<compile_context>
chip_gen: v5e
topology: v5e:2x2
jax: 0.10.0
libtpu: 0.0.40
codegen_flags: <defaults>
</compile_context>

<pallas_src>
import jax
import jax.numpy as jnp
from jax.experimental import pallas as pl
from jax.experimental.pallas import tpu as pltpu

_LANE = 128
_TARGET_ROWS = 256   # aim for >= one v6e/v7x MXU tile in the node dimension


def _round_up(v, m):
    return ((v + m - 1) // m) * m


def _pick_graphs_per_block(num_graphs, nodes_per_graph):
    """Pick how many graphs share one grid block (Mblk = gpb * N rows)."""
    gpb = max(1, min(num_graphs, max(1, _TARGET_ROWS // nodes_per_graph)))
    while gpb > 1 and not (num_graphs % gpb == 0
                           and (gpb * nodes_per_graph) % 8 == 0):
        gpb -= 1
    if num_graphs % gpb != 0 or ((gpb * nodes_per_graph) % 8 != 0
                                 and gpb != num_graphs):
        gpb = num_graphs   # single block == full array dims, always legal
    return gpb


# ----------------------------------------------------------------------------
# Pallas kernels (entire multi-layer forward fused, one grid step = one block
# of graphs packed into a block-diagonal adjacency)
# ----------------------------------------------------------------------------
def _gnn_multi_kernel(x_ref, a_ref, w1_ref, w2_ref, w3_ref, w4_ref, b_ref,
                      x1_ref, x2_ref):
    f32, bf16 = jnp.float32, jnp.bfloat16

    # Block-diagonal 'sum' adjacency (row = dst, col = src), shipped as bf16.
    a_sum = a_ref[0]                                       # (Mblk, Mblk) bf16
    deg = jnp.sum(a_sum.astype(f32), axis=-1, keepdims=True)
    inv_deg = pl.reciprocal(jnp.maximum(deg, 1.0), approx=True)
    a_mean = (a_sum.astype(f32) * inv_deg).astype(bf16)

    # conv1: RGCN-style (mean aggregation), fused [x | agg] @ [W_root; W_rel].
    x = x_ref[...]                                         # (Mblk, Fp) bf16
    agg = jnp.dot(a_mean, x, preferred_element_type=f32).astype(bf16)
    h = jnp.dot(jnp.concatenate([x, agg], axis=-1), w1_ref[...],
                preferred_element_type=f32)
    h = jnp.maximum(h + b_ref[0:1, :], 0.0)

    def graph_conv(h, w_ref, brow):
        # GraphConv ('add' aggregation), fused [h | agg] @ [W_self; W_nbr].
        hb = h.astype(bf16)
        agg = jnp.dot(a_sum, hb, preferred_element_type=f32).astype(bf16)
        out = jnp.dot(jnp.concatenate([hb, agg], axis=-1), w_ref[...],
                      preferred_element_type=f32)
        return jnp.maximum(out + b_ref[brow:brow + 1, :], 0.0)

    h = graph_conv(h, w2_ref, 1)                           # conv2 + ReLU
    x1_ref[...] = h.astype(x1_ref.dtype)                   # x_1 = x.clone()
    h = graph_conv(h, w3_ref, 2)                           # conv3 + ReLU
    h = graph_conv(h, w4_ref, 3)                           # conv4 + ReLU
    x2_ref[...] = h.astype(x2_ref.dtype)                   # x_2 = x.clone()


def _gnn_single_kernel(x_ref, a_ref, w1_ref, w2_ref, b1_ref, b2_ref, out_ref):
    f32, bf16 = jnp.float32, jnp.bfloat16

    a_sum = a_ref[0]
    deg = jnp.sum(a_sum.astype(f32), axis=-1, keepdims=True)
    inv_deg = pl.reciprocal(jnp.maximum(deg, 1.0), approx=True)
    a_mean = (a_sum.astype(f32) * inv_deg).astype(bf16)

    def rgcn(h_bf, w_ref, b_ref):
        agg = jnp.dot(a_mean, h_bf, preferred_element_type=f32).astype(bf16)
        out = jnp.dot(jnp.concatenate([h_bf, agg], axis=-1), w_ref[...],
                      preferred_element_type=f32)
        return jnp.maximum(out + b_ref[...], 0.0)

    h = rgcn(x_ref[...], w1_ref, b1_ref)                   # conv1 + ReLU
    h = rgcn(h.astype(bf16), w2_ref, b2_ref)               # conv2 + ReLU
    out_ref[...] = h.astype(out_ref.dtype)


# ----------------------------------------------------------------------------
# Glue: params, adjacency construction, pallas_call wrappers
# ----------------------------------------------------------------------------
def _glorot(key, fan_in, fan_out):
    scale = jnp.sqrt(2.0 / (fan_in + fan_out)).astype(jnp.float32)
    return scale * jax.random.normal(key, (fan_in, fan_out), jnp.float32)


def _pad2(w, rows, cols):
    return jnp.pad(w, ((0, rows - w.shape[0]), (0, cols - w.shape[1])))


def _pad1(b, cols):
    return jnp.pad(b, (0, cols - b.shape[0]))


def build_block_adjacency(edge_index, num_nodes, graphs_per_block):
    """edge_index (B, 2, E) with rows (src, dst) -> (G, Mblk, Mblk) bf16
    block-diagonal sum-adjacency (row = destination, col = source)."""
    num_graphs = edge_index.shape[0]

    def one(e):
        src, dst = e[0], e[1]
        return jnp.zeros((num_nodes, num_nodes), jnp.float32).at[dst, src].add(1.0)

    a = jax.vmap(one)(edge_index)                              # (B, N, N)
    g = num_graphs // graphs_per_block
    a = a.reshape(g, graphs_per_block, num_nodes, num_nodes)
    eye = jnp.eye(graphs_per_block, dtype=a.dtype)
    blk = a[:, :, None, :, :] * eye[None, :, :, None, None]    # (G, K, K, N, N)
    mblk = graphs_per_block * num_nodes
    blk = blk.transpose(0, 1, 3, 2, 4).reshape(g, mblk, mblk)
    return blk.astype(jnp.bfloat16)


class GNN:
    """JAX/Pallas re-implementation of crowd_nav GNN (graphtohetero).

    __call__ takes a batch of graphs: x (B, N, in_channels) node features and
    edge_index (B, 2, E) per-graph edges, and runs the whole multi-layer
    forward as one fused Pallas kernel over blocks of graphs.
    """

    def __init__(self, in_channels, hidden_channels, out_channels, multi_gnn,
                 key=jax.random.PRNGKey(42)):
        self.multi_gnn = multi_gnn
        self.in_channels = in_channels
        self.hidden = hidden_channels
        self.out = out_channels
        # Lane-padded sizes (lane-dense loads/stores, full-width MXU tiles).
        self.fp = _round_up(in_channels, _LANE)
        self.hp = _round_up(hidden_channels, _LANE)
        self.op = _round_up(out_channels, _LANE)

        ks = jax.random.split(key, 8)
        bf16 = jnp.bfloat16

        # conv1: RGCN-style (in -> hidden). Keep f32 copies for the reference.
        self.w1_root = _glorot(ks[0], in_channels, hidden_channels)
        self.w1_rel = _glorot(ks[1], in_channels, hidden_channels)
        self.b1 = jnp.zeros((hidden_channels,), jnp.float32)
        self.w1_cat = jnp.concatenate(
            [_pad2(self.w1_root, self.fp, self.hp),
             _pad2(self.w1_rel, self.fp, self.hp)], axis=0).astype(bf16)

        if multi_gnn:
            self.w2_self = _glorot(ks[2], hidden_channels, hidden_channels)
            self.w2_nbr = _glorot(ks[3], hidden_channels, hidden_channels)
            self.b2 = jnp.zeros((hidden_channels,), jnp.float32)
            self.w3_self = _glorot(ks[4], hidden_channels, hidden_channels)
            self.w3_nbr = _glorot(ks[5], hidden_channels, hidden_channels)
            self.b3 = jnp.zeros((hidden_channels,), jnp.float32)
            self.w4_self = _glorot(ks[6], hidden_channels, hidden_channels)
            self.w4_nbr = _glorot(ks[7], hidden_channels, hidden_channels)
            self.b4 = jnp.zeros((hidden_channels,), jnp.float32)

            def cat(ws, wn):
                return jnp.concatenate([_pad2(ws, self.hp, self.hp),
                                        _pad2(wn, self.hp, self.hp)],
                                       axis=0).astype(bf16)

            self.w2_cat = cat(self.w2_self, self.w2_nbr)
            self.w3_cat = cat(self.w3_self, self.w3_nbr)
            self.w4_cat = cat(self.w4_self, self.w4_nbr)
            self.b_all = jnp.stack([_pad1(self.b1, self.hp),
                                    _pad1(self.b2, self.hp),
                                    _pad1(self.b3, self.hp),
                                    _pad1(self.b4, self.hp)], axis=0)
        else:
            self.w2_root = _glorot(ks[2], hidden_channels, out_channels)
            self.w2_rel = _glorot(ks[3], hidden_channels, out_channels)
            self.b2 = jnp.zeros((out_channels,), jnp.float32)
            self.w2_cat = jnp.concatenate(
                [_pad2(self.w2_root, self.hp, self.op),
                 _pad2(self.w2_rel, self.hp, self.op)], axis=0).astype(bf16)
            self.b1_pad = _pad1(self.b1, self.hp).reshape(1, self.hp)
            self.b2_pad = _pad1(self.b2, self.op).reshape(1, self.op)

        # Whole forward (adjacency densification + fused Pallas kernel) under
        # one jit so per-call Python/XLA dispatch overhead is paid once.
        self._forward = jax.jit(self._forward_impl)

    def __call__(self, x, edge_index):
        return self._forward(x, edge_index)

    def _forward_impl(self, x, edge_index):
        num_graphs, num_nodes, fin = x.shape
        gpb = _pick_graphs_per_block(num_graphs, num_nodes)
        grid_n = num_graphs // gpb
        mblk = gpb * num_nodes
        m = num_graphs * num_nodes

        # Lane-pad node features; bf16 operands are MXU-native and halve DMA.
        x_flat = jnp.pad(x.reshape(m, fin), ((0, 0), (0, self.fp - fin)))
        x_flat = x_flat.astype(jnp.bfloat16)
        # Per-block block-diagonal 'sum' adjacency (mean derived in-kernel).
        a_blocks = build_block_adjacency(edge_index, num_nodes, gpb)

        const = lambda *_: (0, 0)
        row_blk = lambda g: (g, 0)
        x_spec = pl.BlockSpec((mblk, self.fp), row_blk)
        a_spec = pl.BlockSpec((1, mblk, mblk), lambda g: (g, 0, 0))
        params = pltpu.CompilerParams(dimension_semantics=("parallel",))

        if self.multi_gnn:
            out_spec = pl.BlockSpec((mblk, self.hp), row_blk)
            x1, x2 = pl.pallas_call(
                _gnn_multi_kernel,
                grid=(grid_n,),
                in_specs=[
                    x_spec, a_spec,
                    pl.BlockSpec((2 * self.fp, self.hp), const),
                    pl.BlockSpec((2 * self.hp, self.hp), const),
                    pl.BlockSpec((2 * self.hp, self.hp), const),
                    pl.BlockSpec((2 * self.hp, self.hp), const),
                    pl.BlockSpec((4, self.hp), const),
                ],
                out_specs=(out_spec, out_spec),
                out_shape=(jax.ShapeDtypeStruct((m, self.hp), jnp.float32),
                           jax.ShapeDtypeStruct((m, self.hp), jnp.float32)),
                compiler_params=params,
            )(x_flat, a_blocks, self.w1_cat, self.w2_cat, self.w3_cat,
              self.w4_cat, self.b_all)
            x1 = x1[:, :self.hidden].reshape(num_graphs, num_nodes, self.hidden)
            x2 = x2[:, :self.hidden].reshape(num_graphs, num_nodes, self.hidden)
            return x1, x2
        else:
            out = pl.pallas_call(
                _gnn_single_kernel,
                grid=(grid_n,),
                in_specs=[
                    x_spec, a_spec,
                    pl.BlockSpec((2 * self.fp, self.hp), const),
                    pl.BlockSpec((2 * self.hp, self.op), const),
                    pl.BlockSpec((1, self.hp), const),
                    pl.BlockSpec((1, self.op), const),
                ],
                out_specs=pl.BlockSpec((mblk, self.op), row_blk),
                out_shape=jax.ShapeDtypeStruct((m, self.op), jnp.float32),
                compiler_params=params,
            )(x_flat, a_blocks, self.w1_cat, self.w2_cat,
              self.b1_pad, self.b2_pad)
            return out[:, :self.out].reshape(num_graphs, num_nodes, self.out)


# ----------------------------------------------------------------------------
# Pure-JAX reference (mirrors the kernel's mixed precision: bf16 matmul
# operands, f32 accumulation / bias / ReLU) for a correctness check.
# ----------------------------------------------------------------------------
def _ref_forward(model, x, edge_index):
    f32, bf16 = jnp.float32, jnp.bfloat16

    def dot(a, b):
        return jnp.dot(a.astype(bf16), b.astype(bf16),
                       preferred_element_type=f32)

    def one_graph(xg, eg):
        n = xg.shape[0]
        a_sum = jnp.zeros((n, n), f32).at[eg[1], eg[0]].add(1.0)
        deg = jnp.sum(a_sum, axis=-1, keepdims=True)
        a_mean = a_sum / jnp.maximum(deg, 1.0)

        h = jnp.maximum(dot(xg, model.w1_root)
                        + dot(dot(a_mean, xg), model.w1_rel) + model.b1, 0.0)
        if model.multi_gnn:
            def gc(h, ws, wn, b):
                return jnp.maximum(dot(h, ws) + dot(dot(a_sum, h), wn) + b, 0.0)
            h = gc(h, model.w2_self, model.w2_nbr, model.b2)
            x1 = h
            h = gc(h, model.w3_self, model.w3_nbr, model.b3)
            h = gc(h, model.w4_self, model.w4_nbr, model.b4)
            return x1, h
        else:
            return jnp.maximum(dot(h, model.w2_root)
                               + dot(dot(a_mean, h), model.w2_rel)
                               + model.b2, 0.0)

    return jax.vmap(one_graph)(x, edge_index)


if __name__ == "__main__":
    key = jax.random.PRNGKey(0)
    k_x, k_e, k_param = jax.random.split(key, 3)

    num_graphs = 64        # batch of crowd-nav scenes/timesteps
    num_nodes = 8          # e.g. 1 robot + 7 humans per graph
    num_edges = 24
    in_channels = 7
    hidden_channels = 32
    out_channels = 32

    x = jax.random.normal(k_x, (num_graphs, num_nodes, in_channels), jnp.float32)
    # Deterministic random per-graph edges (src, dst); duplicates / self-loops
    # are allowed and counted per-edge, matching PyG scatter semantics.
    edge_index = jax.random.randint(
        k_e, (num_graphs, 2, num_edges), 0, num_nodes, dtype=jnp.int32)

    # multi_gnn = True branch: returns (x_1, x_2) taps.
    model_multi = GNN(in_channels, hidden_channels, out_channels,
                      multi_gnn=True, key=k_param)
    x1, x2 = model_multi(x, edge_index)
    jax.block_until_ready((x1, x2))
    r1, r2 = _ref_forward(model_multi, x, edge_index)
    assert x1.shape == (num_graphs, num_nodes, hidden_channels)
    assert x2.shape == (num_graphs, num_nodes, hidden_channels)
    assert jnp.allclose(x1, r1, atol=3e-2, rtol=3e-2), float(jnp.max(jnp.abs(x1 - r1)))
    assert jnp.allclose(x2, r2, atol=3e-2, rtol=3e-2), float(jnp.max(jnp.abs(x2 - r2)))

    # multi_gnn = False branch.
    model_single = GNN(in_channels, hidden_channels, out_channels,
                       multi_gnn=False, key=k_param)
    y = model_single(x, edge_index)
    jax.block_until_ready(y)
    ry = _ref_forward(model_single, x, edge_index)
    assert y.shape == (num_graphs, num_nodes, out_channels)
    assert jnp.allclose(y, ry, atol=3e-2, rtol=3e-2), float(jnp.max(jnp.abs(y - ry)))

    print("KERNEL_OK")
</pallas_src>

<mosaic_0001>
module attributes {stable_mosaic.version = 11 : i64} {
  func.func @_gnn_multi_kernel(%arg0: i32, %arg1: memref<256x128xbf16, #tpu.memory_space<vmem>>, %arg2: memref<1x256x256xbf16, #tpu.memory_space<vmem>>, %arg3: memref<256x128xbf16, #tpu.memory_space<vmem>>, %arg4: memref<256x128xbf16, #tpu.memory_space<vmem>>, %arg5: memref<256x128xbf16, #tpu.memory_space<vmem>>, %arg6: memref<256x128xbf16, #tpu.memory_space<vmem>>, %arg7: memref<4x128xf32, #tpu.memory_space<vmem>>, %arg8: memref<256x128xf32, #tpu.memory_space<vmem>>, %arg9: memref<256x128xf32, #tpu.memory_space<vmem>>) attributes {dimension_semantics = [#tpu.dimension_semantics<parallel>], iteration_bounds = array<i64: 2>, scalar_prefetch = 0 : i64, scratch_operands = 0 : i64, tpu.core_type = #tpu.core_type<tc>, window_params = [{transform_indices = @transform_0, window_bounds = array<i64: 256, 128>}, {transform_indices = @transform_1, window_bounds = array<i64: 1, 256, 256>}, {pipeline_mode = #tpu.pipeline_mode<synchronous>, transform_indices = @transform_2, window_bounds = array<i64: 256, 128>}, {pipeline_mode = #tpu.pipeline_mode<synchronous>, transform_indices = @transform_3, window_bounds = array<i64: 256, 128>}, {pipeline_mode = #tpu.pipeline_mode<synchronous>, transform_indices = @transform_4, window_bounds = array<i64: 256, 128>}, {pipeline_mode = #tpu.pipeline_mode<synchronous>, transform_indices = @transform_5, window_bounds = array<i64: 256, 128>}, {pipeline_mode = #tpu.pipeline_mode<synchronous>, transform_indices = @transform_6, window_bounds = array<i64: 4, 128>}, {transform_indices = @transform_7, window_bounds = array<i64: 256, 128>}, {transform_indices = @transform_8, window_bounds = array<i64: 256, 128>}]} {
    %c0 = arith.constant 0 : index
    %c0_0 = arith.constant 0 : index
    %c0_1 = arith.constant 0 : index
    %0 = vector.load %arg2[%c0, %c0_0, %c0_1] : memref<1x256x256xbf16, #tpu.memory_space<vmem>>, vector<1x256x256xbf16>
    %1 = vector.shape_cast %0 : vector<1x256x256xbf16> to vector<256x256xbf16>
    %2 = arith.extf %1 : vector<256x256xbf16> to vector<256x256xf32>
    %cst = arith.constant dense<0.000000e+00> : vector<256xf32>
    %3 = vector.multi_reduction <add>, %2, %cst [1] : vector<256x256xf32> to vector<256xf32>
    %4 = vector.shape_cast %3 : vector<256xf32> to vector<256x1xf32>
    %cst_2 = arith.constant 1.000000e+00 : f32
    %5 = vector.broadcast %cst_2 : f32 to vector<256x1xf32>
    %6 = arith.maximumf %4, %5 : vector<256x1xf32>
    %7 = tpu.reciprocal %6 {approx = true} : vector<256x1xf32> -> vector<256x1xf32>
    %8 = arith.extf %1 : vector<256x256xbf16> to vector<256x256xf32>
    %9 = vector.broadcast %7 : vector<256x1xf32> to vector<256x256xf32>
    %10 = arith.mulf %8, %9 : vector<256x256xf32>
    %11 = arith.truncf %10 : vector<256x256xf32> to vector<256x256xbf16>
    %c0_3 = arith.constant 0 : index
    %c0_4 = arith.constant 0 : index
    %12 = vector.load %arg1[%c0_3, %c0_4] : memref<256x128xbf16, #tpu.memory_space<vmem>>, vector<256x128xbf16>
    %cst_5 = arith.constant dense<0.000000e+00> : vector<256x128xf32>
    %13 = tpu.matmul %11, %12, %cst_5 {dimension_numbers = #tpu.dot_dimension_numbers<[1], [0], [0], [1], [0, 0, 1, 1], [], []>} : vector<256x256xbf16>, vector<256x128xbf16>, vector<256x128xf32> -> vector<256x128xf32>
    %14 = arith.truncf %13 : vector<256x128xf32> to vector<256x128xbf16>
    %15 = tpu.concatenate %12, %14 in 1 : vector<256x128xbf16>, vector<256x128xbf16> -> vector<256x256xbf16>
    %c0_6 = arith.constant 0 : index
    %c0_7 = arith.constant 0 : index
    %16 = vector.load %arg3[%c0_6, %c0_7] : memref<256x128xbf16, #tpu.memory_space<vmem>>, vector<256x128xbf16>
    %cst_8 = arith.constant dense<0.000000e+00> : vector<256x128xf32>
    %17 = tpu.matmul %15, %16, %cst_8 {dimension_numbers = #tpu.dot_dimension_numbers<[1], [0], [0], [1], [0, 0, 1, 1], [], []>} : vector<256x256xbf16>, vector<256x128xbf16>, vector<256x128xf32> -> vector<256x128xf32>
    %c0_9 = arith.constant 0 : index
    %c0_10 = arith.constant 0 : index
    %18 = vector.load %arg7[%c0_9, %c0_10] : memref<4x128xf32, #tpu.memory_space<vmem>>, vector<1x128xf32>
    %19 = vector.broadcast %18 : vector<1x128xf32> to vector<256x128xf32>
    %20 = arith.addf %17, %19 : vector<256x128xf32>
    %cst_11 = arith.constant 0.000000e+00 : f32
    %21 = vector.broadcast %cst_11 : f32 to vector<256x128xf32>
    %22 = arith.maximumf %20, %21 : vector<256x128xf32>
    %23 = arith.truncf %22 : vector<256x128xf32> to vector<256x128xbf16>
    %cst_12 = arith.constant dense<0.000000e+00> : vector<256x128xf32>
    %24 = tpu.matmul %1, %23, %cst_12 {dimension_numbers = #tpu.dot_dimension_numbers<[1], [0], [0], [1], [0, 0, 1, 1], [], []>} : vector<256x256xbf16>, vector<256x128xbf16>, vector<256x128xf32> -> vector<256x128xf32>
    %25 = arith.truncf %24 : vector<256x128xf32> to vector<256x128xbf16>
    %26 = tpu.concatenate %23, %25 in 1 : vector<256x128xbf16>, vector<256x128xbf16> -> vector<256x256xbf16>
    %c0_13 = arith.constant 0 : index
    %c0_14 = arith.constant 0 : index
    %27 = vector.load %arg4[%c0_13, %c0_14] : memref<256x128xbf16, #tpu.memory_space<vmem>>, vector<256x128xbf16>
    %cst_15 = arith.constant dense<0.000000e+00> : vector<256x128xf32>
    %28 = tpu.matmul %26, %27, %cst_15 {dimension_numbers = #tpu.dot_dimension_numbers<[1], [0], [0], [1], [0, 0, 1, 1], [], []>} : vector<256x256xbf16>, vector<256x128xbf16>, vector<256x128xf32> -> vector<256x128xf32>
    %c1 = arith.constant 1 : index
    %c0_16 = arith.constant 0 : index
    %29 = vector.load %arg7[%c1, %c0_16] : memref<4x128xf32, #tpu.memory_space<vmem>>, vector<1x128xf32>
    %30 = vector.broadcast %29 : vector<1x128xf32> to vector<256x128xf32>
    %31 = arith.addf %28, %30 : vector<256x128xf32>
    %cst_17 = arith.constant 0.000000e+00 : f32
    %32 = vector.broadcast %cst_17 : f32 to vector<256x128xf32>
    %33 = arith.maximumf %31, %32 : vector<256x128xf32>
    %c0_18 = arith.constant 0 : index
    %c0_19 = arith.constant 0 : index
    %34 = vector.load %arg8[%c0_18, %c0_19] : memref<256x128xf32, #tpu.memory_space<vmem>>, vector<256x128xf32>
    tpu.vector_store %arg8[%c0_18, %c0_19], %33 {strides = array<i32>} : memref<256x128xf32, #tpu.memory_space<vmem>>, vector<256x128xf32>,
    %35 = arith.truncf %33 : vector<256x128xf32> to vector<256x128xbf16>
    %cst_20 = arith.constant dense<0.000000e+00> : vector<256x128xf32>
    %36 = tpu.matmul %1, %35, %cst_20 {dimension_numbers = #tpu.dot_dimension_numbers<[1], [0], [0], [1], [0, 0, 1, 1], [], []>} : vector<256x256xbf16>, vector<256x128xbf16>, vector<256x128xf32> -> vector<256x128xf32>
    %37 = arith.truncf %36 : vector<256x128xf32> to vector<256x128xbf16>
    %38 = tpu.concatenate %35, %37 in 1 : vector<256x128xbf16>, vector<256x128xbf16> -> vector<256x256xbf16>
    %c0_21 = arith.constant 0 : index
    %c0_22 = arith.constant 0 : index
    %39 = vector.load %arg5[%c0_21, %c0_22] : memref<256x128xbf16, #tpu.memory_space<vmem>>, vector<256x128xbf16>
    %cst_23 = arith.constant dense<0.000000e+00> : vector<256x128xf32>
    %40 = tpu.matmul %38, %39, %cst_23 {dimension_numbers = #tpu.dot_dimension_numbers<[1], [0], [0], [1], [0, 0, 1, 1], [], []>} : vector<256x256xbf16>, vector<256x128xbf16>, vector<256x128xf32> -> vector<256x128xf32>
    %c2 = arith.constant 2 : index
    %c0_24 = arith.constant 0 : index
    %41 = vector.load %arg7[%c2, %c0_24] : memref<4x128xf32, #tpu.memory_space<vmem>>, vector<1x128xf32>
    %42 = vector.broadcast %41 : vector<1x128xf32> to vector<256x128xf32>
    %43 = arith.addf %40, %42 : vector<256x128xf32>
    %cst_25 = arith.constant 0.000000e+00 : f32
    %44 = vector.broadcast %cst_25 : f32 to vector<256x128xf32>
    %45 = arith.maximumf %43, %44 : vector<256x128xf32>
    %46 = arith.truncf %45 : vector<256x128xf32> to vector<256x128xbf16>
    %cst_26 = arith.constant dense<0.000000e+00> : vector<256x128xf32>
    %47 = tpu.matmul %1, %46, %cst_26 {dimension_numbers = #tpu.dot_dimension_numbers<[1], [0], [0], [1], [0, 0, 1, 1], [], []>} : vector<256x256xbf16>, vector<256x128xbf16>, vector<256x128xf32> -> vector<256x128xf32>
    %48 = arith.truncf %47 : vector<256x128xf32> to vector<256x128xbf16>
    %49 = tpu.concatenate %46, %48 in 1 : vector<256x128xbf16>, vector<256x128xbf16> -> vector<256x256xbf16>
    %c0_27 = arith.constant 0 : index
    %c0_28 = arith.constant 0 : index
    %50 = vector.load %arg6[%c0_27, %c0_28] : memref<256x128xbf16, #tpu.memory_space<vmem>>, vector<256x128xbf16>
    %cst_29 = arith.constant dense<0.000000e+00> : vector<256x128xf32>
    %51 = tpu.matmul %49, %50, %cst_29 {dimension_numbers = #tpu.dot_dimension_numbers<[1], [0], [0], [1], [0, 0, 1, 1], [], []>} : vector<256x256xbf16>, vector<256x128xbf16>, vector<256x128xf32> -> vector<256x128xf32>
    %c3 = arith.constant 3 : index
    %c0_30 = arith.constant 0 : index
    %52 = vector.load %arg7[%c3, %c0_30] : memref<4x128xf32, #tpu.memory_space<vmem>>, vector<1x128xf32>
    %53 = vector.broadcast %52 : vector<1x128xf32> to vector<256x128xf32>
    %54 = arith.addf %51, %53 : vector<256x128xf32>
    %cst_31 = arith.constant 0.000000e+00 : f32
    %55 = vector.broadcast %cst_31 : f32 to vector<256x128xf32>
    %56 = arith.maximumf %54, %55 : vector<256x128xf32>
    %c0_32 = arith.constant 0 : index
    %c0_33 = arith.constant 0 : index
    %57 = vector.load %arg9[%c0_32, %c0_33] : memref<256x128xf32, #tpu.memory_space<vmem>>, vector<256x128xf32>
    tpu.vector_store %arg9[%c0_32, %c0_33], %56 {strides = array<i32>} : memref<256x128xf32, #tpu.memory_space<vmem>>, vector<256x128xf32>,
    return
  }
  func.func @transform_0(%arg0: i32) -> (i32, i32) {
    %c0_i32 = arith.constant 0 : i32
    %c0_i32_0 = arith.constant 0 : i32
    return %arg0, %c0_i32 : i32, i32
  }
  func.func @transform_1(%arg0: i32) -> (i32, i32, i32) {
    %c0_i32 = arith.constant 0 : i32
    %c0_i32_0 = arith.constant 0 : i32
    %c0_i32_1 = arith.constant 0 : i32
    return %arg0, %c0_i32, %c0_i32_0 : i32, i32, i32
  }
  func.func @transform_2(%arg0: i32) -> (i32, i32) {
    %c0_i32 = arith.constant 0 : i32
    %c0_i32_0 = arith.constant 0 : i32
    %c0_i32_1 = arith.constant 0 : i32
    return %c0_i32, %c0_i32_0 : i32, i32
  }
  func.func @transform_3(%arg0: i32) -> (i32, i32) {
    %c0_i32 = arith.constant 0 : i32
    %c0_i32_0 = arith.constant 0 : i32
    %c0_i32_1 = arith.constant 0 : i32
    return %c0_i32, %c0_i32_0 : i32, i32
  }
  func.func @transform_4(%arg0: i32) -> (i32, i32) {
    %c0_i32 = arith.constant 0 : i32
    %c0_i32_0 = arith.constant 0 : i32
    %c0_i32_1 = arith.constant 0 : i32
    return %c0_i32, %c0_i32_0 : i32, i32
  }
  func.func @transform_5(%arg0: i32) -> (i32, i32) {
    %c0_i32 = arith.constant 0 : i32
    %c0_i32_0 = arith.constant 0 : i32
    %c0_i32_1 = arith.constant 0 : i32
    return %c0_i32, %c0_i32_0 : i32, i32
  }
  func.func @transform_6(%arg0: i32) -> (i32, i32) {
    %c0_i32 = arith.constant 0 : i32
    %c0_i32_0 = arith.constant 0 : i32
    %c0_i32_1 = arith.constant 0 : i32
    return %c0_i32, %c0_i32_0 : i32, i32
  }
  func.func @transform_7(%arg0: i32) -> (i32, i32) {
    %c0_i32 = arith.constant 0 : i32
    %c0_i32_0 = arith.constant 0 : i32
    return %arg0, %c0_i32 : i32, i32
  }
  func.func @transform_8(%arg0: i32) -> (i32, i32) {
    %c0_i32 = arith.constant 0 : i32
    %c0_i32_0 = arith.constant 0 : i32
    return %arg0, %c0_i32 : i32, i32
  }
}

</mosaic_0001>

<bundles_post_ra>
// kernel: _forward_impl.1
= control target key start
LH: loop header
LB: loop body
LE: loop exit
PB: predicated region body
PF: predicated region fallthrough
CT: control target
= control target key end

     0   :  { %s4824_s27 = smov 0   ;;  %s6410_s0 = inlined_call_operand.vmem [shape: bf16[512,128], index: 0, kind: input, shape index: {}]   ;;  %s6411_s1 = inlined_call_operand.vmem [shape: bf16[2,256,256], index: 1, kind: input, shape index: {}]   ;;  %s6412_s2 = inlined_call_operand.vmem [shape: bf16[256,128], index: 2, kind: input, shape index: {}]   ;;  %s6413_s3 = inlined_call_operand.vmem [shape: bf16[256,128], index: 3, kind: input, shape index: {}]   ;;  %s6414_s4 = inlined_call_operand.vmem [shape: bf16[256,128], index: 4, kind: input, shape index: {}]   ;;  %s6415_s5 = inlined_call_operand.vmem [shape: bf16[256,128], index: 5, kind: input, shape index: {}]   ;;  %s6416_s6 = inlined_call_operand.vmem [shape: f32[4,128], index: 6, kind: input, shape index: {}]   ;;  %s6417_s7 = inlined_call_operand.vmem [shape: f32[512,128], index: 7, kind: output, shape index: {0}]   ;;  %s6418_s8 = inlined_call_operand.vmem [shape: f32[512,128], index: 8, kind: output, shape index: {1}]  }
   0x1 LB: > { %s4117_s28 = sadd.s32 4294967295, %s4777_s27   ;;  %p4121_p0 = scmp.ge.s32.totalorder %s4777_s27, 1  ;;  %s4777_s27 = sphi %s4824_s27, %s19_s27  }
   0x2   : > { %p276_p1 = scmp.lt.s32.totalorder %s4777_s27, 3 }
   0x4   : > { %p277_p2 = pnand %p4121_p0, %p276_p1 }
   0x6   : > { %280 = sbr.rel (%p277_p2) target bundleno = 2374 (0x946), region = 48 }
   0xb   : > { %p326_p3 = scmp.lt.s32.totalorder %s4117_s28, 1  ;;  %s4122_s29 = sshll.u32 %s4117_s28, 5 }
   0xc   : > { %p321_p4 = scmp.lt.s32.totalorder %s4122_s29, 63 }
   0xd   : > { %s6518_s28 = smov (!%p326_p3, %s4117_s28), 1 }
   0xe   : > { %s6520_s29 = smov (!%p321_p4, %s4122_s29), 63  ;;  %s4580_s30 = sshll.u32 %s6518_s28, 8 }
   0xf   : > { %s4837_s11 = scalar_lea.vmem %s6411_s1, %s4580_s30  ;;  %s4123_s12 = sshll.u32 %s6520_s29, 2 }
  0x10   : > { %v4841_v0 = vld [vmem:[%s4837_s11] sm:$0xff]  ;;  %v4844_v1 = vld [vmem:[%s4837_s11 + $0x10] sm:$0xff]  ;;  %v4851_v6 = vld [vmem:[%s4837_s11 + $0x8] sm:$0xff]  ;;  %s4862_s15 = scalar_lea.vmem %s6410_s0, %s4123_s12  ;;  %s4127_s25 = sshll.u32 %s6520_s29, 3 }
  0x11   : > { %v375_v2 = vunpack.c.l.bf16 %v4841_v0  ;;  %v376_v3 = vunpack.c.h.bf16 %v4841_v0  ;;  %v379_v4 = vunpack.c.l.bf16 %v4844_v1  ;;  %v380_v5 = vunpack.c.h.bf16 %v4844_v1  ;;  %v4854_v7 = vld [vmem:[%s4837_s11 + $0x20] sm:$0xff]  ;;  %v4857_v8 = vld [vmem:[%s4837_s11 + $0x18] sm:$0xff]  ;;  %v4876_v14 = vld [vmem:[%s4837_s11 + $0x28] sm:$0xff]  ;;  %s5825_s28 = scalar_lea.vmem %s6417_s7, %s4127_s25 }
  0x12   : > { %v383_v11 = vunpack.c.l.bf16 %v4854_v7  ;;  %v384_v12 = vunpack.c.h.bf16 %v4854_v7  ;;  %v377_v13 = vunpack.c.l.bf16 %v4851_v6  ;;  %v378_v15 = vunpack.c.h.bf16 %v4851_v6  ;;  %v4886_v19 = vld [vmem:[%s4862_s15 + $0x38] sm:$0xff]  ;;  %v4893_v23 = vld [vmem:[%s4862_s15 + $0x30] sm:$0xff]  ;;  %v4916_v30 = vld [vmem:[%s4862_s15 + $0x28] sm:$0xff] }
  0x13   : > { %v439_v9 = vadd.f32 %v376_v3, %v375_v2  ;;  %v445_v10 = vadd.f32 %v380_v5, %v379_v4  ;;  %v381_v16 = vunpack.c.l.bf16 %v4857_v8  ;;  %v382_v17 = vunpack.c.h.bf16 %v4857_v8  ;;  %v4628_v20 = vld [vmem:[%s4862_s15 + $0x78] sm:$0xff]  ;;  %823 = vmatpush.bf16.msra.mxu0 %v4886_v19  ;;  %v4627_v24 = vld [vmem:[%s4862_s15 + $0x70] sm:$0xff]  ;;  %v4919_v31 = vld [vmem:[%s4837_s11 + $0x40] sm:$0xff] }
  0x14   : > { %v451_v18 = vadd.f32 %v384_v12, %v383_v11  ;;  %v385_v21 = vunpack.c.l.bf16 %v4876_v14  ;;  %v386_v22 = vunpack.c.h.bf16 %v4876_v14  ;;  %912 = vmatpush.bf16.msra.mxu1 %v4628_v20  ;;  %v442_v25 = vadd.f32 %v378_v15, %v377_v13  ;;  %v4905_v27 = vld [vmem:[%s4837_s11 + $0x38] sm:$0xff]  ;;  %v4908_v28 = vld [vmem:[%s4837_s11 + $0x30] sm:$0xff]  ;;  %v4922_v32 = vld [vmem:[%s4862_s15 + $0x68] sm:$0xff] }
  0x15   : > { %440 = vadd.xlane.f32.xlu0 %v439_v9  ;;  %446 = vadd.xlane.f32.xlu1 %v445_v10  ;;  %v448_v26 = vadd.f32 %v382_v17, %v381_v16  ;;  %v389_v33 = vunpack.c.l.bf16 %v4905_v27  ;;  %v6445_v34 = vunpack.c.h.bf16 %v4905_v27  ;;  %v387_v35 = vunpack.c.l.bf16 %v4908_v28  ;;  %v4941_v41 = vld [vmem:[%s4837_s11 + $0x48] sm:$0xff]  ;;  %v4944_v42 = vld [vmem:[%s4837_s11 + $0x50] sm:$0xff]  ;;  %v4951_v44 = vld [vmem:[%s4837_s11 + $0x58] sm:$0xff] }
  0x16   : > { %452 = vadd.xlane.f32.xlu2 %v451_v18  ;;  %v454_v29 = vadd.f32 %v386_v22, %v385_v21  ;;  %v6448_v36 = vunpack.c.h.bf16 %v4908_v28  ;;  %v6442_v37 = vunpack.c.l.bf16 %v4919_v31  ;;  %v6440_v38 = vunpack.c.h.bf16 %v4919_v31  ;;  %v4968_v53 = vld [vmem:[%s4837_s11 + $0x68] sm:$0xff]  ;;  %v4971_v54 = vld [vmem:[%s4837_s11 + $0x60] sm:$0xff]  ;;  %v4990_v62 = vld [vmem:[%s4837_s11 + $0x70] sm:$0xff] }
  0x17   : > { %824 = vmatpush.bf16.msra.mxu0 %v4893_v23  ;;  %v460_v39 = vadd.f32 %v6445_v34, %v389_v33  ;;  %v6441_v45 = vunpack.c.l.bf16 %v4941_v41  ;;  %v6435_v46 = vunpack.c.h.bf16 %v4941_v41  ;;  %v6434_v47 = vunpack.c.l.bf16 %v4944_v42  ;;  %v4993_v63 = vld [vmem:[%s4837_s11 + $0x78] sm:$0xff]  ;;  %v4996_v9 = vld [vmem:[%s4862_s15 + $0x20] sm:$0xff] }
  0x18   : > { %913 = vmatpush.bf16.msra.mxu1 %v4627_v24  ;;  %v457_v40 = vadd.f32 %v6448_v36, %v387_v35  ;;  %v463_v43 = vadd.f32 %v6440_v38, %v6442_v37  ;;  %v6432_v48 = vunpack.c.h.bf16 %v4944_v42  ;;  %v6433_v49 = vunpack.c.l.bf16 %v4951_v44  ;;  %v4999_v10 = vld [vmem:[%s4862_s15 + $0x60] sm:$0xff]  ;;  %v4631_v37 = vld [vmem:[%s6412_s2 + $0x10] sm:$0xff]  ;;  %v5134_v36 = vld [vmem:[%s4837_s11 + $0xb8] sm:$0xff] }
  0x19   : > { %v6427_v50 = vunpack.c.h.bf16 %v4951_v44  ;;  %v466_v51 = vadd.f32 %v6435_v46, %v6441_v45  ;;  %v6425_v56 = vunpack.c.l.bf16 %v4968_v53  ;;  %v6423_v57 = vunpack.c.h.bf16 %v4968_v53  ;;  %v4633_v46 = vld [vmem:[%s6412_s2 + $0x20] sm:$0xff] }
  0x1a   : > { %v469_v52 = vadd.f32 %v6432_v48, %v6434_v47  ;;  %v6426_v58 = vunpack.c.l.bf16 %v4971_v54  ;;  %v6424_v59 = vunpack.c.h.bf16 %v4971_v54  ;;  %v6422_v18 = vunpack.c.l.bf16 %v4990_v62  ;;  %v4634_v48 = vld [vmem:[%s6412_s2 + $0x28] sm:$0xff] }
  0x1b   : > { %825 = vmatpush.bf16.msra.mxu0 %v4916_v30  ;;  %v472_v55 = vadd.f32 %v6427_v50, %v6433_v49  ;;  %v478_v60 = vadd.f32 %v6423_v57, %v6425_v56  ;;  %v6420_v20 = vunpack.c.h.bf16 %v4990_v62  ;;  %v6421_v24 = vunpack.c.l.bf16 %v4993_v63  ;;  %v4636_v56 = vld [vmem:[%s6412_s2 + $0x38] sm:$0xff]  ;;  %v5072_v50 = vld [vmem:[%s4837_s11 + $0x90] sm:$0xff] }
  0x1c   : > { %914 = vmatpush.bf16.msra.mxu1 %v4922_v32  ;;  %v475_v61 = vadd.f32 %v6424_v59, %v6426_v58  ;;  %v5069_v58 = vld [vmem:[%s4837_s11 + $0x98] sm:$0xff]  ;;  %1259 = vmatpush.bf16.msra.mxu2 %v4636_v56  ;;  %v421_v0 = vunpack.c.l.bf16 %v5134_v36 }
  0x1d   : > { %443 = vadd.xlane.f32.xlu0 %v442_v25  ;;  %449 = vadd.xlane.f32.xlu1 %v448_v26  ;;  %v6419_v25 = vunpack.c.h.bf16 %v4993_v63  ;;  %v481_v26 = vadd.f32 %v6420_v20, %v6422_v18  ;;  %v5053_v18 = vld [vmem:[%s4862_s15 + $0x40] sm:$0xff] }
  0x1e   : > { %455 = vadd.xlane.f32.xlu2 %v454_v29 }
  0x1f   : > { %826 = vmatpush.bf16.msra.mxu0 %v4996_v9  ;;  %v484_v29 = vadd.f32 %v6419_v25, %v6421_v24  ;;  %v5050_v24 = vld [vmem:[%s4862_s15] sm:$0xff] }
  0x20   : > { %915 = vmatpush.bf16.msra.mxu1 %v4999_v10 }
  0x25   : > { %461 = vadd.xlane.f32.xlu1 %v460_v39  ;;  %458 = vadd.xlane.f32.xlu0 %v457_v40  ;;  %v5016_v39 = vld [vmem:[%s4862_s15 + $0x18] sm:$0xff] }
  0x26   : > { %464 = vadd.xlane.f32.xlu2 %v463_v43  ;;  %v5019_v40 = vld [vmem:[%s4862_s15 + $0x58] sm:$0xff]  ;;  %827 = vmatpush.bf16.msra.mxu0 %v5016_v39  ;;  %v5024_v43 = vld [vmem:[%s4862_s15 + $0x10] sm:$0xff] }
  0x27   : > { %916 = vmatpush.bf16.msra.mxu1 %v5019_v40 }
  0x2a   : > { %828 = vmatpush.bf16.msra.mxu0 %v5024_v43 }
  0x2d   : > { %467 = vadd.xlane.f32.xlu0 %v466_v51  ;;  %470 = vadd.xlane.f32.xlu1 %v469_v52  ;;  %v5027_v51 = vld [vmem:[%s4862_s15 + $0x50] sm:$0xff]  ;;  %v5032_v52 = vld [vmem:[%s4862_s15 + $0x8] sm:$0xff] }
  0x2e   : > { %473 = vadd.xlane.f32.xlu2 %v472_v55  ;;  %917 = vmatpush.bf16.msra.mxu1 %v5027_v51  ;;  %v5035_v55 = vld [vmem:[%s4862_s15 + $0x48] sm:$0xff] }
  0x2f   : > { %829 = vmatpush.bf16.msra.mxu0 %v5032_v52 }
  0x32   : > { %918 = vmatpush.bf16.msra.mxu1 %v5035_v55 }
  0x33   : > { %830 = vmatpush.bf16.msra.mxu0 %v5050_v24 }
  0x35   : > { %479 = vadd.xlane.f32.xlu1 %v478_v60  ;;  %476 = vadd.xlane.f32.xlu0 %v475_v61  ;;  %v5038_v60 = vld [vmem:[%s4837_s11 + $0x88] sm:$0xff] }
  0x36   : > { %482 = vadd.xlane.f32.xlu2 %v481_v26  ;;  %v6430_v61 = vunpack.c.l.bf16 %v5038_v60  ;;  %v6428_v26 = vunpack.c.h.bf16 %v5038_v60  ;;  %919 = vmatpush.bf16.msra.mxu1 %v5053_v18 }
  0x38   : > { %v490_v57 = vadd.f32 %v6428_v26, %v6430_v61  ;;  %v4635_v26 = vld [vmem:[%s6412_s2 + $0x30] sm:$0xff]  ;;  %v6437_v61 = vunpack.c.h.bf16 %v5072_v50 }
  0x39   : > { %1260 = vmatpush.bf16.msra.mxu2 %v4635_v26  ;;  %v5099_v26 = vld [vmem:[%s4837_s11 + $0xa0] sm:$0xff] }
  0x3d   : > { %485 = vadd.xlane.f32.xlu0 %v484_v29  ;;  %v5043_v29 = vld [vmem:[%s4837_s11 + $0x80] sm:$0xff]  ;;  %1261 = vmatpush.bf16.msra.mxu2 %v4634_v48  ;;  %v6443_v48 = vunpack.c.h.bf16 %v5099_v26 }
  0x3e   : > { %v6431_v25 = vunpack.c.l.bf16 %v5043_v29  ;;  %v6429_v20 = vunpack.c.h.bf16 %v5043_v29  ;;  %491 = vadd.xlane.f32.xlu2 %v490_v57  ;;  %v6439_v57 = vunpack.c.l.bf16 %v5069_v58 }
  0x40   : > { %v487_v59 = vadd.f32 %v6429_v20, %v6431_v25  ;;  %v6438_v20 = vunpack.c.l.bf16 %v5072_v50 }
  0x41   : > { %1262 = vmatpush.bf16.msra.mxu2 %v4633_v46 }
  0x42   : > { %488 = vadd.xlane.f32.xlu1 %v487_v59  ;;  %v6436_v59 = vunpack.c.h.bf16 %v5069_v58  ;;  %v493_v56 = vadd.f32 %v6437_v61, %v6438_v20  ;;  %v4632_v61 = vld [vmem:[%s6412_s2 + $0x18] sm:$0xff]  ;;  %v5102_v20 = vld [vmem:[%s4837_s11 + $0xa8] sm:$0xff] }
  0x44   : > { %v496_v25 = vadd.f32 %v6436_v59, %v6439_v57 }
  0x45   : > { %494 = vadd.xlane.f32.xlu0 %v493_v56  ;;  %v6446_v56 = vunpack.c.h.bf16 %v5102_v20  ;;  %1263 = vmatpush.bf16.msra.mxu2 %v4632_v61 }
  0x49   : > { %1264 = vmatpush.bf16.msra.mxu2 %v4631_v37 }
  0x4a   : > { %497 = vadd.xlane.f32.xlu1 %v496_v25  ;;  %v6444_v25 = vunpack.c.l.bf16 %v5099_v26 }
  0x4c   : > { %v499_v46 = vadd.f32 %v6443_v48, %v6444_v25 }
  0x4e   : > { %500 = vadd.xlane.f32.xlu2 %v499_v46 }
  0x88   : > { %v441_v49 = vpop.xlane.xlu0 %440  ;;  %v447_v59 = vpop.xlane.xlu1 %446 }
  0x89   : > { %v535_v47 = vmax.f32 %v441_v49, 1.0  ;;  %v6447_v49 = vunpack.c.l.bf16 %v5102_v20  ;;  %v537_v34 = vmax.f32 %v447_v59, 1.0  ;;  %v4629_v59 = vld [vmem:[%s6412_s2] sm:$0xff] }
  0x8b   : > { %4705 = vrcp.f32 %v535_v47  ;;  %v502_v45 = vadd.f32 %v6446_v56, %v6447_v49 }
  0x8d   : > { %503 = vadd.xlane.f32.xlu0 %v502_v45 }
  0x90   : > { %v444_v57 = vpop.xlane.xlu0 %443  ;;  %v450_v48 = vpop.xlane.xlu1 %449 }
  0x91   : > { %v536_v38 = vmax.f32 %v444_v57, 1.0  ;;  %v4706_v47 = vpop.eup %4705  ;;  %v4630_v57 = vld [vmem:[%s6412_s2 + $0x8] sm:$0xff]  ;;  %v538_v46 = vmax.f32 %v450_v48, 1.0 }
  0x92   : > { %v600_v45 = vmul.f32 %v4706_v47, %v376_v3  ;;  %1265 = vmatpush.bf16.msra.mxu2 %v4630_v57  ;;  %v422_v3 = vunpack.c.h.bf16 %v5134_v36 }
  0x93   : > { %4707 = vrcp.f32 %v536_v38  ;;  %v599_v38 = vmul.f32 %v4706_v47, %v375_v2  ;;  %v453_v2 = vpop.xlane.xlu2 %452 }
  0x94   : > { %4709 = vrcp.f32 %v537_v34  ;;  %v508_v34 = vadd.f32 %v422_v3, %v421_v0 }
  0x95   : > { %4711 = vrcp.f32 %v538_v46 }
  0x96   : > { %1266 = vmatpush.bf16.msra.mxu2 %v4629_v59  ;;  %509 = vadd.xlane.f32.xlu2 %v508_v34  ;;  %v5161_v59 = vld [vmem:[%s4837_s11 + $0xc8] sm:$0xff]  ;;  %v5164_v34 = vld [vmem:[%s4837_s11 + $0xc0] sm:$0xff] }
  0x97   : > { %v426_v1 = vunpack.c.h.bf16 %v5161_v59  ;;  %v424_v8 = vunpack.c.h.bf16 %v5164_v34 }
  0x99   : > { %v4708_v25 = vpop.eup %4707  ;;  %1267 = vmatmul.bf16.vlgmr.msra.gmra.mxu2 %v5050_v24 }
  0x9a   : > { %v601_v61 = vmul.f32 %v4708_v25, %v377_v13  ;;  %v602_v37 = vmul.f32 %v4708_v25, %v378_v15  ;;  %v5137_v13 = vld [vmem:[%s4837_s11 + $0xb0] sm:$0xff]  ;;  %v4710_v48 = vpop.eup %4709 }
  0x9b   : > { %v419_v6 = vunpack.c.l.bf16 %v5137_v13  ;;  %v420_v15 = vunpack.c.h.bf16 %v5137_v13  ;;  %v603_v47 = vmul.f32 %v4710_v48, %v379_v4  ;;  %v604_v24 = vmul.f32 %v4710_v48, %v380_v5  ;;  %v462_v48 = vpop.xlane.xlu1 %461 }
  0x9c   : > { %v663_v56 = vpack.c.bf16 %v601_v61, %v599_v38  ;;  %v664_v49 = vpack.c.bf16 %v602_v37, %v600_v45  ;;  %v539_v61 = vmax.f32 %v453_v2, 1.0  ;;  %v425_v4 = vunpack.c.l.bf16 %v5161_v59 }
  0x9d   : > { %v505_v25 = vadd.f32 %v420_v15, %v419_v6  ;;  %v423_v5 = vunpack.c.l.bf16 %v5164_v34 }
  0x9e   : > { %831 = vmatmul.bf16.vlgmr.msra.gmra.mxu0 %v663_v56  ;;  %920 = vmatmul.bf16.vlgmr.msra.gmra.mxu1 %v664_v49  ;;  %v4712_v49 = vpop.eup %4711  ;;  %v456_v56 = vpop.xlane.xlu2 %455  ;;  %4713 = vrcp.f32 %v539_v61 }
  0x9f   : > { %506 = vadd.xlane.f32.xlu1 %v505_v25  ;;  %v605_v57 = vmul.f32 %v4712_v49, %v381_v16  ;;  %v606_v38 = vmul.f32 %v4712_v49, %v382_v17  ;;  %v540_v45 = vmax.f32 %v456_v56, 1.0  ;;  %v514_v16 = vadd.f32 %v426_v1, %v425_v4  ;;  %v459_v49 = vpop.xlane.xlu0 %458 }
  0xa0   : > { %v511_v17 = vadd.f32 %v424_v8, %v423_v5 }
  0xa1   : > { %v665_v37 = vpack.c.bf16 %v605_v57, %v603_v47  ;;  %v666_v46 = vpack.c.bf16 %v606_v38, %v604_v24  ;;  %4715 = vrcp.f32 %v540_v45  ;;  %v542_v24 = vmax.f32 %v462_v48, 1.0 }
  0xa2   : > { %512 = vadd.xlane.f32.xlu0 %v511_v17  ;;  %v541_v38 = vmax.f32 %v459_v49, 1.0  ;;  %v6465_v49 = vunpack.c.h.bf16 %v4908_v28 }
  0xa3   : > { %4717 = vrcp.f32 %v542_v24 }
  0xa4   : > { %v4714_v2 = vpop.eup %4713  ;;  %4719 = vrcp.f32 %v541_v38 }
  0xa5   : > { %v607_v56 = vmul.f32 %v4714_v2, %v383_v11  ;;  %v5191_v11 = vld [vmem:[%s4837_s11 + $0xd8] sm:$0xff] }
  0xa6   : > { %v430_v14 = vunpack.c.h.bf16 %v5191_v11 }
  0xa7   : > { %515 = vadd.xlane.f32.xlu1 %v514_v16  ;;  %v4716_v25 = vpop.eup %4715 }
  0xa8   : > { %v609_v47 = vmul.f32 %v4716_v25, %v385_v21  ;;  %v610_v57 = vmul.f32 %v4716_v25, %v386_v22 }
  0xa9   : > { %1272 = vmatmul.bf16.gmra.mxu2 %v5032_v52  ;;  %v608_v52 = vmul.f32 %v4714_v2, %v384_v12  ;;  %v429_v12 = vunpack.c.l.bf16 %v5191_v11  ;;  %v465_v2 = vpop.xlane.xlu2 %464 }
  0xaa   : > { %v667_v61 = vpack.c.bf16 %v609_v47, %v607_v56  ;;  %v6466_v56 = vunpack.c.h.bf16 %v4905_v27 }
  0xab   : > { %v668_v45 = vpack.c.bf16 %v610_v57, %v608_v52  ;;  %v520_v16 = vadd.f32 %v430_v14, %v429_v12  ;;  %v468_v52 = vpop.xlane.xlu0 %467  ;;  %v543_v57 = vmax.f32 %v465_v2, 1.0 }
  0xac   : > { %v544_v24 = vmax.f32 %v468_v52, 1.0  ;;  %v6470_v52 = vunpack.c.h.bf16 %v4941_v41 }
  0xad   : > { %521 = vadd.xlane.f32.xlu0 %v520_v16  ;;  %4721 = vrcp.f32 %v543_v57 }
  0xae   : > { %836 = vmatmul.bf16.gmra.mxu0 %v665_v37  ;;  %925 = vmatmul.bf16.gmra.mxu1 %v666_v46  ;;  %v5188_v37 = vld [vmem:[%s4837_s11 + $0xd0] sm:$0xff]  ;;  %v4718_v46 = vpop.eup %4717  ;;  %4723 = vrcp.f32 %v544_v24  ;;  %v471_v24 = vpop.xlane.xlu1 %470 }
  0xaf   : > { %v427_v21 = vunpack.c.l.bf16 %v5188_v37  ;;  %v428_v7 = vunpack.c.h.bf16 %v5188_v37  ;;  %v4720_v17 = vpop.eup %4719  ;;  %v613_v48 = vmul.f32 %v4718_v46, %v389_v33  ;;  %v614_v47 = vmul.f32 %v4718_v46, %v6466_v56 }
  0xb0   : > { %v611_v25 = vmul.f32 %v4720_v17, %v387_v35  ;;  %v5218_v35 = vld [vmem:[%s4837_s11 + $0xe0] sm:$0xff] }
  0xb1   : > { %v517_v22 = vadd.f32 %v428_v7, %v427_v21  ;;  %v431_v27 = vunpack.c.l.bf16 %v5218_v35 }
  0xb2   : > { %v669_v38 = vpack.c.bf16 %v613_v48, %v611_v25  ;;  %v474_v25 = vpop.xlane.xlu2 %473  ;;  %v6467_v48 = vunpack.c.l.bf16 %v4919_v31 }
  0xb3   : > { %518 = vadd.xlane.f32.xlu2 %v517_v22  ;;  %v432_v22 = vunpack.c.h.bf16 %v5218_v35  ;;  %v4722_v16 = vpop.eup %4721  ;;  %v4652_v35 = vld [vmem:[%s6413_s3 + $0x38] sm:$0xff] }
  0xb4   : > { %v4724_v2 = vpop.eup %4723  ;;  %2193 = vmatpush.bf16.msrb.mxu2 %v4652_v35  ;;  %v5436_v35 = vld [vmem:[%s6416_s6] ss:$0 sm:$0xff] }
  0xb5   : > { %v618_v57 = vmul.f32 %v4724_v2, %v6470_v52 }
  0xb6   : > { %v480_v52 = vpop.xlane.xlu1 %479 }
  0xb9   : > { %1277 = vmatmul.bf16.gmra.mxu2 %v5024_v43  ;;  %v612_v43 = vmul.f32 %v4720_v17, %v6465_v49  ;;  %v523_v17 = vadd.f32 %v432_v22, %v431_v27  ;;  %v615_v49 = vmul.f32 %v4722_v16, %v6467_v48  ;;  %v4644_v48 = vld [vmem:[%s6412_s2 + $0x78] sm:$0xff] }
  0xba   : > { %1348 = vmatpush.bf16.msra.mxu3 %v4644_v48  ;;  %v6474_v48 = vunpack.c.h.bf16 %v4951_v44 }
  0xbb   : > { %524 = vadd.xlane.f32.xlu1 %v523_v17 }
  0xbe   : > { %841 = vmatmul.bf16.gmra.mxu0 %v667_v61  ;;  %930 = vmatmul.bf16.gmra.mxu1 %v668_v45  ;;  %v670_v61 = vpack.c.bf16 %v614_v47, %v612_v43  ;;  %v5215_v45 = vld [vmem:[%s4837_s11 + $0xe8] sm:$0xff]  ;;  %v6468_v43 = vunpack.c.l.bf16 %v4941_v41  ;;  %v6469_v47 = vunpack.c.h.bf16 %v4919_v31  ;;  %v5248_v31 = vld [vmem:[%s4837_s11 + $0xf0] sm:$0xff] }
  0xbf   : > { %v433_v33 = vunpack.c.l.bf16 %v5215_v45  ;;  %v6453_v28 = vunpack.c.h.bf16 %v5215_v45 }
  0xc0   : > { %v617_v56 = vmul.f32 %v4724_v2, %v6468_v43  ;;  %v5245_v43 = vld [vmem:[%s4837_s11 + $0xf8] sm:$0xff]  ;;  %v6451_v2 = vunpack.c.l.bf16 %v5248_v31 }
  0xc1   : > { %v526_v46 = vadd.f32 %v6453_v28, %v433_v33  ;;  %v6452_v41 = vunpack.c.l.bf16 %v5245_v43 }
  0xc3   : > { %527 = vadd.xlane.f32.xlu2 %v526_v46  ;;  %v671_v46 = vpack.c.bf16 %v617_v56, %v615_v49 }
  0xc9   : > { %1282 = vmatmul.bf16.gmra.mxu2 %v5016_v39  ;;  %v616_v39 = vmul.f32 %v4722_v16, %v6469_v47  ;;  %v6449_v16 = vunpack.c.h.bf16 %v5245_v43 }
  0xcb   : > { %v672_v17 = vpack.c.bf16 %v618_v57, %v616_v39  ;;  %v532_v49 = vadd.f32 %v6449_v16, %v6452_v41  ;;  %v6471_v57 = vunpack.c.l.bf16 %v4944_v42 }
  0xcd   : > { %533 = vadd.xlane.f32.xlu1 %v532_v49  ;;  %v4643_v49 = vld [vmem:[%s6412_s2 + $0x70] sm:$0xff] }
  0xce   : > { %846 = vmatmul.bf16.gmra.mxu0 %v669_v38  ;;  %935 = vmatmul.bf16.gmra.mxu1 %v670_v61  ;;  %v546_v38 = vmax.f32 %v474_v25, 1.0  ;;  %v545_v61 = vmax.f32 %v471_v24, 1.0  ;;  %v6450_v25 = vunpack.c.h.bf16 %v5248_v31 }
  0xcf   : > { %1349 = vmatpush.bf16.msra.mxu3 %v4643_v49  ;;  %v4638_v49 = vld [vmem:[%s6412_s2 + $0x48] sm:$0xff] }
  0xd0   : > { %4725 = vrcp.f32 %v546_v38  ;;  %v529_v56 = vadd.f32 %v6450_v25, %v6451_v2  ;;  %v6472_v38 = vunpack.c.l.bf16 %v4951_v44  ;;  %v477_v25 = vpop.xlane.xlu0 %476  ;;  %v548_v2 = vmax.f32 %v480_v52, 1.0 }
  0xd1   : > { %4727 = vrcp.f32 %v545_v61  ;;  %v547_v41 = vmax.f32 %v477_v25, 1.0  ;;  %v6476_v25 = vunpack.c.l.bf16 %v4968_v53 }
  0xd2   : > { %530 = vadd.xlane.f32.xlu0 %v529_v56  ;;  %4729 = vrcp.f32 %v548_v2 }
  0xd3   : > { %4731 = vrcp.f32 %v547_v41  ;;  %v4641_v41 = vld [vmem:[%s6412_s2 + $0x60] sm:$0xff] }
  0xd6   : > { %v4726_v47 = vpop.eup %4725 }
  0xd7   : > { %v4728_v39 = vpop.eup %4727  ;;  %v621_v61 = vmul.f32 %v4726_v47, %v6472_v38  ;;  %v622_v16 = vmul.f32 %v4726_v47, %v6474_v48  ;;  %v4640_v48 = vld [vmem:[%s6412_s2 + $0x58] sm:$0xff] }
  0xd8   : > { %v619_v24 = vmul.f32 %v4728_v39, %v6471_v57  ;;  %v4730_v44 = vpop.eup %4729  ;;  %v6478_v57 = vunpack.c.h.bf16 %v4968_v53  ;;  %v4639_v53 = vld [vmem:[%s6412_s2 + $0x50] sm:$0xff] }
  0xd9   : > { %1287 = vmatmul.bf16.gmra.mxu2 %v4996_v9  ;;  %v4732_v56 = vpop.eup %4731  ;;  %v625_v47 = vmul.f32 %v4730_v44, %v6476_v25  ;;  %v6482_v25 = vunpack.c.h.bf16 %v4993_v63 }
  0xda   : > { %v673_v9 = vpack.c.bf16 %v621_v61, %v619_v24  ;;  %v626_v24 = vmul.f32 %v4730_v44, %v6478_v57  ;;  %v6479_v44 = vunpack.c.l.bf16 %v4990_v62 }
  0xde   : > { %851 = vmatmul.bf16.gmra.mxu0 %v671_v46  ;;  %940 = vmatmul.bf16.gmra.mxu1 %v672_v17  ;;  %v6473_v46 = vunpack.c.h.bf16 %v4944_v42  ;;  %v4642_v42 = vld [vmem:[%s6412_s2 + $0x68] sm:$0xff] }
  0xdf   : > { %1350 = vmatpush.bf16.msra.mxu3 %v4642_v42 }
  0xe0   : > { %v620_v17 = vmul.f32 %v4728_v39, %v6473_v46  ;;  %v6477_v39 = vunpack.c.h.bf16 %v4971_v54 }
  0xe2   : > { %v674_v28 = vpack.c.bf16 %v622_v16, %v620_v17  ;;  %v483_v16 = vpop.xlane.xlu2 %482  ;;  %v624_v52 = vmul.f32 %v4732_v56, %v6477_v39  ;;  %v4637_v39 = vld [vmem:[%s6412_s2 + $0x40] sm:$0xff] }
  0xe3   : > { %v549_v38 = vmax.f32 %v483_v16, 1.0  ;;  %1351 = vmatpush.bf16.msra.mxu3 %v4641_v41  ;;  %v6480_v41 = vunpack.c.l.bf16 %v4993_v63 }
  0xe4   : > { %v676_v17 = vpack.c.bf16 %v626_v24, %v624_v52 }
  0xe5   : > { %4733 = vrcp.f32 %v549_v38 }
  0xe7   : > { %1352 = vmatpush.bf16.msra.mxu3 %v4640_v48 }
  0xe9   : > { %1292 = vmatmul.bf16.gmra.mxu2 %v4916_v30  ;;  %v486_v30 = vpop.xlane.xlu0 %485 }
  0xea   : > { %v550_v61 = vmax.f32 %v486_v30, 1.0  ;;  %v492_v42 = vpop.xlane.xlu2 %491 }
  0xeb   : > { %1353 = vmatpush.bf16.msra.mxu3 %v4639_v53  ;;  %v552_v52 = vmax.f32 %v492_v42, 1.0  ;;  %v6485_v53 = vunpack.c.h.bf16 %v5043_v29 }
  0xec   : > { %4735 = vrcp.f32 %v550_v61  ;;  %v6483_v61 = vunpack.c.l.bf16 %v5043_v29 }
  0xed   : > { %4737 = vrcp.f32 %v552_v52  ;;  %v6487_v52 = vunpack.c.l.bf16 %v5069_v58 }
  0xee   : > { %856 = vmatmul.bf16.gmra.mxu0 %v673_v9  ;;  %945 = vmatmul.bf16.gmra.mxu1 %v674_v28  ;;  %v6475_v28 = vunpack.c.l.bf16 %v4971_v54  ;;  %v4734_v54 = vpop.eup %4733 }
  0xef   : > { %1354 = vmatpush.bf16.msra.mxu3 %v4638_v49 }
  0xf0   : > { %v623_v2 = vmul.f32 %v4732_v56, %v6475_v28  ;;  %v627_v56 = vmul.f32 %v4734_v54, %v6479_v44  ;;  %v6481_v28 = vunpack.c.h.bf16 %v4990_v62 }
  0xf1   : > { %v495_v42 = vpop.xlane.xlu0 %494 }
  0xf2   : > { %v675_v46 = vpack.c.bf16 %v625_v47, %v623_v2  ;;  %v4736_v9 = vpop.eup %4735  ;;  %v628_v2 = vmul.f32 %v4734_v54, %v6481_v28 }
  0xf3   : > { %v629_v16 = vmul.f32 %v4736_v9, %v6480_v41  ;;  %v630_v47 = vmul.f32 %v4736_v9, %v6482_v25  ;;  %1355 = vmatpush.bf16.msra.mxu3 %v4637_v39  ;;  %v4738_v38 = vpop.eup %4737  ;;  %v6486_v9 = vunpack.c.h.bf16 %v5038_v60 }
  0xf5   : > { %v677_v24 = vpack.c.bf16 %v629_v16, %v627_v56  ;;  %v678_v30 = vpack.c.bf16 %v630_v47, %v628_v2  ;;  %v634_v49 = vmul.f32 %v4738_v38, %v6486_v9  ;;  %v553_v56 = vmax.f32 %v495_v42, 1.0 }
  0xf9   : > { %1297 = vmatmul.bf16.gmra.mxu2 %v4893_v23  ;;  %v489_v23 = vpop.xlane.xlu1 %488 }
  0xfa   : > { %v551_v57 = vmax.f32 %v489_v23, 1.0 }
  0xfc   : > { %4739 = vrcp.f32 %v551_v57 }
  0xfe   : > { %861 = vmatmul.bf16.gmra.mxu0 %v675_v46  ;;  %950 = vmatmul.bf16.gmra.mxu1 %v676_v17  ;;  %v6484_v17 = vunpack.c.l.bf16 %v5038_v60 }
 0x100   : > { %v633_v48 = vmul.f32 %v4738_v38, %v6484_v17  ;;  %v6488_v38 = vunpack.c.l.bf16 %v5072_v50 }
 0x101   : > { %v498_v63 = vpop.xlane.xlu1 %497 }
 0x102   : > { %v4740_v62 = vpop.eup %4739  ;;  %v554_v44 = vmax.f32 %v498_v63, 1.0  ;;  %v6489_v63 = vunpack.c.h.bf16 %v5072_v50 }
 0x103   : > { %v631_v46 = vmul.f32 %v4740_v62, %v6483_v61  ;;  %v632_v54 = vmul.f32 %v4740_v62, %v6485_v53 }
 0x104   : > { %4741 = vrcp.f32 %v554_v44 }
 0x105   : > { %v679_v41 = vpack.c.bf16 %v633_v48, %v631_v46  ;;  %v680_v16 = vpack.c.bf16 %v634_v49, %v632_v54  ;;  %4743 = vrcp.f32 %v553_v56  ;;  %v6490_v46 = vunpack.c.h.bf16 %v5069_v58 }
 0x109   : > { %1302 = vmatmul.bf16.gmra.mxu2 %v4886_v19 }
 0x10a   : > { %v4742_v25 = vpop.eup %4741 }
 0x10b   : > { %v4744_v29 = vpop.eup %4743  ;;  %v637_v57 = vmul.f32 %v4742_v25, %v6487_v52  ;;  %v638_v17 = vmul.f32 %v4742_v25, %v6490_v46  ;;  %v6492_v52 = vunpack.c.l.bf16 %v5102_v20 }
 0x10c   : > { %v635_v62 = vmul.f32 %v4744_v29, %v6488_v38  ;;  %v636_v61 = vmul.f32 %v4744_v29, %v6489_v63  ;;  %v6494_v38 = vunpack.c.h.bf16 %v5102_v20 }
 0x10e   : > { %866 = vmatmul.bf16.gmra.mxu0 %v677_v24  ;;  %955 = vmatmul.bf16.gmra.mxu1 %v678_v30  ;;  %v501_v24 = vpop.xlane.xlu2 %500  ;;  %v681_v42 = vpack.c.bf16 %v637_v57, %v635_v62  ;;  %v682_v44 = vpack.c.bf16 %v638_v17, %v636_v61 }
 0x10f   : > { %v555_v54 = vmax.f32 %v501_v24, 1.0  ;;  %v6493_v24 = vunpack.c.h.bf16 %v5099_v26 }
 0x111   : > { %4745 = vrcp.f32 %v555_v54 }
 0x117   : > { %v4746_v58 = vpop.eup %4745 }
 0x119   : > { %1307 = vmatmul.bf16.gmra.mxu2 %v5053_v18  ;;  %v504_v18 = vpop.xlane.xlu0 %503 }
 0x11a   : > { %v556_v9 = vmax.f32 %v504_v18, 1.0 }
 0x11b   : > { %v832_v19 = vpop.f32.mrf.mxu0  ;;  %v921_v28 = vpop.f32.mrf.mxu1 }
 0x11c   : > { %v922_v2 = vadd.f32 %v921_v28, %v832_v19  ;;  %4747 = vrcp.f32 %v556_v9 }
 0x11e   : > { %871 = vmatmul.bf16.gmra.mxu0 %v679_v41  ;;  %960 = vmatmul.bf16.gmra.mxu1 %v680_v16  ;;  %v1001_v60 = vpack.c.bf16 %v922_v2, %v922_v2  ;;  %v5328_v16 = vpop.f32.mrf.mxu2 }
 0x120   : > { %v1065_v48 = vunpack.c.l.b16 %v1001_v60  ;;  %v510_v60 = vpop.xlane.xlu2 %509 }
 0x121   : > { %v558_v17 = vmax.f32 %v510_v60, 1.0 }
 0x122   : > { %v4748_v19 = vpop.eup %4747 }
 0x123   : > { %v834_v47 = vpop.f32.mrf.mxu0  ;;  %v923_v23 = vpop.f32.mrf.mxu1  ;;  %v641_v57 = vmul.f32 %v4748_v19, %v6492_v52  ;;  %v642_v62 = vmul.f32 %v4748_v19, %v6494_v38  ;;  %4749 = vrcp.f32 %v558_v17 }
 0x124   : > { %v924_v39 = vadd.f32 %v923_v23, %v834_v47  ;;  %v6491_v47 = vunpack.c.l.bf16 %v5099_v26 }
 0x126   : > { %v1002_v30 = vpack.c.bf16 %v924_v39, %v924_v39  ;;  %v639_v23 = vmul.f32 %v4746_v58, %v6491_v47  ;;  %v5339_v63 = vpop.f32.mrf.mxu2 }
 0x128   : > { %v1066_v53 = vunpack.c.l.b16 %v1002_v30  ;;  %v640_v30 = vmul.f32 %v4746_v58, %v6493_v24 }
 0x129   : > { %1312 = vmatmul.bf16.gmra.mxu2 %v5035_v55  ;;  %v507_v55 = vpop.xlane.xlu1 %506 }
 0x12a   : > { %v1097_v49 = vpack.c.b16 %v1066_v53, %v1065_v48  ;;  %v557_v18 = vmax.f32 %v507_v55, 1.0  ;;  %v683_v53 = vpack.c.bf16 %v641_v57, %v639_v23  ;;  %v684_v54 = vpack.c.bf16 %v642_v62, %v640_v30 }
 0x12b   : > { %v837_v56 = vpop.f32.mrf.mxu0  ;;  %v926_v41 = vpop.f32.mrf.mxu1 }
 0x12c   : > { %1356 = vmatmul.bf16.vlgmr.msra.gmra.mxu3 %v1097_v49  ;;  %v927_v50 = vadd.f32 %v926_v41, %v837_v56  ;;  %4751 = vrcp.f32 %v557_v18  ;;  %v519_v18 = vpop.xlane.xlu2 %518 }
 0x12e   : > { %876 = vmatmul.bf16.gmra.mxu0 %v681_v42  ;;  %965 = vmatmul.bf16.gmra.mxu1 %v682_v44  ;;  %v1003_v25 = vpack.c.bf16 %v927_v50, %v927_v50  ;;  %v5341_v20 = vpop.f32.mrf.mxu2  ;;  %v4750_v42 = vpop.eup %4749 }
 0x12f   : > { %v645_v19 = vmul.f32 %v4750_v42, %v421_v0  ;;  %v646_v47 = vmul.f32 %v4750_v42, %v422_v3  ;;  %v561_v42 = vmax.f32 %v519_v18, 1.0 }
 0x130   : > { %v1067_v61 = vunpack.c.l.b16 %v1003_v25 }
 0x132   : > { %v4752_v44 = vpop.eup %4751 }
 0x133   : > { %v839_v28 = vpop.f32.mrf.mxu0  ;;  %v928_v2 = vpop.f32.mrf.mxu1  ;;  %v643_v25 = vmul.f32 %v4752_v44, %v419_v6 }
 0x134   : > { %v929_v29 = vadd.f32 %v928_v2, %v839_v28  ;;  %v516_v28 = vpop.xlane.xlu1 %515 }
 0x135   : > { %v685_v24 = vpack.c.bf16 %v645_v19, %v643_v25 }
 0x136   : > { %v1004_v39 = vpack.c.bf16 %v929_v29, %v929_v29  ;;  %v644_v29 = vmul.f32 %v4752_v44, %v420_v15  ;;  %v5352_v0 = vpop.f32.mrf.mxu2 }
 0x138   : > { %v1068_v46 = vunpack.c.l.b16 %v1004_v39  ;;  %v560_v39 = vmax.f32 %v516_v28, 1.0  ;;  %v686_v30 = vpack.c.bf16 %v646_v47, %v644_v29  ;;  %v528_v29 = vpop.xlane.xlu2 %527 }
 0x139   : > { %1317 = vmatmul.bf16.gmra.mxu2 %v5027_v51  ;;  %v513_v51 = vpop.xlane.xlu0 %512 }
 0x13a   : > { %v1098_v48 = vpack.c.b16 %v1068_v46, %v1067_v61  ;;  %v559_v52 = vmax.f32 %v513_v51, 1.0  ;;  %4753 = vrcp.f32 %v560_v39 }
 0x13b   : > { %v842_v9 = vpop.f32.mrf.mxu0  ;;  %v931_v49 = vpop.f32.mrf.mxu1 }
 0x13c   : > { %1361 = vmatmul.bf16.gmra.mxu3 %v1098_v48  ;;  %v932_v26 = vadd.f32 %v931_v49, %v842_v9  ;;  %4755 = vrcp.f32 %v559_v52 }
 0x13d   : > { %4757 = vrcp.f32 %v561_v42 }
 0x13e   : > { %881 = vmatmul.bf16.gmra.mxu0 %v683_v53  ;;  %970 = vmatmul.bf16.gmra.mxu1 %v684_v54  ;;  %v1005_v50 = vpack.c.bf16 %v932_v26, %v932_v26  ;;  %v5355_v46 = vpop.f32.mrf.mxu2 }
 0x140   : > { %v1069_v23 = vunpack.c.l.b16 %v1005_v50  ;;  %v4754_v36 = vpop.eup %4753 }
 0x141   : > { %v649_v17 = vmul.f32 %v4754_v36, %v425_v4  ;;  %v522_v9 = vpop.xlane.xlu0 %521 }
 0x142   : > { %v4756_v3 = vpop.eup %4755  ;;  %v562_v44 = vmax.f32 %v522_v9, 1.0 }
 0x143   : > { %v844_v56 = vpop.f32.mrf.mxu0  ;;  %v933_v41 = vpop.f32.mrf.mxu1  ;;  %v647_v53 = vmul.f32 %v4756_v3, %v423_v5  ;;  %v648_v54 = vmul.f32 %v4756_v3, %v424_v8 }
 0x144   : > { %v934_v58 = vadd.f32 %v933_v41, %v844_v56  ;;  %4759 = vrcp.f32 %v562_v44  ;;  %v4758_v59 = vpop.eup %4757 }
 0x145   : > { %v687_v41 = vpack.c.bf16 %v649_v17, %v647_v53  ;;  %v651_v25 = vmul.f32 %v4758_v59, %v427_v21  ;;  %v6495_v53 = vunpack.c.h.bf16 %v5215_v45 }
 0x146   : > { %v1006_v2 = vpack.c.bf16 %v934_v58, %v934_v58  ;;  %v5365_v34 = vpop.f32.mrf.mxu2 }
 0x148   : > { %v1070_v60 = vunpack.c.l.b16 %v1006_v2 }
 0x149   : > { %1322 = vmatmul.bf16.gmra.mxu2 %v5019_v40  ;;  %v650_v40 = vmul.f32 %v4754_v36, %v426_v1 }
 0x14a   : > { %v1099_v57 = vpack.c.b16 %v1070_v60, %v1069_v23  ;;  %v4760_v1 = vpop.eup %4759  ;;  %v652_v23 = vmul.f32 %v4758_v59, %v428_v7 }
 0x14b   : > { %v847_v38 = vpop.f32.mrf.mxu0  ;;  %v936_v62 = vpop.f32.mrf.mxu1  ;;  %v688_v50 = vpack.c.bf16 %v650_v40, %v648_v54  ;;  %v653_v51 = vmul.f32 %v4760_v1, %v429_v12  ;;  %v654_v60 = vmul.f32 %v4760_v1, %v430_v14 }
 0x14c   : > { %1366 = vmatmul.bf16.gmra.mxu3 %v1099_v57  ;;  %v937_v13 = vadd.f32 %v936_v62, %v847_v38  ;;  %v564_v57 = vmax.f32 %v528_v29, 1.0  ;;  %v6497_v29 = vunpack.c.l.bf16 %v5248_v31 }
 0x14d   : > { %v689_v21 = vpack.c.bf16 %v653_v51, %v651_v25  ;;  %v690_v62 = vpack.c.bf16 %v654_v60, %v652_v23  ;;  %v6498_v51 = vunpack.c.h.bf16 %v5248_v31  ;;  %v6499_v60 = vunpack.c.h.bf16 %v5245_v43 }
 0x14e   : > { %886 = vmatmul.bf16.gmra.mxu0 %v685_v24  ;;  %975 = vmatmul.bf16.gmra.mxu1 %v686_v30  ;;  %v1007_v55 = vpack.c.bf16 %v937_v13, %v937_v13  ;;  %v5376_v24 = vpop.f32.mrf.mxu2  ;;  %4761 = vrcp.f32 %v564_v57  ;;  %v4650_v57 = vld [vmem:[%s6413_s3 + $0x28] sm:$0xff] }
 0x150   : > { %v1071_v49 = vunpack.c.l.b16 %v1007_v55 }
 0x153   : > { %v849_v6 = vpop.f32.mrf.mxu0  ;;  %v938_v15 = vpop.f32.mrf.mxu1 }
 0x154   : > { %v939_v61 = vadd.f32 %v938_v15, %v849_v6  ;;  %v4762_v11 = vpop.eup %4761 }
 0x155   : > { %v657_v55 = vmul.f32 %v4762_v11, %v433_v33  ;;  %v658_v54 = vmul.f32 %v4762_v11, %v6495_v53  ;;  %v4770_v11 = vld [vmem:[%s4862_s15 + $0x78] sm:$0xff] }
 0x156   : > { %v1008_v48 = vpack.c.bf16 %v939_v61, %v939_v61  ;;  %v5378_v7 = vpop.f32.mrf.mxu2 }
 0x158   : > { %v1072_v26 = vunpack.c.l.b16 %v1008_v48 }
 0x159   : > { %1327 = vmatmul.bf16.gmra.mxu2 %v4999_v10  ;;  %v525_v10 = vpop.xlane.xlu1 %524 }
 0x15a   : > { %v1100_v56 = vpack.c.b16 %v1072_v26, %v1071_v49  ;;  %v563_v30 = vmax.f32 %v525_v10, 1.0 }
 0x15b   : > { %v852_v4 = vpop.f32.mrf.mxu0  ;;  %v941_v58 = vpop.f32.mrf.mxu1 }
 0x15c   : > { %1371 = vmatmul.bf16.gmra.mxu3 %v1100_v56  ;;  %v942_v5 = vadd.f32 %v941_v58, %v852_v4  ;;  %4763 = vrcp.f32 %v563_v30 }
 0x15e   : > { %891 = vmatmul.bf16.gmra.mxu0 %v687_v41  ;;  %980 = vmatmul.bf16.gmra.mxu1 %v688_v50  ;;  %v1009_v28 = vpack.c.bf16 %v942_v5, %v942_v5  ;;  %v4769_v50 = vld [vmem:[%s4862_s15 + $0x70] sm:$0xff]  ;;  %s6326_s15 = scalar_lea.vmem %s6418_s8, %s4127_s25 }
 0x160   : > { %v1073_v39 = vunpack.c.l.b16 %v1009_v28  ;;  %v4651_v28 = vld [vmem:[%s6413_s3 + $0x30] sm:$0xff] }
 0x161   : > { %v534_v61 = vpop.xlane.xlu1 %533  ;;  %2194 = vmatpush.bf16.msrb.mxu2 %v4651_v28 }
 0x162   : > { %v4764_v12 = vpop.eup %4763  ;;  %v566_v49 = vmax.f32 %v534_v61, 1.0 }
 0x163   : > { %v854_v8 = vpop.f32.mrf.mxu0  ;;  %v943_v19 = vpop.f32.mrf.mxu1  ;;  %v655_v18 = vmul.f32 %v4764_v12, %v431_v27  ;;  %v656_v48 = vmul.f32 %v4764_v12, %v432_v22 }
 0x164   : > { %v944_v2 = vadd.f32 %v943_v19, %v854_v8  ;;  %4765 = vrcp.f32 %v566_v49  ;;  %v5389_v27 = vpop.f32.mrf.mxu2  ;;  %v6496_v8 = vunpack.c.l.bf16 %v5245_v43  ;;  %v4649_v43 = vld [vmem:[%s6413_s3 + $0x20] sm:$0xff] }
 0x165   : > { %v691_v44 = vpack.c.bf16 %v657_v55, %v655_v18  ;;  %v692_v33 = vpack.c.bf16 %v658_v54, %v656_v48  ;;  %2195 = vmatpush.bf16.msrb.mxu2 %v4650_v57  ;;  %v4646_v18 = vld [vmem:[%s6413_s3 + $0x8] sm:$0xff] }
 0x166   : > { %v1010_v47 = vpack.c.bf16 %v944_v2, %v944_v2 }
 0x168   : > { %v1074_v52 = vunpack.c.l.b16 %v1010_v47 }
 0x169   : > { %1332 = vmatmul.bf16.gmra.mxu2 %v4922_v32  ;;  %v531_v32 = vpop.xlane.xlu0 %530 }
 0x16a   : > { %v1101_v38 = vpack.c.b16 %v1074_v52, %v1073_v39  ;;  %v565_v26 = vmax.f32 %v531_v32, 1.0  ;;  %v4766_v22 = vpop.eup %4765  ;;  %2196 = vmatpush.bf16.msrb.mxu2 %v4649_v43  ;;  %v1274_v43 = vadd.f32 %v5436_v35, %v5341_v20 }
 0x16b   : > { %v857_v13 = vpop.f32.mrf.mxu0  ;;  %v946_v36 = vpop.f32.mrf.mxu1  ;;  %v661_v19 = vmul.f32 %v4766_v22, %v6496_v8  ;;  %v662_v10 = vmul.f32 %v4766_v22, %v6499_v60 }
 0x16c   : > { %1376 = vmatmul.bf16.gmra.mxu3 %v1101_v38  ;;  %v947_v37 = vadd.f32 %v946_v36, %v857_v13  ;;  %4767 = vrcp.f32 %v565_v26  ;;  %v5400_v25 = vpop.f32.mrf.mxu2 }
 0x16e   : > { %896 = vmatmul.bf16.gmra.mxu0 %v689_v21  ;;  %985 = vmatmul.bf16.gmra.mxu1 %v690_v62  ;;  %v1011_v6 = vpack.c.bf16 %v947_v37, %v947_v37  ;;  %v4648_v37 = vld [vmem:[%s6413_s3 + $0x18] sm:$0xff] }
 0x16f   : > { %2197 = vmatpush.bf16.msrb.mxu2 %v4648_v37 }
 0x170   : > { %v1075_v40 = vunpack.c.l.b16 %v1011_v6 }
 0x172   : > { %v4768_v4 = vpop.eup %4767 }
 0x173   : > { %v859_v14 = vpop.f32.mrf.mxu0  ;;  %v948_v3 = vpop.f32.mrf.mxu1  ;;  %v659_v47 = vmul.f32 %v4768_v4, %v6497_v29  ;;  %v660_v23 = vmul.f32 %v4768_v4, %v6498_v51 }
 0x174   : > { %v949_v15 = vadd.f32 %v948_v3, %v859_v14  ;;  %v5414_v36 = vpop.f32.mrf.mxu2 }
 0x175   : > { %v693_v38 = vpack.c.bf16 %v661_v19, %v659_v47  ;;  %v694_v21 = vpack.c.bf16 %v662_v10, %v660_v23  ;;  %v1271_v47 = vadd.f32 %v5436_v35, %v5339_v63 }
 0x176   : > { %v1012_v17 = vpack.c.bf16 %v949_v15, %v949_v15  ;;  %v4647_v15 = vld [vmem:[%s6413_s3 + $0x10] sm:$0xff] }
 0x177   : > { %2198 = vmatpush.bf16.msrb.mxu2 %v4647_v15 }
 0x178   : > { %v1076_v9 = vunpack.c.l.b16 %v1012_v17 }
 0x179   : > { %1337 = vmatmul.bf16.gmra.mxu2 %v4769_v50 }
 0x17a   : > { %v1102_v42 = vpack.c.b16 %v1076_v9, %v1075_v40  ;;  %v4645_v40 = vld [vmem:[%s6413_s3] sm:$0xff] }
 0x17b   : > { %v862_v56 = vpop.f32.mrf.mxu0  ;;  %v951_v41 = vpop.f32.mrf.mxu1  ;;  %2199 = vmatpush.bf16.msrb.mxu2 %v4646_v18 }
 0x17c   : > { %1381 = vmatmul.bf16.gmra.mxu3 %v1102_v42  ;;  %v952_v45 = vadd.f32 %v951_v41, %v862_v56  ;;  %v5426_v53 = vpop.f32.mrf.mxu2 }
 0x17e   : > { %901 = vmatmul.bf16.gmra.mxu0 %v691_v44  ;;  %990 = vmatmul.bf16.gmra.mxu1 %v692_v33  ;;  %v1013_v59 = vpack.c.bf16 %v952_v45, %v952_v45 }
 0x17f   : > { %2200 = vmatpush.bf16.msrb.mxu2 %v4645_v40 }
 0x180   : > { %v1077_v39 = vunpack.c.l.b16 %v1013_v59 }
 0x183   : > { %v864_v58 = vpop.f32.mrf.mxu0  ;;  %v953_v5 = vpop.f32.mrf.mxu1 }
 0x184   : > { %v954_v1 = vadd.f32 %v953_v5, %v864_v58  ;;  %v5431_v33 = vpop.f32.mrf.mxu2  ;;  %v1269_v58 = vadd.f32 %v5436_v35, %v5328_v16 }
 0x186   : > { %v1014_v2 = vpack.c.bf16 %v954_v1, %v954_v1 }
 0x188   : > { %v1078_v52 = vunpack.c.l.b16 %v1014_v2 }
 0x189   : > { %1342 = vmatmul.bf16.gmra.mxu2 %v4770_v11 }
 0x18a   : > { %v1103_v30 = vpack.c.b16 %v1078_v52, %v1077_v39 }
 0x18b   : > { %v867_v62 = vpop.f32.mrf.mxu0  ;;  %v956_v13 = vpop.f32.mrf.mxu1 }
 0x18c   : > { %1386 = vmatmul.bf16.gmra.mxu3 %v1103_v30  ;;  %v957_v31 = vadd.f32 %v956_v13, %v867_v62  ;;  %v5440_v5 = vpop.f32.mrf.mxu2 }
 0x18e   : > { %906 = vmatmul.bf16.gmra.mxu0 %v693_v38  ;;  %995 = vmatmul.bf16.gmra.mxu1 %v694_v21  ;;  %v1015_v3 = vpack.c.bf16 %v957_v31, %v957_v31 }
 0x190   : > { %v1079_v61 = vunpack.c.l.b16 %v1015_v3 }
 0x193   : > { %v869_v12 = vpop.f32.mrf.mxu0  ;;  %v958_v14 = vpop.f32.mrf.mxu1 }
 0x194   : > { %v959_v6 = vadd.f32 %v958_v14, %v869_v12  ;;  %v5444_v52 = vpop.f32.mrf.mxu2 }
 0x196   : > { %v1016_v55 = vpack.c.bf16 %v959_v6, %v959_v6 }
 0x198   : > { %v1080_v17 = vunpack.c.l.b16 %v1016_v55 }
 0x19a   : > { %v1104_v48 = vpack.c.b16 %v1080_v17, %v1079_v61  ;;  %v1276_v17 = vadd.f32 %v5436_v35, %v5352_v0 }
 0x19b   : > { %v872_v54 = vpop.f32.mrf.mxu0  ;;  %v961_v32 = vpop.f32.mrf.mxu1 }
 0x19c   : > { %1391 = vmatmul.bf16.gmra.mxu3 %v1104_v48  ;;  %v962_v9 = vadd.f32 %v961_v32, %v872_v54  ;;  %v5450_v14 = vpop.f32.mrf.mxu2 }
 0x19e   : > { %v1017_v42 = vpack.c.bf16 %v962_v9, %v962_v9 }
 0x1a0   : > { %v1081_v41 = vunpack.c.l.b16 %v1017_v42 }
 0x1a3   : > { %v874_v49 = vpop.f32.mrf.mxu0  ;;  %v963_v26 = vpop.f32.mrf.mxu1 }
 0x1a4   : > { %v964_v44 = vadd.f32 %v963_v26, %v874_v49 }
 0x1a6   : > { %v1018_v56 = vpack.c.bf16 %v964_v44, %v964_v44 }
 0x1a8   : > { %v1082_v45 = vunpack.c.l.b16 %v1018_v56  ;;  %v5455_v56 = vpop.f32.mrf.mxu2 }
 0x1aa   : > { %v1105_v22 = vpack.c.b16 %v1082_v45, %v1081_v41  ;;  %v1279_v45 = vadd.f32 %v5436_v35, %v5355_v46 }
 0x1ab   : > { %v877_v50 = vpop.f32.mrf.mxu0  ;;  %v966_v4 = vpop.f32.mrf.mxu1 }
 0x1ac   : > { %1396 = vmatmul.bf16.gmra.mxu3 %v1105_v22  ;;  %v967_v1 = vadd.f32 %v966_v4, %v877_v50 }
 0x1ae   : > { %v1019_v2 = vpack.c.bf16 %v967_v1, %v967_v1 }
 0x1af   : > { %v1357_v59 = vpop.f32.mrf.mxu3 }
 0x1b0   : > { %v1358_v8 = vadd.f32 %v1357_v59, %v1269_v58  ;;  %v1083_v10 = vunpack.c.l.b16 %v1019_v2  ;;  %v1281_v2 = vadd.f32 %v5436_v35, %v5365_v34 }
 0x1b2   : > { %v1437_v51 = vmax.f32 %v1358_v8, 0.0 }
 0x1b3   : > { %v879_v19 = vpop.f32.mrf.mxu0  ;;  %v968_v28 = vpop.f32.mrf.mxu1 }
 0x1b4   : > { %v969_v29 = vadd.f32 %v968_v28, %v879_v19  ;;  %v1469_v57 = vpack.c.bf16 %v1437_v51, %v1437_v51 }
 0x1b6   : > { %v1020_v23 = vpack.c.bf16 %v969_v29, %v969_v29  ;;  %v1693_v31 = vunpack.c.l.b16 %v1469_v57  ;;  %v5464_v29 = vpop.f32.mrf.mxu2 }
 0x1b7   : > { %v1359_v60 = vpop.f32.mrf.mxu3 }
 0x1b8   : > { %v1084_v39 = vunpack.c.l.b16 %v1020_v23  ;;  %v1360_v16 = vadd.f32 %v1359_v60, %v1271_v47 }
 0x1ba   : > { %v1438_v30 = vmax.f32 %v1360_v16, 0.0  ;;  %v1106_v38 = vpack.c.b16 %v1084_v39, %v1083_v10 }
 0x1bb   : > { %v882_v21 = vpop.f32.mrf.mxu0  ;;  %v971_v62 = vpop.f32.mrf.mxu1 }
 0x1bc   : > { %v1470_v13 = vpack.c.bf16 %v1438_v30, %v1438_v30  ;;  %1401 = vmatmul.bf16.gmra.mxu3 %v1106_v38  ;;  %v972_v12 = vadd.f32 %v971_v62, %v882_v21  ;;  %v1284_v62 = vadd.f32 %v5436_v35, %v5376_v24 }
 0x1be   : > { %v1694_v63 = vunpack.c.l.b16 %v1470_v13  ;;  %v1021_v55 = vpack.c.bf16 %v972_v12, %v972_v12 }
 0x1bf   : > { %v1362_v37 = vpop.f32.mrf.mxu3 }
 0x1c0   : > { %v5448_v11 = vpack.c.b16 %v1694_v63, %v1693_v31  ;;  %v1363_v3 = vadd.f32 %v1362_v37, %v1274_v43  ;;  %v1085_v54 = vunpack.c.l.b16 %v1021_v55  ;;  %v5468_v31 = vpop.f32.mrf.mxu2 }
 0x1c2   : > { %2201 = vmatmul.bf16.vlgmr.msrb.gmra.mxu2 %v5448_v11  ;;  %v1439_v18 = vmax.f32 %v1363_v3, 0.0 }
 0x1c3   : > { %v884_v6 = vpop.f32.mrf.mxu0  ;;  %v973_v15 = vpop.f32.mrf.mxu1 }
 0x1c4   : > { %v974_v61 = vadd.f32 %v973_v15, %v884_v6  ;;  %v1471_v9 = vpack.c.bf16 %v1439_v18, %v1439_v18 }
 0x1c6   : > { %v1022_v20 = vpack.c.bf16 %v974_v61, %v974_v61  ;;  %v1695_v22 = vunpack.c.l.b16 %v1471_v9  ;;  %v1286_v61 = vadd.f32 %v5436_v35, %v5378_v7 }
 0x1c7   : > { %v1364_v48 = vpop.f32.mrf.mxu3 }
 0x1c8   : > { %v1086_v32 = vunpack.c.l.b16 %v1022_v20  ;;  %v1365_v40 = vadd.f32 %v1364_v48, %v1276_v17 }
 0x1ca   : > { %v1440_v49 = vmax.f32 %v1365_v40, 0.0  ;;  %v1107_v26 = vpack.c.b16 %v1086_v32, %v1085_v54  ;;  %v5475_v32 = vpop.f32.mrf.mxu2 }
 0x1cb   : > { %v887_v42 = vpop.f32.mrf.mxu0  ;;  %v976_v44 = vpop.f32.mrf.mxu1 }
 0x1cc   : > { %v1472_v41 = vpack.c.bf16 %v1440_v49, %v1440_v49  ;;  %1406 = vmatmul.bf16.gmra.mxu3 %v1107_v26  ;;  %v977_v4 = vadd.f32 %v976_v44, %v887_v42 }
 0x1ce   : > { %v1696_v0 = vunpack.c.l.b16 %v1472_v41  ;;  %v1023_v19 = vpack.c.bf16 %v977_v4, %v977_v4  ;;  %v1289_v41 = vadd.f32 %v5436_v35, %v5389_v27 }
 0x1cf   : > { %v1367_v50 = vpop.f32.mrf.mxu3 }
 0x1d0   : > { %v5459_v58 = vpack.c.b16 %v1696_v0, %v1695_v22  ;;  %v1368_v59 = vadd.f32 %v1367_v50, %v1279_v45  ;;  %v1087_v23 = vunpack.c.l.b16 %v1023_v19 }
 0x1d2   : > { %2206 = vmatmul.bf16.gmra.mxu2 %v5459_v58  ;;  %v1441_v47 = vmax.f32 %v1368_v59, 0.0 }
 0x1d3   : > { %v889_v1 = vpop.f32.mrf.mxu0  ;;  %v978_v8 = vpop.f32.mrf.mxu1 }
 0x1d4   : > { %v979_v28 = vadd.f32 %v978_v8, %v889_v1  ;;  %v1473_v39 = vpack.c.bf16 %v1441_v47, %v1441_v47  ;;  %v5482_v8 = vpop.f32.mrf.mxu2 }
 0x1d6   : > { %v1024_v46 = vpack.c.bf16 %v979_v28, %v979_v28  ;;  %v1697_v13 = vunpack.c.l.b16 %v1473_v39 }
 0x1d7   : > { %v1369_v51 = vpop.f32.mrf.mxu3 }
 0x1d8   : > { %v1088_v60 = vunpack.c.l.b16 %v1024_v46  ;;  %v1370_v10 = vadd.f32 %v1369_v51, %v1281_v2  ;;  %v1291_v2 = vadd.f32 %v5436_v35, %v5400_v25 }
 0x1da   : > { %v1442_v16 = vmax.f32 %v1370_v10, 0.0  ;;  %v1108_v57 = vpack.c.b16 %v1088_v60, %v1087_v23 }
 0x1db   : > { %v892_v30 = vpop.f32.mrf.mxu0  ;;  %v981_v38 = vpop.f32.mrf.mxu1 }
 0x1dc   : > { %v1474_v21 = vpack.c.bf16 %v1442_v16, %v1442_v16  ;;  %1411 = vmatmul.bf16.gmra.mxu3 %v1108_v57  ;;  %v982_v63 = vadd.f32 %v981_v38, %v892_v30 }
 0x1de   : > { %v1698_v34 = vunpack.c.l.b16 %v1474_v21  ;;  %v1025_v15 = vpack.c.bf16 %v982_v63, %v982_v63  ;;  %v1294_v21 = vadd.f32 %v5436_v35, %v5414_v36 }
 0x1df   : > { %v1372_v43 = vpop.f32.mrf.mxu3 }
 0x1e0   : > { %v5470_v37 = vpack.c.b16 %v1698_v34, %v1697_v13  ;;  %v1373_v12 = vadd.f32 %v1372_v43, %v1284_v62  ;;  %v1089_v20 = vunpack.c.l.b16 %v1025_v15  ;;  %v5488_v62 = vpop.f32.mrf.mxu2 }
 0x1e2   : > { %2211 = vmatmul.bf16.gmra.mxu2 %v5470_v37  ;;  %v1443_v17 = vmax.f32 %v1373_v12, 0.0 }
 0x1e3   : > { %v894_v3 = vpop.f32.mrf.mxu0  ;;  %v983_v6 = vpop.f32.mrf.mxu1 }
 0x1e4   : > { %v984_v55 = vadd.f32 %v983_v6, %v894_v3  ;;  %v1475_v40 = vpack.c.bf16 %v1443_v17, %v1443_v17 }
 0x1e6   : > { %v1026_v24 = vpack.c.bf16 %v984_v55, %v984_v55  ;;  %v1699_v45 = vunpack.c.l.b16 %v1475_v40 }
 0x1e7   : > { %v1374_v18 = vpop.f32.mrf.mxu3 }
 0x1e8   : > { %v1090_v48 = vunpack.c.l.b16 %v1026_v24  ;;  %v1375_v54 = vadd.f32 %v1374_v18, %v1286_v61  ;;  %v1296_v61 = vadd.f32 %v5436_v35, %v5426_v53  ;;  %v5495_v18 = vpop.f32.mrf.mxu2 }
 0x1ea   : > { %v1444_v9 = vmax.f32 %v1375_v54, 0.0  ;;  %v1109_v49 = vpack.c.b16 %v1090_v48, %v1089_v20 }
 0x1eb   : > { %v897_v26 = vpop.f32.mrf.mxu0  ;;  %v986_v42 = vpop.f32.mrf.mxu1 }
 0x1ec   : > { %v1476_v44 = vpack.c.bf16 %v1444_v9, %v1444_v9  ;;  %1416 = vmatmul.bf16.gmra.mxu3 %v1109_v49  ;;  %v987_v0 = vadd.f32 %v986_v42, %v897_v26 }
 0x1ee   : > { %v1700_v7 = vunpack.c.l.b16 %v1476_v44  ;;  %v1027_v19 = vpack.c.bf16 %v987_v0, %v987_v0 }
 0x1ef   : > { %v1377_v22 = vpop.f32.mrf.mxu3 }
 0x1f0   : > { %v5479_v50 = vpack.c.b16 %v1700_v7, %v1699_v45  ;;  %v1378_v4 = vadd.f32 %v1377_v22, %v1289_v41  ;;  %v1091_v51 = vunpack.c.l.b16 %v1027_v19  ;;  %v1299_v41 = vadd.f32 %v5436_v35, %v5431_v33 }
 0x1f2   : > { %2216 = vmatmul.bf16.gmra.mxu2 %v5479_v50  ;;  %v1445_v47 = vmax.f32 %v1378_v4, 0.0  ;;  %v5499_v4 = vpop.f32.mrf.mxu2 }
 0x1f3   : > { %v899_v59 = vpop.f32.mrf.mxu0  ;;  %v988_v1 = vpop.f32.mrf.mxu1 }
 0x1f4   : > { %v989_v28 = vadd.f32 %v988_v1, %v899_v59  ;;  %v1477_v10 = vpack.c.bf16 %v1445_v47, %v1445_v47  ;;  %v1301_v47 = vadd.f32 %v5436_v35, %v5440_v5 }
 0x1f6   : > { %v1028_v27 = vpack.c.bf16 %v989_v28, %v989_v28  ;;  %v1701_v13 = vunpack.c.l.b16 %v1477_v10 }
 0x1f7   : > { %v1379_v46 = vpop.f32.mrf.mxu3 }
 0x1f8   : > { %v1092_v23 = vunpack.c.l.b16 %v1028_v27  ;;  %v1380_v60 = vadd.f32 %v1379_v46, %v1291_v2 }
 0x1fa   : > { %v1446_v39 = vmax.f32 %v1380_v60, 0.0  ;;  %v1110_v16 = vpack.c.b16 %v1092_v23, %v1091_v51 }
 0x1fb   : > { %v902_v57 = vpop.f32.mrf.mxu0  ;;  %v991_v30 = vpop.f32.mrf.mxu1 }
 0x1fc   : > { %v1478_v38 = vpack.c.bf16 %v1446_v39, %v1446_v39  ;;  %1421 = vmatmul.bf16.gmra.mxu3 %v1110_v16  ;;  %v992_v43 = vadd.f32 %v991_v30, %v902_v57  ;;  %v5503_v57 = vpop.f32.mrf.mxu2 }
 0x1fe   : > { %v1702_v25 = vunpack.c.l.b16 %v1478_v38  ;;  %v1029_v15 = vpack.c.bf16 %v992_v43, %v992_v43  ;;  %v1304_v38 = vadd.f32 %v5436_v35, %v5444_v52  ;;  %v1306_v43 = vadd.f32 %v5436_v35, %v5450_v14 }
 0x1ff   : > { %v1382_v34 = vpop.f32.mrf.mxu3  ;;  %v1309_v52 = vadd.f32 %v5436_v35, %v5455_v56  ;;  %v1311_v14 = vadd.f32 %v5436_v35, %v5464_v29 }
 0x200   : > { %v5490_v63 = vpack.c.b16 %v1702_v25, %v1701_v13  ;;  %v1383_v12 = vadd.f32 %v1382_v34, %v1294_v21  ;;  %v1093_v20 = vunpack.c.l.b16 %v1029_v15 }
 0x202   : > { %2221 = vmatmul.bf16.gmra.mxu2 %v5490_v63  ;;  %v1447_v17 = vmax.f32 %v1383_v12, 0.0 }
 0x203   : > { %v904_v3 = vpop.f32.mrf.mxu0  ;;  %v993_v6 = vpop.f32.mrf.mxu1 }
 0x204   : > { %v994_v55 = vadd.f32 %v993_v6, %v904_v3  ;;  %v1479_v40 = vpack.c.bf16 %v1447_v17, %v1447_v17  ;;  %v5509_v12 = vpop.f32.mrf.mxu2 }
 0x206   : > { %v1030_v36 = vpack.c.bf16 %v994_v55, %v994_v55  ;;  %v1703_v45 = vunpack.c.l.b16 %v1479_v40 }
 0x207   : > { %v1384_v24 = vpop.f32.mrf.mxu3 }
 0x208   : > { %v1094_v48 = vunpack.c.l.b16 %v1030_v36  ;;  %v1385_v54 = vadd.f32 %v1384_v24, %v1296_v61 }
 0x20a   : > { %v1448_v9 = vmax.f32 %v1385_v54, 0.0  ;;  %v1111_v49 = vpack.c.b16 %v1094_v48, %v1093_v20 }
 0x20b   : > { %v907_v26 = vpop.f32.mrf.mxu0  ;;  %v996_v42 = vpop.f32.mrf.mxu1 }
 0x20c   : > { %v1480_v44 = vpack.c.bf16 %v1448_v9, %v1448_v9  ;;  %1426 = vmatmul.bf16.gmra.mxu3 %v1111_v49  ;;  %v997_v22 = vadd.f32 %v996_v42, %v907_v26  ;;  %v5513_v48 = vpop.f32.mrf.mxu2 }
 0x20e   : > { %v1704_v53 = vunpack.c.l.b16 %v1480_v44  ;;  %v1031_v28 = vpack.c.bf16 %v997_v22, %v997_v22 }
 0x20f   : > { %v1387_v7 = vpop.f32.mrf.mxu3 }
 0x210   : > { %v1730_v0 = vpack.c.b16 %v1704_v53, %v1703_v45  ;;  %v1388_v59 = vadd.f32 %v1387_v7, %v1299_v41  ;;  %v1095_v33 = vunpack.c.l.b16 %v1031_v28  ;;  %v1314_v45 = vadd.f32 %v5436_v35, %v5468_v31 }
 0x212   : > { %2226 = vmatmul.bf16.gmra.mxu2 %v1730_v0  ;;  %v1449_v27 = vmax.f32 %v1388_v59, 0.0 }
 0x213   : > { %v909_v1 = vpop.f32.mrf.mxu0  ;;  %v998_v19 = vpop.f32.mrf.mxu1 }
 0x214   : > { %v999_v2 = vadd.f32 %v998_v19, %v909_v1  ;;  %v1481_v10 = vpack.c.bf16 %v1449_v27, %v1449_v27  ;;  %v5517_v42 = vpop.f32.mrf.mxu2 }
 0x216   : > { %v1032_v46 = vpack.c.bf16 %v999_v2, %v999_v2  ;;  %v1705_v21 = vunpack.c.l.b16 %v1481_v10 }
 0x217   : > { %v1389_v51 = vpop.f32.mrf.mxu3 }
 0x218   : > { %v1096_v23 = vunpack.c.l.b16 %v1032_v46  ;;  %v1390_v60 = vadd.f32 %v1389_v51, %v1301_v47 }
 0x21a   : > { %v1450_v39 = vmax.f32 %v1390_v60, 0.0  ;;  %v1112_v16 = vpack.c.b16 %v1096_v23, %v1095_v33  ;;  %v1321_v23 = vadd.f32 %v5436_v35, %v5488_v62  ;;  %v1326_v62 = vadd.f32 %v5436_v35, %v5499_v4 }
 0x21b   : > { %v1331_v4 = vadd.f32 %v5436_v35, %v5509_v12  ;;  %v1336_v12 = vadd.f32 %v5436_v35, %v5517_v42 }
 0x21c   : > { %v1482_v30 = vpack.c.bf16 %v1450_v39, %v1450_v39  ;;  %1431 = vmatmul.bf16.gmra.mxu3 %v1112_v16  ;;  %v5526_v1 = vpop.f32.mrf.mxu2 }
 0x21e   : > { %v1706_v13 = vunpack.c.l.b16 %v1482_v30 }
 0x21f   : > { %v1392_v25 = vpop.f32.mrf.mxu3 }
 0x220   : > { %v1731_v5 = vpack.c.b16 %v1706_v13, %v1705_v21  ;;  %v1393_v34 = vadd.f32 %v1392_v25, %v1304_v38 }
 0x222   : > { %2231 = vmatmul.bf16.gmra.mxu2 %v1731_v5  ;;  %v1451_v3 = vmax.f32 %v1393_v34, 0.0 }
 0x224   : > { %v1483_v55 = vpack.c.bf16 %v1451_v3, %v1451_v3  ;;  %v5534_v27 = vpop.f32.mrf.mxu2 }
 0x225   : > { %v1341_v42 = vadd.f32 %v5436_v35, %v5534_v27 }
 0x226   : > { %v1707_v36 = vunpack.c.l.b16 %v1483_v55 }
 0x227   : > { %v1394_v6 = vpop.f32.mrf.mxu3 }
 0x228   : > { %v1395_v15 = vadd.f32 %v1394_v6, %v1306_v43 }
 0x22a   : > { %v1452_v61 = vmax.f32 %v1395_v15, 0.0 }
 0x22c   : > { %v1484_v17 = vpack.c.bf16 %v1452_v61, %v1452_v61  ;;  %v5542_v10 = vpop.f32.mrf.mxu2 }
 0x22e   : > { %v1708_v24 = vunpack.c.l.b16 %v1484_v17  ;;  %v1329_v17 = vadd.f32 %v5436_v35, %v5503_v57  ;;  %v1334_v57 = vadd.f32 %v5436_v35, %v5513_v48  ;;  %v1339_v48 = vadd.f32 %v5436_v35, %v5526_v1 }
 0x22f   : > { %v1397_v20 = vpop.f32.mrf.mxu3  ;;  %v1344_v1 = vadd.f32 %v5436_v35, %v5542_v10 }
 0x230   : > { %v1732_v54 = vpack.c.b16 %v1708_v24, %v1707_v36  ;;  %v1398_v40 = vadd.f32 %v1397_v20, %v1309_v52 }
 0x232   : > { %1757 = vmatpush.bf16.msrb.mxu0 %v1732_v54  ;;  %2236 = vmatmul.bf16.gmra.mxu2 %v1732_v54  ;;  %v1453_v9 = vmax.f32 %v1398_v40, 0.0 }
 0x234   : > { %v1485_v44 = vpack.c.bf16 %v1453_v9, %v1453_v9 }
 0x236   : > { %1758 = vmatpush.bf16.msrb.mxu0 %v1731_v5  ;;  %v1709_v53 = vunpack.c.l.b16 %v1485_v44  ;;  %v5548_v5 = vpop.f32.mrf.mxu2 }
 0x237   : > { %v1399_v49 = vpop.f32.mrf.mxu3  ;;  %v1346_v27 = vadd.f32 %v5436_v35, %v5548_v5 }
 0x238   : > { %v1400_v26 = vadd.f32 %v1399_v49, %v1311_v14 }
 0x23a   : > { %v1454_v56 = vmax.f32 %v1400_v26, 0.0  ;;  %1759 = vmatpush.bf16.msrb.mxu0 %v1730_v0  ;;  %v1316_v0 = vadd.f32 %v5436_v35, %v5475_v32 }
 0x23c   : > { %v1486_v41 = vpack.c.bf16 %v1454_v56, %v1454_v56 }
 0x23e   : > { %v1710_v7 = vunpack.c.l.b16 %v1486_v41  ;;  %1760 = vmatpush.bf16.msrb.mxu0 %v5490_v63 }
 0x23f   : > { %v1402_v22 = vpop.f32.mrf.mxu3 }
 0x240   : > { %v5522_v59 = vpack.c.b16 %v1710_v7, %v1709_v53  ;;  %v1403_v29 = vadd.f32 %v1402_v22, %v1314_v45 }
 0x242   : > { %1761 = vmatpush.bf16.msrb.mxu0 %v5479_v50  ;;  %2241 = vmatmul.bf16.gmra.mxu2 %v5522_v59  ;;  %v1455_v19 = vmax.f32 %v1403_v29, 0.0  ;;  %v1319_v50 = vadd.f32 %v5436_v35, %v5482_v8 }
 0x244   : > { %v1487_v2 = vpack.c.bf16 %v1455_v19, %v1455_v19 }
 0x245   : > { %v5553_v61 = vpop.f32.mrf.mxu2 }
 0x246   : > { %1762 = vmatpush.bf16.msrb.mxu0 %v5470_v37  ;;  %v1711_v46 = vunpack.c.l.b16 %v1487_v2 }
 0x247   : > { %v1404_v31 = vpop.f32.mrf.mxu3 }
 0x248   : > { %v1405_v28 = vadd.f32 %v1404_v31, %v1316_v0 }
 0x24a   : > { %v1456_v63 = vmax.f32 %v1405_v28, 0.0  ;;  %1763 = vmatpush.bf16.msrb.mxu0 %v5459_v58 }
 0x24c   : > { %v1488_v47 = vpack.c.bf16 %v1456_v63, %v1456_v63 }
 0x24d   : > { %v5562_v40 = vpop.f32.mrf.mxu2 }
 0x24e   : > { %v1712_v51 = vunpack.c.l.b16 %v1488_v47  ;;  %1764 = vmatpush.bf16.msrb.mxu0 %v5448_v11  ;;  %v1324_v11 = vadd.f32 %v5436_v35, %v5495_v18 }
 0x24f   : > { %v1407_v32 = vpop.f32.mrf.mxu3 }
 0x250   : > { %v5537_v33 = vpack.c.b16 %v1712_v51, %v1711_v46  ;;  %v1408_v37 = vadd.f32 %v1407_v32, %v1319_v50 }
 0x252   : > { %2246 = vmatmul.bf16.gmra.mxu2 %v5537_v33  ;;  %v1457_v58 = vmax.f32 %v1408_v37, 0.0 }
 0x254   : > { %v1489_v39 = vpack.c.bf16 %v1457_v58, %v1457_v58 }
 0x255   : > { %v5566_v7 = vpop.f32.mrf.mxu2 }
 0x256   : > { %v1713_v38 = vunpack.c.l.b16 %v1489_v39 }
 0x257   : > { %v1409_v60 = vpop.f32.mrf.mxu3 }
 0x258   : > { %v1410_v8 = vadd.f32 %v1409_v60, %v1321_v23 }
 0x25a   : > { %v1458_v16 = vmax.f32 %v1410_v8, 0.0 }
 0x25c   : > { %v1490_v30 = vpack.c.bf16 %v1458_v16, %v1458_v16 }
 0x25d   : > { %v5570_v28 = vpop.f32.mrf.mxu2 }
 0x25e   : > { %v1714_v21 = vunpack.c.l.b16 %v1490_v30 }
 0x25f   : > { %v1412_v13 = vpop.f32.mrf.mxu3 }
 0x260   : > { %v5546_v25 = vpack.c.b16 %v1714_v21, %v1713_v38  ;;  %v1413_v34 = vadd.f32 %v1412_v13, %v1324_v11 }
 0x262   : > { %2251 = vmatmul.bf16.gmra.mxu2 %v5546_v25  ;;  %v1459_v43 = vmax.f32 %v1413_v34, 0.0 }
 0x264   : > { %v1491_v15 = vpack.c.bf16 %v1459_v43, %v1459_v43 }
 0x265   : > { %v5574_v23 = vpop.f32.mrf.mxu2 }
 0x266   : > { %v1715_v52 = vunpack.c.l.b16 %v1491_v15 }
 0x267   : > { %v1414_v3 = vpop.f32.mrf.mxu3 }
 0x268   : > { %v1415_v6 = vadd.f32 %v1414_v3, %v1326_v62  ;;  %v4260_v3 = vld [vmem:[%s4837_s11] sm:$0xf] }
 0x26a   : > { %v1460_v55 = vmax.f32 %v1415_v6, 0.0  ;;  %v4582_v6 = vld [vmem:[%s4837_s11 + $0x4] sm:$0xf0] }
 0x26c   : > { %v1492_v18 = vpack.c.bf16 %v1460_v55, %v1460_v55  ;;  %v5586_v55 = vor.u32 %v4582_v6, %v4260_v3  ;;  %v4657_v6 = vld [vmem:[%s6413_s3 + $0x60] sm:$0xff] }
 0x26d   : > { %v5580_v11 = vpop.f32.mrf.mxu2 }
 0x26e   : > { %v1716_v36 = vunpack.c.l.b16 %v1492_v18  ;;  %1765 = vmatmul.bf16.vlgmr.msrb.gmra.mxu0 %v5586_v55 }
 0x26f   : > { %v1417_v24 = vpop.f32.mrf.mxu3 }
 0x270   : > { %v5557_v20 = vpack.c.b16 %v1716_v36, %v1715_v52  ;;  %v1418_v54 = vadd.f32 %v1417_v24, %v1329_v17 }
 0x272   : > { %2256 = vmatmul.bf16.gmra.mxu2 %v5557_v20  ;;  %v1461_v14 = vmax.f32 %v1418_v54, 0.0 }
 0x274   : > { %v1493_v26 = vpack.c.bf16 %v1461_v14, %v1461_v14  ;;  %v4584_v14 = vld [vmem:[%s4837_s11 + $0x14] sm:$0xf0] }
 0x275   : > { %v5588_v10 = vpop.f32.mrf.mxu2 }
 0x276   : > { %v1717_v41 = vunpack.c.l.b16 %v1493_v26  ;;  %v4586_v26 = vld [vmem:[%s4837_s11 + $0x24] sm:$0xf0] }
 0x277   : > { %v1419_v9 = vpop.f32.mrf.mxu3 }
 0x278   : > { %v1420_v49 = vadd.f32 %v1419_v9, %v1331_v4  ;;  %v4268_v4 = vld [vmem:[%s4837_s11 + $0x10] sm:$0xf] }
 0x279   : > { %v5595_v9 = vor.u32 %v4584_v14, %v4268_v4  ;;  %v4332_v4 = vld [vmem:[%s4837_s11 + $0x90] sm:$0xf]  ;;  %v4600_v14 = vld [vmem:[%s4837_s11 + $0x94] sm:$0xf0] }
 0x27a   : > { %v1462_v44 = vmax.f32 %v1420_v49, 0.0  ;;  %v4276_v49 = vld [vmem:[%s4837_s11 + $0x20] sm:$0xf] }
 0x27c   : > { %v1494_v56 = vpack.c.bf16 %v1462_v44, %v1462_v44  ;;  %v5602_v44 = vor.u32 %v4586_v26, %v4276_v49  ;;  %v5695_v49 = vor.u32 %v4600_v14, %v4332_v4  ;;  %v4595_v26 = vld [vmem:[%s4837_s11 + $0x74] sm:$0xf] }
 0x27d   : > { %v5591_v54 = vpop.f32.mrf.mxu2 }
 0x27e   : > { %v1718_v45 = vunpack.c.l.b16 %v1494_v56  ;;  %1770 = vmatmul.bf16.gmra.mxu0 %v5595_v9  ;;  %v4581_v56 = vld [vmem:[%s4837_s11 + $0x4] sm:$0xf] }
 0x27f   : > { %v1422_v53 = vpop.f32.mrf.mxu3 }
 0x280   : > { %v1737_v22 = vpack.c.b16 %v1718_v45, %v1717_v41  ;;  %v1423_v29 = vadd.f32 %v1422_v53, %v1334_v57  ;;  %v4262_v57 = vld [vmem:[%s4837_s11 + $0x8] sm:$0xf0]  ;;  %v4583_v53 = vld [vmem:[%s4837_s11 + $0x14] sm:$0xf] }
 0x281   : > { %v5608_v41 = vor.u32 %v4581_v56, %v4262_v57  ;;  %v4318_v56 = vld [vmem:[%s4837_s11 + $0x78] sm:$0xf0]  ;;  %v4653_v57 = vld [vmem:[%s6413_s3 + $0x40] sm:$0xff] }
 0x282   : > { %2261 = vmatmul.bf16.gmra.mxu2 %v1737_v22  ;;  %v1463_v0 = vmax.f32 %v1423_v29, 0.0  ;;  %v4292_v29 = vld [vmem:[%s4837_s11 + $0x40] sm:$0xf] }
 0x284   : > { %v1495_v2 = vpack.c.bf16 %v1463_v0, %v1463_v0  ;;  %v4585_v0 = vld [vmem:[%s4837_s11 + $0x24] sm:$0xf] }
 0x286   : > { %v1719_v50 = vunpack.c.l.b16 %v1495_v2  ;;  %v4300_v2 = vld [vmem:[%s4837_s11 + $0x50] sm:$0xf] }
 0x287   : > { %v1424_v19 = vpop.f32.mrf.mxu3 }
 0x288   : > { %v1425_v31 = vadd.f32 %v1424_v19, %v1336_v12  ;;  %v4278_v19 = vld [vmem:[%s4837_s11 + $0x28] sm:$0xf0] }
 0x28a   : > { %v1464_v63 = vmax.f32 %v1425_v31, 0.0  ;;  %v5629_v31 = vor.u32 %v4585_v0, %v4278_v19  ;;  %v4597_v0 = vld [vmem:[%s4837_s11 + $0x84] sm:$0xf]  ;;  %v4326_v19 = vld [vmem:[%s4837_s11 + $0x88] sm:$0xf0] }
 0x28c   : > { %v1496_v47 = vpack.c.bf16 %v1464_v63, %v1464_v63  ;;  %v4592_v63 = vld [vmem:[%s4837_s11 + $0x54] sm:$0xf0] }
 0x28e   : > { %v1720_v46 = vunpack.c.l.b16 %v1496_v47  ;;  %1775 = vmatmul.bf16.gmra.mxu0 %v5602_v44  ;;  %v5634_v47 = vor.u32 %v4592_v63, %v4300_v2  ;;  %v5713_v2 = vor.u32 %v4597_v0, %v4326_v19 }
 0x28f   : > { %v1427_v51 = vpop.f32.mrf.mxu3 }
 0x290   : > { %v1738_v32 = vpack.c.b16 %v1720_v46, %v1719_v50  ;;  %v1428_v37 = vadd.f32 %v1427_v51, %v1339_v48  ;;  %v4587_v48 = vld [vmem:[%s4837_s11 + $0x34] sm:$0xf]  ;;  %v4286_v50 = vld [vmem:[%s4837_s11 + $0x38] sm:$0xf0]  ;;  %v4308_v51 = vld [vmem:[%s4837_s11 + $0x60] sm:$0xf] }
 0x291   : > { %v5639_v46 = vor.u32 %v4587_v48, %v4286_v50 }
 0x292   : > { %2266 = vmatmul.bf16.gmra.mxu2 %v1738_v32  ;;  %v1465_v58 = vmax.f32 %v1428_v37, 0.0 }
 0x294   : > { %v1497_v39 = vpack.c.bf16 %v1465_v58, %v1465_v58  ;;  %v4294_v58 = vld [vmem:[%s4837_s11 + $0x48] sm:$0xf0] }
 0x296   : > { %v1721_v38 = vunpack.c.l.b16 %v1497_v39  ;;  %v4596_v39 = vld [vmem:[%s4837_s11 + $0x74] sm:$0xf0] }
 0x297   : > { %v1429_v60 = vpop.f32.mrf.mxu3 }
 0x298   : > { %v1430_v8 = vadd.f32 %v1429_v60, %v1341_v42  ;;  %v4589_v42 = vld [vmem:[%s4837_s11 + $0x44] sm:$0xf] }
 0x299   : > { %v5649_v60 = vor.u32 %v4589_v42, %v4294_v58  ;;  %v4348_v42 = vld [vmem:[%s4837_s11 + $0xb0] sm:$0xf]  ;;  %v4604_v58 = vld [vmem:[%s4837_s11 + $0xb4] sm:$0xf0] }
 0x29a   : > { %v1466_v16 = vmax.f32 %v1430_v8, 0.0  ;;  %v4316_v8 = vld [vmem:[%s4837_s11 + $0x70] sm:$0xf] }
 0x29c   : > { %v1498_v30 = vpack.c.bf16 %v1466_v16, %v1466_v16  ;;  %v5654_v16 = vor.u32 %v4596_v39, %v4316_v8 }
 0x29e   : > { %v1722_v21 = vunpack.c.l.b16 %v1498_v30  ;;  %v4591_v30 = vld [vmem:[%s4837_s11 + $0x54] sm:$0xf] }
 0x29f   : > { %v1432_v13 = vpop.f32.mrf.mxu3 }
 0x2a0   : > { %v1739_v34 = vpack.c.b16 %v1722_v21, %v1721_v38  ;;  %v1433_v62 = vadd.f32 %v1432_v13, %v1344_v1  ;;  %v4302_v1 = vld [vmem:[%s4837_s11 + $0x58] sm:$0xf0]  ;;  %v4659_v13 = vld [vmem:[%s6413_s3 + $0x70] sm:$0xff] }
 0x2a1   : > { %v5659_v38 = vor.u32 %v4591_v30, %v4302_v1  ;;  %v4660_v21 = vld [vmem:[%s6413_s3 + $0x78] sm:$0xff]  ;;  %v5718_v30 = vor.u32 %v4604_v58, %v4348_v42  ;;  %v4364_v58 = vld [vmem:[%s4837_s11 + $0xd0] sm:$0xf] }
 0x2a2   : > { %2271 = vmatmul.bf16.gmra.mxu2 %v1739_v34  ;;  %v1467_v43 = vmax.f32 %v1433_v62, 0.0  ;;  %2282 = vmatpush.bf16.msrb.mxu3 %v4660_v21  ;;  %v4598_v62 = vld [vmem:[%s4837_s11 + $0x84] sm:$0xf0]  ;;  %v4599_v21 = vld [vmem:[%s4837_s11 + $0x94] sm:$0xf] }
 0x2a4   : > { %v1499_v17 = vpack.c.bf16 %v1467_v43, %v1467_v43 }
 0x2a6   : > { %v1723_v24 = vunpack.c.l.b16 %v1499_v17  ;;  %2283 = vmatpush.bf16.msrb.mxu3 %v4659_v13  ;;  %v4334_v13 = vld [vmem:[%s4837_s11 + $0x98] sm:$0xf0] }
 0x2a7   : > { %v1434_v15 = vpop.f32.mrf.mxu3 }
 0x2a8   : > { %v1435_v18 = vadd.f32 %v1434_v15, %v1346_v27  ;;  %v4658_v27 = vld [vmem:[%s6413_s3 + $0x68] sm:$0xff]  ;;  %v4593_v15 = vld [vmem:[%s4837_s11 + $0x64] sm:$0xf] }
 0x2aa   : > { %v1468_v52 = vmax.f32 %v1435_v18, 0.0  ;;  %2284 = vmatpush.bf16.msrb.mxu3 %v4658_v27  ;;  %v4310_v18 = vld [vmem:[%s4837_s11 + $0x68] sm:$0xf0] }
 0x2ab   : > { %v5681_v17 = vor.u32 %v4593_v15, %v4310_v18 }
 0x2ac   : > { %v1500_v36 = vpack.c.bf16 %v1468_v52, %v1468_v52 }
 0x2ae   : > { %v1724_v35 = vunpack.c.l.b16 %v1500_v36  ;;  %2285 = vmatpush.bf16.msrb.mxu3 %v4657_v6  ;;  %v4656_v36 = vld [vmem:[%s6413_s3 + $0x58] sm:$0xff] }
 0x2b0   : > { %v1740_v5 = vpack.c.b16 %v1724_v35, %v1723_v24  ;;  %v4655_v24 = vld [vmem:[%s6413_s3 + $0x50] sm:$0xff] }
 0x2b2   : > { %1846 = vmatpush.bf16.msrb.mxu1 %v1740_v5  ;;  %2276 = vmatmul.bf16.gmra.mxu2 %v1740_v5  ;;  %v4654_v5 = vld [vmem:[%s6413_s3 + $0x48] sm:$0xff] }
 0x2b3   : > { %2286 = vmatpush.bf16.msrb.mxu3 %v4656_v36 }
 0x2b6   : > { %1847 = vmatpush.bf16.msrb.mxu1 %v1739_v34  ;;  %v4324_v34 = vld [vmem:[%s4837_s11 + $0x80] sm:$0xf] }
 0x2b7   : > { %v5673_v43 = vor.u32 %v4598_v62, %v4324_v34  ;;  %2287 = vmatpush.bf16.msrb.mxu3 %v4655_v24  ;;  %v4356_v24 = vld [vmem:[%s4837_s11 + $0xc0] sm:$0xf] }
 0x2ba   : > { %1848 = vmatpush.bf16.msrb.mxu1 %v1738_v32  ;;  %v4594_v32 = vld [vmem:[%s4837_s11 + $0x64] sm:$0xf0] }
 0x2bb   : > { %v5644_v37 = vor.u32 %v4594_v32, %v4308_v51  ;;  %2288 = vmatpush.bf16.msrb.mxu3 %v4654_v5  ;;  %v4606_v5 = vld [vmem:[%s4837_s11 + $0xc4] sm:$0xf0] }
 0x2be   : > { %1849 = vmatpush.bf16.msrb.mxu1 %v1737_v22 }
 0x2bf   : > { %2289 = vmatpush.bf16.msrb.mxu3 %v4653_v57  ;;  %v4601_v57 = vld [vmem:[%s4837_s11 + $0xa4] sm:$0xf] }
 0x2c2   : > { %1850 = vmatpush.bf16.msrb.mxu1 %v5557_v20  ;;  %v4588_v20 = vld [vmem:[%s4837_s11 + $0x34] sm:$0xf0] }
 0x2c6   : > { %1851 = vmatpush.bf16.msrb.mxu1 %v5546_v25  ;;  %v4284_v25 = vld [vmem:[%s4837_s11 + $0x30] sm:$0xf] }
 0x2c7   : > { %v5614_v45 = vor.u32 %v4588_v20, %v4284_v25  ;;  %v5703_v25 = vor.u32 %v4595_v26, %v4318_v56  ;;  %v5728_v26 = vor.u32 %v4606_v5, %v4356_v24 }
 0x2c9   : > { %1780 = vmatmul.bf16.gmra.mxu0 %v5614_v45 }
 0x2ca   : > { %1852 = vmatpush.bf16.msrb.mxu1 %v5537_v33  ;;  %v4270_v33 = vld [vmem:[%s4837_s11 + $0x18] sm:$0xf0] }
 0x2cb   : > { %v5619_v22 = vor.u32 %v4583_v53, %v4270_v33  ;;  %v4340_v33 = vld [vmem:[%s4837_s11 + $0xa0] sm:$0xf] }
 0x2ce   : > { %1853 = vmatpush.bf16.msrb.mxu1 %v5522_v59  ;;  %v4590_v59 = vld [vmem:[%s4837_s11 + $0x44] sm:$0xf0] }
 0x2cf   : > { %v5624_v12 = vor.u32 %v4590_v59, %v4292_v29  ;;  %v4602_v29 = vld [vmem:[%s4837_s11 + $0xa4] sm:$0xf0] }
 0x2d0   : > { %v5708_v59 = vor.u32 %v4602_v29, %v4340_v33  ;;  %v4342_v33 = vld [vmem:[%s4837_s11 + $0xa8] sm:$0xf0] }
 0x2d1   : > { %1854 = vmatmul.bf16.vlgmr.msrb.gmra.mxu1 %v5608_v41 }
 0x2d9   : > { %1785 = vmatmul.bf16.gmra.mxu0 %v5624_v12 }
 0x2e1   : > { %1859 = vmatmul.bf16.gmra.mxu1 %v5619_v22 }
 0x2e9   : > { %1790 = vmatmul.bf16.gmra.mxu0 %v5634_v47 }
 0x2eb   : > { %v1766_v3 = vpop.f32.mrf.mxu0 }
 0x2f1   : > { %1864 = vmatmul.bf16.gmra.mxu1 %v5629_v31 }
 0x2f3   : > { %v1768_v52 = vpop.f32.mrf.mxu0 }
 0x2f9   : > { %1795 = vmatmul.bf16.gmra.mxu0 %v5644_v37 }
 0x2fb   : > { %v1771_v35 = vpop.f32.mrf.mxu0 }
 0x301   : > { %1869 = vmatmul.bf16.gmra.mxu1 %v5639_v46 }
 0x303   : > { %v1773_v20 = vpop.f32.mrf.mxu0 }
 0x309   : > { %1800 = vmatmul.bf16.gmra.mxu0 %v5654_v16 }
 0x30b   : > { %v1776_v53 = vpop.f32.mrf.mxu0 }
 0x311   : > { %1874 = vmatmul.bf16.gmra.mxu1 %v5649_v60 }
 0x313   : > { %v1778_v48 = vpop.f32.mrf.mxu0 }
 0x319   : > { %1805 = vmatmul.bf16.gmra.mxu0 %v5673_v43 }
 0x321   : > { %1879 = vmatmul.bf16.gmra.mxu1 %v5659_v38 }
 0x329   : > { %1810 = vmatmul.bf16.gmra.mxu0 %v5695_v49 }
 0x331   : > { %1884 = vmatmul.bf16.gmra.mxu1 %v5681_v17 }
 0x339   : > { %1815 = vmatmul.bf16.gmra.mxu0 %v5708_v59 }
 0x341   : > { %1889 = vmatmul.bf16.gmra.mxu1 %v5703_v25 }
 0x346   : > { %v1781_v32 = vpop.f32.mrf.mxu0 }
 0x349   : > { %1820 = vmatmul.bf16.gmra.mxu0 %v5718_v30 }
 0x34e   : > { %v1855_v63 = vpop.f32.mrf.mxu1  ;;  %v1783_v15 = vpop.f32.mrf.mxu0 }
 0x34f   : > { %v1856_v50 = vadd.f32 %v1855_v63, %v1766_v3  ;;  %v5723_v3 = vor.u32 %v4599_v21, %v4334_v13 }
 0x351   : > { %1894 = vmatmul.bf16.gmra.mxu1 %v5713_v2  ;;  %v1935_v8 = vpack.c.bf16 %v1856_v50, %v1856_v50 }
 0x353   : > { %v1999_v34 = vunpack.c.l.b16 %v1935_v8  ;;  %v4608_v8 = vld [vmem:[%s4837_s11 + $0xd4] sm:$0xf0] }
 0x354   : > { %v5738_v21 = vor.u32 %v4608_v8, %v4364_v58 }
 0x356   : > { %v1857_v51 = vpop.f32.mrf.mxu1  ;;  %v1786_v36 = vpop.f32.mrf.mxu0 }
 0x357   : > { %v1858_v39 = vadd.f32 %v1857_v51, %v1768_v52 }
 0x359   : > { %v1936_v1 = vpack.c.bf16 %v1858_v39, %v1858_v39  ;;  %1825 = vmatmul.bf16.gmra.mxu0 %v5728_v26 }
 0x35b   : > { %v2000_v62 = vunpack.c.l.b16 %v1936_v1 }
 0x35d   : > { %v2031_v27 = vpack.c.b16 %v2000_v62, %v1999_v34  ;;  %v4603_v34 = vld [vmem:[%s4837_s11 + $0xb4] sm:$0xf]  ;;  %v4350_v62 = vld [vmem:[%s4837_s11 + $0xb8] sm:$0xf0] }
 0x35e   : > { %v1860_v6 = vpop.f32.mrf.mxu1  ;;  %v1788_v50 = vpop.f32.mrf.mxu0 }
 0x35f   : > { %2290 = vmatmul.bf16.vlgmr.msrb.gmra.mxu3 %v2031_v27  ;;  %v1861_v18 = vadd.f32 %v1860_v6, %v1771_v35  ;;  %v5733_v35 = vor.u32 %v4601_v57, %v4342_v33 }
 0x361   : > { %1899 = vmatmul.bf16.gmra.mxu1 %v5723_v3  ;;  %v1937_v4 = vpack.c.bf16 %v1861_v18, %v1861_v18  ;;  %6500 = vst [vmem:[#allocation2_spill] sm:$0xff] %v5733_v35 }
 0x363   : > { %v2001_v29 = vunpack.c.l.b16 %v1937_v4  ;;  %v4372_v4 = vld [vmem:[%s4837_s11 + $0xe0] sm:$0xf] }
 0x366   : > { %v1862_v52 = vpop.f32.mrf.mxu1  ;;  %v1791_v42 = vpop.f32.mrf.mxu0 }
 0x367   : > { %v1863_v14 = vadd.f32 %v1862_v52, %v1773_v20 }
 0x369   : > { %v1938_v56 = vpack.c.bf16 %v1863_v14, %v1863_v14  ;;  %1830 = vmatmul.bf16.gmra.mxu0 %v5738_v21  ;;  %v4610_v14 = vld [vmem:[%s4837_s11 + $0xe4] sm:$0xf0] }
 0x36a   : > { %v5748_v33 = vor.u32 %v4610_v14, %v4372_v4 }
 0x36b   : > { %v2002_v0 = vunpack.c.l.b16 %v1938_v56 }
 0x36d   : > { %v2032_v19 = vpack.c.b16 %v2002_v0, %v2001_v29 }
 0x36e   : > { %v1865_v63 = vpop.f32.mrf.mxu1  ;;  %v1793_v24 = vpop.f32.mrf.mxu0 }
 0x36f   : > { %2295 = vmatmul.bf16.gmra.mxu3 %v2032_v19  ;;  %v1866_v20 = vadd.f32 %v1865_v63, %v1776_v53  ;;  %v5743_v53 = vor.u32 %v4603_v34, %v4350_v62  ;;  %v4605_v19 = vld [vmem:[%s4837_s11 + $0xc4] sm:$0xf]  ;;  %v4358_v63 = vld [vmem:[%s4837_s11 + $0xc8] sm:$0xf0]  ;;  %v4612_v34 = vld [vmem:[%s4837_s11 + $0xf4] sm:$0xf0] }
 0x371   : > { %1904 = vmatmul.bf16.gmra.mxu1 %v5733_v35  ;;  %v1939_v39 = vpack.c.bf16 %v1866_v20, %v1866_v20  ;;  %6501 = vst [vmem:[#allocation3_spill] sm:$0xff] %v5743_v53 }
 0x373   : > { %v2003_v27 = vunpack.c.l.b16 %v1939_v39 }
 0x376   : > { %v1867_v51 = vpop.f32.mrf.mxu1  ;;  %v1796_v29 = vpop.f32.mrf.mxu0 }
 0x377   : > { %v1868_v1 = vadd.f32 %v1867_v51, %v1778_v48 }
 0x379   : > { %v1940_v13 = vpack.c.bf16 %v1868_v1, %v1868_v1  ;;  %1835 = vmatmul.bf16.gmra.mxu0 %v5748_v33 }
 0x37b   : > { %v2004_v6 = vunpack.c.l.b16 %v1940_v13  ;;  %v4380_v13 = vld [vmem:[%s4837_s11 + $0xf0] sm:$0xf] }
 0x37d   : > { %v2033_v18 = vpack.c.b16 %v2004_v6, %v2003_v27  ;;  %v5758_v6 = vor.u32 %v4612_v34, %v4380_v13 }
 0x37e   : > { %v1870_v52 = vpop.f32.mrf.mxu1 }
 0x37f   : > { %2300 = vmatmul.bf16.gmra.mxu3 %v2033_v18  ;;  %v1871_v48 = vadd.f32 %v1870_v52, %v1781_v32  ;;  %v5753_v32 = vor.u32 %v4605_v19, %v4358_v63  ;;  %v4607_v52 = vld [vmem:[%s4837_s11 + $0xd4] sm:$0xf] }
 0x381   : > { %1909 = vmatmul.bf16.gmra.mxu1 %v5743_v53  ;;  %v1941_v56 = vpack.c.bf16 %v1871_v48, %v1871_v48  ;;  %6502 = vst [vmem:[#allocation4_spill] sm:$0xff] %v5753_v32  ;;  %v4366_v48 = vld [vmem:[%s4837_s11 + $0xd8] sm:$0xf0] }
 0x383   : > { %v2005_v20 = vunpack.c.l.b16 %v1941_v56 }
 0x386   : > { %v1872_v5 = vpop.f32.mrf.mxu1 }
 0x387   : > { %v1873_v57 = vadd.f32 %v1872_v5, %v1783_v15  ;;  %v1798_v15 = vpop.f32.mrf.mxu0 }
 0x389   : > { %v1942_v0 = vpack.c.bf16 %v1873_v57, %v1873_v57  ;;  %1840 = vmatmul.bf16.gmra.mxu0 %v5758_v6  ;;  %v5763_v57 = vor.u32 %v4607_v52, %v4366_v48 }
 0x38b   : > { %v2006_v51 = vunpack.c.l.b16 %v1942_v0  ;;  %6503 = vst [vmem:[#allocation5_spill] sm:$0xff] %v5763_v57 }
 0x38d   : > { %v2034_v58 = vpack.c.b16 %v2006_v51, %v2005_v20 }
 0x38e   : > { %v1875_v8 = vpop.f32.mrf.mxu1 }
 0x38f   : > { %2305 = vmatmul.bf16.gmra.mxu3 %v2034_v58  ;;  %v1876_v39 = vadd.f32 %v1875_v8, %v1786_v36  ;;  %v1801_v14 = vpop.f32.mrf.mxu0  ;;  %v4609_v58 = vld [vmem:[%s4837_s11 + $0xe4] sm:$0xf]  ;;  %v4374_v8 = vld [vmem:[%s4837_s11 + $0xe8] sm:$0xf0] }
 0x390   : > { %v5768_v34 = vor.u32 %v4609_v58, %v4374_v8 }
 0x391   : > { %1914 = vmatmul.bf16.gmra.mxu1 %v5753_v32  ;;  %v1943_v62 = vpack.c.bf16 %v1876_v39, %v1876_v39 }
 0x392   : > { %6504 = vst [vmem:[#allocation6_spill] sm:$0xff] %v5768_v34 }
 0x393   : > { %v2007_v5 = vunpack.c.l.b16 %v1943_v62 }
 0x396   : > { %v1877_v1 = vpop.f32.mrf.mxu1 }
 0x397   : > { %v1878_v27 = vadd.f32 %v1877_v1, %v1788_v50  ;;  %v1803_v19 = vpop.f32.mrf.mxu0 }
 0x399   : > { %v1944_v18 = vpack.c.bf16 %v1878_v27, %v1878_v27 }
 0x39b   : > { %v2008_v4 = vunpack.c.l.b16 %v1944_v18  ;;  %v5770_v18 = vpop.f32.mrf.mxu2 }
 0x39d   : > { %v2035_v56 = vpack.c.b16 %v2008_v4, %v2007_v5  ;;  %v4667_v4 = vld [vmem:[%s6414_s4 + $0x30] sm:$0xff] }
 0x39e   : > { %v1880_v36 = vpop.f32.mrf.mxu1 }
 0x39f   : > { %2310 = vmatmul.bf16.gmra.mxu3 %v2035_v56  ;;  %v1881_v50 = vadd.f32 %v1880_v36, %v1791_v42  ;;  %v1806_v27 = vpop.f32.mrf.mxu0  ;;  %v4611_v36 = vld [vmem:[%s4837_s11 + $0xf4] sm:$0xf] }
 0x3a1   : > { %1919 = vmatmul.bf16.gmra.mxu1 %v5763_v57  ;;  %v1945_v63 = vpack.c.bf16 %v1881_v50, %v1881_v50  ;;  %v4382_v50 = vld [vmem:[%s4837_s11 + $0xf8] sm:$0xf0] }
 0x3a2   : > { %v5786_v8 = vor.u32 %v4611_v36, %v4382_v50 }
 0x3a3   : > { %v2009_v39 = vunpack.c.l.b16 %v1945_v63  ;;  %v5781_v63 = vpop.f32.mrf.mxu2 }
 0x3a4   : > { %6505 = vst [vmem:[#allocation7_spill] sm:$0xff] %v5786_v8 }
 0x3a6   : > { %v1882_v0 = vpop.f32.mrf.mxu1 }
 0x3a7   : > { %v1883_v20 = vadd.f32 %v1882_v0, %v1793_v24  ;;  %v4668_v24 = vld [vmem:[%s6414_s4 + $0x38] sm:$0xff]  ;;  %v1808_v0 = vpop.f32.mrf.mxu0 }
 0x3a8   : > { %2999 = vmatpush.bf16.msra.mxu2 %v4668_v24 }
 0x3a9   : > { %v1946_v51 = vpack.c.bf16 %v1883_v20, %v1883_v20 }
 0x3ab   : > { %v2010_v1 = vunpack.c.l.b16 %v1946_v51  ;;  %v4666_v51 = vld [vmem:[%s6414_s4 + $0x28] sm:$0xff] }
 0x3ac   : > { %3000 = vmatpush.bf16.msra.mxu2 %v4667_v4 }
 0x3ad   : > { %v2036_v13 = vpack.c.b16 %v2010_v1, %v2009_v39  ;;  %v4665_v39 = vld [vmem:[%s6414_s4 + $0x20] sm:$0xff] }
 0x3ae   : > { %v1885_v62 = vpop.f32.mrf.mxu1 }
 0x3af   : > { %2315 = vmatmul.bf16.gmra.mxu3 %v2036_v13  ;;  %v1886_v42 = vadd.f32 %v1885_v62, %v1796_v29  ;;  %v1811_v13 = vpop.f32.mrf.mxu0  ;;  %v4664_v62 = vld [vmem:[%s6414_s4 + $0x18] sm:$0xff] }
 0x3b0   : > { %3001 = vmatpush.bf16.msra.mxu2 %v4666_v51 }
 0x3b1   : > { %1924 = vmatmul.bf16.gmra.mxu1 %v5768_v34  ;;  %v1947_v48 = vpack.c.bf16 %v1886_v42, %v1886_v42  ;;  %v5795_v42 = vpop.f32.mrf.mxu2 }
 0x3b3   : > { %v2011_v29 = vunpack.c.l.b16 %v1947_v48 }
 0x3b4   : > { %3002 = vmatpush.bf16.msra.mxu2 %v4665_v39 }
 0x3b6   : > { %v1887_v52 = vpop.f32.mrf.mxu1 }
 0x3b7   : > { %v1888_v5 = vadd.f32 %v1887_v52, %v1798_v15 }
 0x3b8   : > { %3003 = vmatpush.bf16.msra.mxu2 %v4664_v62 }
 0x3b9   : > { %v1948_v56 = vpack.c.bf16 %v1888_v5, %v1888_v5  ;;  %v4663_v5 = vld [vmem:[%s6414_s4 + $0x10] sm:$0xff]  ;;  %v5803_v51 = vpop.f32.mrf.mxu2 }
 0x3bb   : > { %v2012_v20 = vunpack.c.l.b16 %v1948_v56 }
 0x3bc   : > { %3004 = vmatpush.bf16.msra.mxu2 %v4663_v5 }
 0x3bd   : > { %v2037_v58 = vpack.c.b16 %v2012_v20, %v2011_v29  ;;  %v1813_v20 = vpop.f32.mrf.mxu0 }
 0x3be   : > { %v1890_v15 = vpop.f32.mrf.mxu1 }
 0x3bf   : > { %2320 = vmatmul.bf16.gmra.mxu3 %v2037_v58  ;;  %v1891_v1 = vadd.f32 %v1890_v15, %v1801_v14  ;;  %v4662_v14 = vld [vmem:[%s6414_s4 + $0x8] sm:$0xff] }
 0x3c0   : > { %3005 = vmatpush.bf16.msra.mxu2 %v4662_v14 }
 0x3c1   : > { %1929 = vmatmul.bf16.gmra.mxu1 %v5786_v8  ;;  %v1949_v52 = vpack.c.bf16 %v1891_v1, %v1891_v1 }
 0x3c3   : > { %v2013_v56 = vunpack.c.l.b16 %v1949_v52 }
 0x3c5   : > { %v1816_v62 = vpop.f32.mrf.mxu0 }
 0x3c6   : > { %v1892_v24 = vpop.f32.mrf.mxu1 }
 0x3c7   : > { %v1893_v48 = vadd.f32 %v1892_v24, %v1803_v19  ;;  %v4661_v19 = vld [vmem:[%s6414_s4] sm:$0xff]  ;;  %v5808_v24 = vpop.f32.mrf.mxu2 }
 0x3c8   : > { %3006 = vmatpush.bf16.msra.mxu2 %v4661_v19 }
 0x3c9   : > { %v1950_v4 = vpack.c.bf16 %v1893_v48, %v1893_v48 }
 0x3cb   : > { %v2014_v36 = vunpack.c.l.b16 %v1950_v4  ;;  %v5813_v4 = vld [vmem:[%s6416_s6 + $0x1] ss:$0 sm:$0xff] }
 0x3cd   : > { %v2038_v50 = vpack.c.b16 %v2014_v36, %v2013_v56  ;;  %v1818_v14 = vpop.f32.mrf.mxu0 }
 0x3ce   : > { %v1895_v29 = vpop.f32.mrf.mxu1 }
 0x3cf   : > { %2325 = vmatmul.bf16.gmra.mxu3 %v2038_v50  ;;  %v1896_v58 = vadd.f32 %v1895_v29, %v1806_v27  ;;  %v2203_v27 = vadd.f32 %v5813_v4, %v5553_v61  ;;  %v5818_v50 = vpop.f32.mrf.mxu2 }
 0x3d1   : > { %v1951_v39 = vpack.c.bf16 %v1896_v58, %v1896_v58 }
 0x3d3   : > { %v2015_v48 = vunpack.c.l.b16 %v1951_v39 }
 0x3d6   : > { %v1897_v15 = vpop.f32.mrf.mxu1 }
 0x3d7   : > { %v1898_v1 = vadd.f32 %v1897_v15, %v1808_v0 }
 0x3d9   : > { %v1952_v52 = vpack.c.bf16 %v1898_v1, %v1898_v1  ;;  %v2205_v1 = vadd.f32 %v5813_v4, %v5562_v40 }
 0x3db   : > { %v2016_v5 = vunpack.c.l.b16 %v1952_v52 }
 0x3dd   : > { %v2039_v56 = vpack.c.b16 %v2016_v5, %v2015_v48 }
 0x3de   : > { %v1900_v36 = vpop.f32.mrf.mxu1 }
 0x3df   : > { %2330 = vmatmul.bf16.gmra.mxu3 %v2039_v56  ;;  %v1901_v29 = vadd.f32 %v1900_v36, %v1811_v13  ;;  %v1821_v36 = vpop.f32.mrf.mxu0 }
 0x3e1   : > { %v1953_v39 = vpack.c.bf16 %v1901_v29, %v1901_v29 }
 0x3e2   : > { %v2291_v0 = vpop.f32.mrf.mxu3 }
 0x3e3   : > { %v2292_v19 = vadd.f32 %v2291_v0, %v2203_v27  ;;  %v2017_v13 = vunpack.c.l.b16 %v1953_v39  ;;  %v5830_v27 = vpop.f32.mrf.mxu2 }
 0x3e5   : > { %v2371_v58 = vmax.f32 %v2292_v19, 0.0 }
 0x3e6   : > { %v1902_v15 = vpop.f32.mrf.mxu1 }
 0x3e7   : > { %2403 = vst [vmem:[%s5825_s28] sm:$0xff] %v2371_v58  ;;  %v1903_v61 = vadd.f32 %v1902_v15, %v1813_v20  ;;  %v2435_v0 = vpack.c.bf16 %v2371_v58, %v2371_v58  ;;  %v2208_v20 = vadd.f32 %v5813_v4, %v5566_v7  ;;  %v2210_v7 = vadd.f32 %v5813_v4, %v5570_v28 }
 0x3e9   : > { %v1954_v52 = vpack.c.bf16 %v1903_v61, %v1903_v61  ;;  %v2499_v40 = vunpack.c.l.b16 %v2435_v0 }
 0x3ea   : > { %v2293_v48 = vpop.f32.mrf.mxu3 }
 0x3eb   : > { %v2018_v5 = vunpack.c.l.b16 %v1954_v52  ;;  %v2294_v56 = vadd.f32 %v2293_v48, %v2205_v1 }
 0x3ed   : > { %v2372_v8 = vmax.f32 %v2294_v56, 0.0  ;;  %v2040_v34 = vpack.c.b16 %v2018_v5, %v2017_v13  ;;  %v1823_v13 = vpop.f32.mrf.mxu0  ;;  %v5838_v5 = vpop.f32.mrf.mxu2 }
 0x3ee   : > { %v1905_v19 = vpop.f32.mrf.mxu1 }
 0x3ef   : > { %2404 = vst [vmem:[%s5825_s28 + $0x8] sm:$0xff] %v2372_v8  ;;  %v2436_v29 = vpack.c.bf16 %v2372_v8, %v2372_v8  ;;  %2335 = vmatmul.bf16.gmra.mxu3 %v2040_v34  ;;  %v1906_v1 = vadd.f32 %v1905_v19, %v1816_v62 }
 0x3f1   : > { %v2500_v15 = vunpack.c.l.b16 %v2436_v29  ;;  %v1955_v8 = vpack.c.bf16 %v1906_v1, %v1906_v1 }
 0x3f2   : > { %v2296_v61 = vpop.f32.mrf.mxu3 }
 0x3f3   : > { %v5835_v39 = vpack.c.b16 %v2500_v15, %v2499_v40  ;;  %v2297_v52 = vadd.f32 %v2296_v61, %v2208_v20  ;;  %v2019_v29 = vunpack.c.l.b16 %v1955_v8 }
 0x3f5   : > { %v2373_v48 = vmax.f32 %v2297_v52, 0.0  ;;  %3007 = vmatmul.bf16.vlgmr.msra.gmra.mxu2 %v5835_v39  ;;  %v1826_v57 = vpop.f32.mrf.mxu0  ;;  %v5846_v1 = vpop.f32.mrf.mxu2 }
 0x3f6   : > { %v1907_v58 = vpop.f32.mrf.mxu1 }
 0x3f7   : > { %2405 = vst [vmem:[%s5825_s28 + $0x10] sm:$0xff] %v2373_v48  ;;  %v1908_v34 = vadd.f32 %v1907_v58, %v1818_v14  ;;  %v2437_v19 = vpack.c.bf16 %v2373_v48, %v2373_v48  ;;  %v2213_v14 = vadd.f32 %v5813_v4, %v5574_v23  ;;  %v2215_v23 = vadd.f32 %v5813_v4, %v5580_v11 }
 0x3f9   : > { %v1956_v56 = vpack.c.bf16 %v1908_v34, %v1908_v34  ;;  %v2501_v28 = vunpack.c.l.b16 %v2437_v19 }
 0x3fa   : > { %v2298_v0 = vpop.f32.mrf.mxu3 }
 0x3fb   : > { %v2020_v40 = vunpack.c.l.b16 %v1956_v56  ;;  %v2299_v62 = vadd.f32 %v2298_v0, %v2210_v7 }
 0x3fd   : > { %v2374_v20 = vmax.f32 %v2299_v62, 0.0  ;;  %v2041_v15 = vpack.c.b16 %v2020_v40, %v2019_v29  ;;  %v1828_v19 = vpop.f32.mrf.mxu0 }
 0x3fe   : > { %v1910_v61 = vpop.f32.mrf.mxu1 }
 0x3ff   : > { %2406 = vst [vmem:[%s5825_s28 + $0x18] sm:$0xff] %v2374_v20  ;;  %v2438_v52 = vpack.c.bf16 %v2374_v20, %v2374_v20  ;;  %2340 = vmatmul.bf16.gmra.mxu3 %v2041_v15  ;;  %v1911_v8 = vadd.f32 %v1910_v61, %v1821_v36  ;;  %v5854_v15 = vpop.f32.mrf.mxu2 }
 0x401   : > { %v2502_v58 = vunpack.c.l.b16 %v2438_v52  ;;  %v1957_v29 = vpack.c.bf16 %v1911_v8, %v1911_v8 }
 0x402   : > { %v2301_v34 = vpop.f32.mrf.mxu3 }
 0x403   : > { %v2302_v56 = vadd.f32 %v2301_v34, %v2213_v14  ;;  %v5848_v7 = vpack.c.b16 %v2502_v58, %v2501_v28  ;;  %v2021_v36 = vunpack.c.l.b16 %v1957_v29 }
 0x405   : > { %v2375_v48 = vmax.f32 %v2302_v56, 0.0  ;;  %3012 = vmatmul.bf16.gmra.mxu2 %v5848_v7  ;;  %v1831_v29 = vpop.f32.mrf.mxu0 }
 0x406   : > { %v1912_v0 = vpop.f32.mrf.mxu1 }
 0x407   : > { %2407 = vst [vmem:[%s5825_s28 + $0x20] sm:$0xff] %v2375_v48  ;;  %v1913_v40 = vadd.f32 %v1912_v0, %v1823_v13  ;;  %v2439_v14 = vpack.c.bf16 %v2375_v48, %v2375_v48  ;;  %v2218_v13 = vadd.f32 %v5813_v4, %v5588_v10  ;;  %v2220_v10 = vadd.f32 %v5813_v4, %v5591_v54 }
 0x409   : > { %v1958_v62 = vpack.c.bf16 %v1913_v40, %v1913_v40  ;;  %v2503_v11 = vunpack.c.l.b16 %v2439_v14 }
 0x40a   : > { %v2303_v20 = vpop.f32.mrf.mxu3 }
 0x40b   : > { %v2022_v61 = vunpack.c.l.b16 %v1958_v62  ;;  %v2304_v52 = vadd.f32 %v2303_v20, %v2215_v23  ;;  %v5861_v23 = vpop.f32.mrf.mxu2 }
 0x40d   : > { %v2376_v28 = vmax.f32 %v2304_v52, 0.0  ;;  %v2042_v58 = vpack.c.b16 %v2022_v61, %v2021_v36 }
 0x40e   : > { %v1915_v34 = vpop.f32.mrf.mxu1 }
 0x40f   : > { %2408 = vst [vmem:[%s5825_s28 + $0x28] sm:$0xff] %v2376_v28  ;;  %v2440_v8 = vpack.c.bf16 %v2376_v28, %v2376_v28  ;;  %2345 = vmatmul.bf16.gmra.mxu3 %v2042_v58  ;;  %v1916_v40 = vadd.f32 %v1915_v34, %v1826_v57 }
 0x411   : > { %v2504_v56 = vunpack.c.l.b16 %v2440_v8  ;;  %v1959_v20 = vpack.c.bf16 %v1916_v40, %v1916_v40 }
 0x412   : > { %v2306_v0 = vpop.f32.mrf.mxu3 }
 0x413   : > { %v2307_v32 = vadd.f32 %v2306_v0, %v2218_v13  ;;  %v5859_v53 = vpack.c.b16 %v2504_v56, %v2503_v11  ;;  %v2023_v57 = vunpack.c.l.b16 %v1959_v20  ;;  %v1833_v13 = vpop.f32.mrf.mxu0  ;;  %v5867_v11 = vpop.f32.mrf.mxu2 }
 0x415   : > { %v2377_v48 = vmax.f32 %v2307_v32, 0.0  ;;  %3017 = vmatmul.bf16.gmra.mxu2 %v5859_v53 }
 0x416   : > { %v1917_v62 = vpop.f32.mrf.mxu1 }
 0x417   : > { %2409 = vst [vmem:[%s5825_s28 + $0x30] sm:$0xff] %v2377_v48  ;;  %v1918_v36 = vadd.f32 %v1917_v62, %v1828_v19  ;;  %v2441_v58 = vpack.c.bf16 %v2377_v48, %v2377_v48  ;;  %v2223_v19 = vadd.f32 %v5813_v4, %v5770_v18 }
 0x419   : > { %v1960_v61 = vpack.c.bf16 %v1918_v36, %v1918_v36  ;;  %v2505_v54 = vunpack.c.l.b16 %v2441_v58 }
 0x41a   : > { %v2308_v52 = vpop.f32.mrf.mxu3 }
 0x41b   : > { %v2024_v14 = vunpack.c.l.b16 %v1960_v61  ;;  %v2309_v28 = vadd.f32 %v2308_v52, %v2220_v10  ;;  %v5878_v18 = vpop.f32.mrf.mxu2 }
 0x41d   : > { %v2378_v34 = vmax.f32 %v2309_v28, 0.0  ;;  %v2043_v8 = vpack.c.b16 %v2024_v14, %v2023_v57  ;;  %v1836_v57 = vpop.f32.mrf.mxu0  ;;  %v2225_v14 = vadd.f32 %v5813_v4, %v5781_v63 }
 0x41e   : > { %v1920_v32 = vpop.f32.mrf.mxu1 }
 0x41f   : > { %2410 = vst [vmem:[%s5825_s28 + $0x38] sm:$0xff] %v2378_v34  ;;  %v2442_v56 = vpack.c.bf16 %v2378_v34, %v2378_v34  ;;  %2350 = vmatmul.bf16.gmra.mxu3 %v2043_v8  ;;  %v1921_v62 = vadd.f32 %v1920_v32, %v1831_v29 }
 0x421   : > { %v2506_v0 = vunpack.c.l.b16 %v2442_v56  ;;  %v1961_v61 = vpack.c.bf16 %v1921_v62, %v1921_v62 }
 0x422   : > { %v2311_v40 = vpop.f32.mrf.mxu3 }
 0x423   : > { %v2312_v20 = vadd.f32 %v2311_v40, %v2223_v19  ;;  %v5872_v36 = vpack.c.b16 %v2506_v0, %v2505_v54  ;;  %v2025_v29 = vunpack.c.l.b16 %v1961_v61 }
 0x425   : > { %v2379_v48 = vmax.f32 %v2312_v20, 0.0  ;;  %3022 = vmatmul.bf16.gmra.mxu2 %v5872_v36  ;;  %v1838_v62 = vpop.f32.mrf.mxu0 }
 0x426   : > { %v1922_v10 = vpop.f32.mrf.mxu1 }
 0x427   : > { %2411 = vst [vmem:[%s5825_s28 + $0x40] sm:$0xff] %v2379_v48  ;;  %v1923_v52 = vadd.f32 %v1922_v10, %v1833_v13  ;;  %v2443_v32 = vpack.c.bf16 %v2379_v48, %v2379_v48  ;;  %v2228_v13 = vadd.f32 %v5813_v4, %v5795_v42  ;;  %v5883_v10 = vpop.f32.mrf.mxu2  ;;  %v2230_v42 = vadd.f32 %v5813_v4, %v5803_v51 }
 0x429   : > { %v1962_v28 = vpack.c.bf16 %v1923_v52, %v1923_v52  ;;  %v2507_v40 = vunpack.c.l.b16 %v2443_v32 }
 0x42a   : > { %v2313_v58 = vpop.f32.mrf.mxu3 }
 0x42b   : > { %v2026_v34 = vunpack.c.l.b16 %v1962_v28  ;;  %v2314_v8 = vadd.f32 %v2313_v58, %v2225_v14 }
 0x42d   : > { %v2380_v56 = vmax.f32 %v2314_v8, 0.0  ;;  %v2044_v19 = vpack.c.b16 %v2026_v34, %v2025_v29 }
 0x42e   : > { %v1925_v54 = vpop.f32.mrf.mxu1 }
 0x42f   : > { %2412 = vst [vmem:[%s5825_s28 + $0x48] sm:$0xff] %v2380_v56  ;;  %v2444_v0 = vpack.c.bf16 %v2380_v56, %v2380_v56  ;;  %2355 = vmatmul.bf16.gmra.mxu3 %v2044_v19  ;;  %v1926_v61 = vadd.f32 %v1925_v54, %v1836_v57  ;;  %v1841_v57 = vpop.f32.mrf.mxu0  ;;  %v5891_v54 = vpop.f32.mrf.mxu2 }
 0x431   : > { %v2508_v63 = vunpack.c.l.b16 %v2444_v0  ;;  %v1963_v58 = vpack.c.bf16 %v1926_v61, %v1926_v61 }
 0x432   : > { %v2316_v20 = vpop.f32.mrf.mxu3 }
 0x433   : > { %v2317_v52 = vadd.f32 %v2316_v20, %v2228_v13  ;;  %v5885_v14 = vpack.c.b16 %v2508_v63, %v2507_v40  ;;  %v2027_v32 = vunpack.c.l.b16 %v1963_v58 }
 0x435   : > { %v2381_v48 = vmax.f32 %v2317_v52, 0.0  ;;  %3027 = vmatmul.bf16.gmra.mxu2 %v5885_v14 }
 0x436   : > { %v1927_v28 = vpop.f32.mrf.mxu1 }
 0x437   : > { %2413 = vst [vmem:[%s5825_s28 + $0x50] sm:$0xff] %v2381_v48  ;;  %v1928_v29 = vadd.f32 %v1927_v28, %v1838_v62  ;;  %v2445_v0 = vpack.c.bf16 %v2381_v48, %v2381_v48  ;;  %v2233_v62 = vadd.f32 %v5813_v4, %v5808_v24  ;;  %v1843_v48 = vpop.f32.mrf.mxu0 }
 0x439   : > { %v1964_v34 = vpack.c.bf16 %v1928_v29, %v1928_v29  ;;  %v2509_v51 = vunpack.c.l.b16 %v2445_v0 }
 0x43a   : > { %v2318_v8 = vpop.f32.mrf.mxu3 }
 0x43b   : > { %v2028_v56 = vunpack.c.l.b16 %v1964_v34  ;;  %v2319_v19 = vadd.f32 %v2318_v8, %v2230_v42  ;;  %v5896_v8 = vpop.f32.mrf.mxu2 }
 0x43d   : > { %v2382_v13 = vmax.f32 %v2319_v19, 0.0  ;;  %v2045_v40 = vpack.c.b16 %v2028_v56, %v2027_v32  ;;  %v2235_v19 = vadd.f32 %v5813_v4, %v5818_v50 }
 0x43e   : > { %v1930_v63 = vpop.f32.mrf.mxu1 }
 0x43f   : > { %2414 = vst [vmem:[%s5825_s28 + $0x58] sm:$0xff] %v2382_v13  ;;  %v2446_v20 = vpack.c.bf16 %v2382_v13, %v2382_v13  ;;  %2360 = vmatmul.bf16.gmra.mxu3 %v2045_v40  ;;  %v1931_v28 = vadd.f32 %v1930_v63, %v1841_v57 }
 0x441   : > { %v2510_v61 = vunpack.c.l.b16 %v2446_v20  ;;  %v1965_v32 = vpack.c.bf16 %v1931_v28, %v1931_v28 }
 0x442   : > { %v2321_v52 = vpop.f32.mrf.mxu3 }
 0x443   : > { %v2322_v58 = vadd.f32 %v2321_v52, %v2233_v62  ;;  %v2536_v29 = vpack.c.b16 %v2510_v61, %v2509_v51  ;;  %v2029_v13 = vunpack.c.l.b16 %v1965_v32  ;;  %v2238_v61 = vadd.f32 %v5813_v4, %v5830_v27  ;;  %v5904_v52 = vpop.f32.mrf.mxu2 }
 0x445   : > { %v2383_v42 = vmax.f32 %v2322_v58, 0.0  ;;  %3032 = vmatmul.bf16.gmra.mxu2 %v2536_v29 }
 0x446   : > { %v1932_v34 = vpop.f32.mrf.mxu1 }
 0x447   : > { %2415 = vst [vmem:[%s5825_s28 + $0x60] sm:$0xff] %v2383_v42  ;;  %v1933_v56 = vadd.f32 %v1932_v34, %v1843_v48  ;;  %v2447_v63 = vpack.c.bf16 %v2383_v42, %v2383_v42  ;;  %v2240_v42 = vadd.f32 %v5813_v4, %v5838_v5 }
 0x449   : > { %v1966_v24 = vpack.c.bf16 %v1933_v56, %v1933_v56  ;;  %v2511_v28 = vunpack.c.l.b16 %v2447_v63 }
 0x44a   : > { %v2323_v0 = vpop.f32.mrf.mxu3 }
 0x44b   : > { %v2030_v40 = vunpack.c.l.b16 %v1966_v24  ;;  %v2324_v57 = vadd.f32 %v2323_v0, %v2235_v19  ;;  %v5909_v19 = vpop.f32.mrf.mxu2 }
 0x44d   : > { %v2384_v20 = vmax.f32 %v2324_v57, 0.0  ;;  %v2046_v62 = vpack.c.b16 %v2030_v40, %v2029_v13  ;;  %v2243_v40 = vadd.f32 %v5813_v4, %v5846_v1 }
 0x44f   : > { %2416 = vst [vmem:[%s5825_s28 + $0x68] sm:$0xff] %v2384_v20  ;;  %v2448_v51 = vpack.c.bf16 %v2384_v20, %v2384_v20  ;;  %2365 = vmatmul.bf16.gmra.mxu3 %v2046_v62 }
 0x451   : > { %v2512_v50 = vunpack.c.l.b16 %v2448_v51 }
 0x452   : > { %v2326_v58 = vpop.f32.mrf.mxu3 }
 0x453   : > { %v2327_v48 = vadd.f32 %v2326_v58, %v2238_v61  ;;  %v2537_v34 = vpack.c.b16 %v2512_v50, %v2511_v28  ;;  %v5914_v61 = vpop.f32.mrf.mxu2  ;;  %v2245_v28 = vadd.f32 %v5813_v4, %v5854_v15 }
 0x455   : > { %v2385_v32 = vmax.f32 %v2327_v48, 0.0  ;;  %3037 = vmatmul.bf16.gmra.mxu2 %v2537_v34 }
 0x457   : > { %2417 = vst [vmem:[%s5825_s28 + $0x70] sm:$0xff] %v2385_v32  ;;  %v2449_v27 = vpack.c.bf16 %v2385_v32, %v2385_v32 }
 0x459   : > { %v2513_v57 = vunpack.c.l.b16 %v2449_v27 }
 0x45a   : > { %v2328_v56 = vpop.f32.mrf.mxu3 }
 0x45b   : > { %v2329_v24 = vadd.f32 %v2328_v56, %v2240_v42  ;;  %v5919_v32 = vpop.f32.mrf.mxu2  ;;  %v2248_v56 = vadd.f32 %v5813_v4, %v5861_v23 }
 0x45d   : > { %v2386_v0 = vmax.f32 %v2329_v24, 0.0 }
 0x45f   : > { %2418 = vst [vmem:[%s5825_s28 + $0x78] sm:$0xff] %v2386_v0  ;;  %v2450_v13 = vpack.c.bf16 %v2386_v0, %v2386_v0 }
 0x461   : > { %v2514_v63 = vunpack.c.l.b16 %v2450_v13 }
 0x462   : > { %v2331_v20 = vpop.f32.mrf.mxu3 }
 0x463   : > { %v2538_v62 = vpack.c.b16 %v2514_v63, %v2513_v57  ;;  %v2332_v51 = vadd.f32 %v2331_v20, %v2243_v40  ;;  %v5932_v40 = vpop.f32.mrf.mxu2 }
 0x465   : > { %v2387_v5 = vmax.f32 %v2332_v51, 0.0  ;;  %2563 = vmatpush.bf16.msra.mxu0 %v2538_v62  ;;  %3042 = vmatmul.bf16.gmra.mxu2 %v2538_v62 }
 0x467   : > { %2419 = vst [vmem:[%s5825_s28 + $0x80] sm:$0xff] %v2387_v5  ;;  %v2451_v48 = vpack.c.bf16 %v2387_v5, %v2387_v5 }
 0x469   : > { %2564 = vmatpush.bf16.msra.mxu0 %v2537_v34  ;;  %v2515_v24 = vunpack.c.l.b16 %v2451_v48 }
 0x46a   : > { %v2333_v50 = vpop.f32.mrf.mxu3 }
 0x46b   : > { %v2334_v58 = vadd.f32 %v2333_v50, %v2245_v28  ;;  %v5940_v5 = vpop.f32.mrf.mxu2 }
 0x46d   : > { %v2388_v1 = vmax.f32 %v2334_v58, 0.0  ;;  %2565 = vmatpush.bf16.msra.mxu0 %v2536_v29  ;;  %v2250_v29 = vadd.f32 %v5813_v4, %v5867_v11 }
 0x46f   : > { %2420 = vst [vmem:[%s5825_s28 + $0x88] sm:$0xff] %v2388_v1  ;;  %v2452_v42 = vpack.c.bf16 %v2388_v1, %v2388_v1 }
 0x471   : > { %v2516_v27 = vunpack.c.l.b16 %v2452_v42  ;;  %2566 = vmatpush.bf16.msra.mxu0 %v5885_v14 }
 0x472   : > { %v2336_v15 = vpop.f32.mrf.mxu3 }
 0x473   : > { %v2337_v34 = vadd.f32 %v2336_v15, %v2248_v56  ;;  %v5925_v0 = vpack.c.b16 %v2516_v27, %v2515_v24  ;;  %v5949_v48 = vpop.f32.mrf.mxu2  ;;  %v2258_v56 = vadd.f32 %v5813_v4, %v5891_v54 }
 0x475   : > { %v2389_v13 = vmax.f32 %v2337_v34, 0.0  ;;  %2567 = vmatpush.bf16.msra.mxu0 %v5872_v36  ;;  %3047 = vmatmul.bf16.gmra.mxu2 %v5925_v0  ;;  %v2253_v36 = vadd.f32 %v5813_v4, %v5878_v18 }
 0x477   : > { %2421 = vst [vmem:[%s5825_s28 + $0x90] sm:$0xff] %v2389_v13  ;;  %v2453_v57 = vpack.c.bf16 %v2389_v13, %v2389_v13 }
 0x479   : > { %2568 = vmatpush.bf16.msra.mxu0 %v5859_v53  ;;  %v2517_v62 = vunpack.c.l.b16 %v2453_v57 }
 0x47a   : > { %v2338_v23 = vpop.f32.mrf.mxu3 }
 0x47b   : > { %v2339_v14 = vadd.f32 %v2338_v23, %v2250_v29  ;;  %v5958_v29 = vpop.f32.mrf.mxu2  ;;  %v2260_v23 = vadd.f32 %v5813_v4, %v5896_v8 }
 0x47d   : > { %v2390_v63 = vmax.f32 %v2339_v14, 0.0  ;;  %2569 = vmatpush.bf16.msra.mxu0 %v5848_v7  ;;  %v2255_v7 = vadd.f32 %v5813_v4, %v5883_v10 }
 0x47f   : > { %2422 = vst [vmem:[%s5825_s28 + $0x98] sm:$0xff] %v2390_v63  ;;  %v2454_v20 = vpack.c.bf16 %v2390_v63, %v2390_v63 }
 0x481   : > { %v2518_v51 = vunpack.c.l.b16 %v2454_v20  ;;  %2570 = vmatpush.bf16.msra.mxu0 %v5835_v39 }
 0x482   : > { %v2341_v11 = vpop.f32.mrf.mxu3 }
 0x483   : > { %v2342_v53 = vadd.f32 %v2341_v11, %v2253_v36  ;;  %v5942_v28 = vpack.c.b16 %v2518_v51, %v2517_v62  ;;  %v5963_v20 = vpop.f32.mrf.mxu2  ;;  %v2263_v62 = vadd.f32 %v5813_v4, %v5904_v52 }
 0x484   : > { %2571 = vmatmul.bf16.vlgmr.msra.gmra.mxu0 %v5586_v55 }
 0x485   : > { %v2391_v50 = vmax.f32 %v2342_v53, 0.0  ;;  %3052 = vmatmul.bf16.gmra.mxu2 %v5942_v28 }
 0x487   : > { %2423 = vst [vmem:[%s5825_s28 + $0xa0] sm:$0xff] %v2391_v50  ;;  %v2455_v39 = vpack.c.bf16 %v2391_v50, %v2391_v50 }
 0x489   : > { %v2519_v24 = vunpack.c.l.b16 %v2455_v39 }
 0x48a   : > { %v2343_v18 = vpop.f32.mrf.mxu3 }
 0x48b   : > { %v2344_v58 = vadd.f32 %v2343_v18, %v2255_v7  ;;  %v2265_v18 = vadd.f32 %v5813_v4, %v5909_v19 }
 0x48d   : > { %v2392_v1 = vmax.f32 %v2344_v58, 0.0  ;;  %v5975_v58 = vpop.f32.mrf.mxu2 }
 0x48f   : > { %2424 = vst [vmem:[%s5825_s28 + $0xa8] sm:$0xff] %v2392_v1  ;;  %v2456_v42 = vpack.c.bf16 %v2392_v1, %v2392_v1 }
 0x491   : > { %v2520_v27 = vunpack.c.l.b16 %v2456_v42 }
 0x492   : > { %v2346_v15 = vpop.f32.mrf.mxu3 }
 0x493   : > { %v2347_v34 = vadd.f32 %v2346_v15, %v2258_v56  ;;  %v5954_v13 = vpack.c.b16 %v2520_v27, %v2519_v24  ;;  %v2268_v24 = vadd.f32 %v5813_v4, %v5914_v61 }
 0x494   : > { %2576 = vmatmul.bf16.gmra.mxu0 %v5595_v9 }
 0x495   : > { %v2393_v10 = vmax.f32 %v2347_v34, 0.0  ;;  %3057 = vmatmul.bf16.gmra.mxu2 %v5954_v13 }
 0x497   : > { %2425 = vst [vmem:[%s5825_s28 + $0xb0] sm:$0xff] %v2393_v10  ;;  %v2457_v57 = vpack.c.bf16 %v2393_v10, %v2393_v10  ;;  %v5980_v10 = vpop.f32.mrf.mxu2 }
 0x499   : > { %v2521_v51 = vunpack.c.l.b16 %v2457_v57 }
 0x49a   : > { %v2348_v14 = vpop.f32.mrf.mxu3 }
 0x49b   : > { %v2349_v54 = vadd.f32 %v2348_v14, %v2260_v23 }
 0x49d   : > { %v2394_v63 = vmax.f32 %v2349_v54, 0.0  ;;  %v2270_v54 = vadd.f32 %v5813_v4, %v5919_v32 }
 0x49f   : > { %2426 = vst [vmem:[%s5825_s28 + $0xb8] sm:$0xff] %v2394_v63  ;;  %v2458_v36 = vpack.c.bf16 %v2394_v63, %v2394_v63  ;;  %v5986_v61 = vpop.f32.mrf.mxu2 }
 0x4a1   : > { %v2522_v11 = vunpack.c.l.b16 %v2458_v36 }
 0x4a2   : > { %v2351_v53 = vpop.f32.mrf.mxu3 }
 0x4a3   : > { %v2352_v50 = vadd.f32 %v2351_v53, %v2263_v62  ;;  %v5968_v7 = vpack.c.b16 %v2522_v11, %v2521_v51  ;;  %v2273_v11 = vadd.f32 %v5813_v4, %v5932_v40 }
 0x4a4   : > { %2581 = vmatmul.bf16.gmra.mxu0 %v5602_v44 }
 0x4a5   : > { %v2395_v8 = vmax.f32 %v2352_v50, 0.0  ;;  %3062 = vmatmul.bf16.gmra.mxu2 %v5968_v7 }
 0x4a7   : > { %2427 = vst [vmem:[%s5825_s28 + $0xc0] sm:$0xff] %v2395_v8  ;;  %v2459_v1 = vpack.c.bf16 %v2395_v8, %v2395_v8 }
 0x4a9   : > { %v2523_v27 = vunpack.c.l.b16 %v2459_v1  ;;  %v2275_v1 = vadd.f32 %v5813_v4, %v5940_v5 }
 0x4aa   : > { %v2353_v39 = vpop.f32.mrf.mxu3 }
 0x4ab   : > { %v2354_v52 = vadd.f32 %v2353_v39, %v2265_v18 }
 0x4ad   : > { %v2396_v42 = vmax.f32 %v2354_v52, 0.0  ;;  %v5992_v52 = vpop.f32.mrf.mxu2 }
 0x4af   : > { %2428 = vst [vmem:[%s5825_s28 + $0xc8] sm:$0xff] %v2396_v42  ;;  %v2460_v56 = vpack.c.bf16 %v2396_v42, %v2396_v42 }
 0x4b1   : > { %v2524_v15 = vunpack.c.l.b16 %v2460_v56 }
 0x4b2   : > { %v2356_v34 = vpop.f32.mrf.mxu3 }
 0x4b3   : > { %v2357_v23 = vadd.f32 %v2356_v34, %v2268_v24  ;;  %v2543_v19 = vpack.c.b16 %v2524_v15, %v2523_v27  ;;  %v2278_v15 = vadd.f32 %v5813_v4, %v5949_v48 }
 0x4b4   : > { %2586 = vmatmul.bf16.gmra.mxu0 %v5614_v45 }
 0x4b5   : > { %v2397_v14 = vmax.f32 %v2357_v23, 0.0  ;;  %3067 = vmatmul.bf16.gmra.mxu2 %v2543_v19  ;;  %v6000_v34 = vpop.f32.mrf.mxu2 }
 0x4b7   : > { %2429 = vst [vmem:[%s5825_s28 + $0xd0] sm:$0xff] %v2397_v14  ;;  %v2461_v36 = vpack.c.bf16 %v2397_v14, %v2397_v14 }
 0x4b9   : > { %v2525_v53 = vunpack.c.l.b16 %v2461_v36  ;;  %v2280_v36 = vadd.f32 %v5813_v4, %v5958_v29  ;;  %v4676_v4 = vld [vmem:[%s6414_s4 + $0x78] sm:$0xff]  ;;  %v4673_v29 = vld [vmem:[%s6414_s4 + $0x60] sm:$0xff] }
 0x4ba   : > { %v2358_v57 = vpop.f32.mrf.mxu3  ;;  %3088 = vmatpush.bf16.msra.mxu3 %v4676_v4 }
 0x4bb   : > { %v2359_v63 = vadd.f32 %v2358_v57, %v2270_v54 }
 0x4bd   : > { %v2398_v62 = vmax.f32 %v2359_v63, 0.0 }
 0x4bf   : > { %2430 = vst [vmem:[%s5825_s28 + $0xd8] sm:$0xff] %v2398_v62  ;;  %v2462_v51 = vpack.c.bf16 %v2398_v62, %v2398_v62 }
 0x4c1   : > { %v2526_v50 = vunpack.c.l.b16 %v2462_v51  ;;  %v6006_v51 = vpop.f32.mrf.mxu2 }
 0x4c2   : > { %v2361_v8 = vpop.f32.mrf.mxu3 }
 0x4c3   : > { %v2362_v18 = vadd.f32 %v2361_v8, %v2273_v11  ;;  %v2544_v39 = vpack.c.b16 %v2526_v50, %v2525_v53 }
 0x4c4   : > { %2591 = vmatmul.bf16.gmra.mxu0 %v5624_v12 }
 0x4c5   : > { %v2399_v32 = vmax.f32 %v2362_v18, 0.0  ;;  %3072 = vmatmul.bf16.gmra.mxu2 %v2544_v39 }
 0x4c7   : > { %2431 = vst [vmem:[%s5825_s28 + $0xe0] sm:$0xff] %v2399_v32  ;;  %v2463_v40 = vpack.c.bf16 %v2399_v32, %v2399_v32 }
 0x4c9   : > { %v2527_v23 = vunpack.c.l.b16 %v2463_v40  ;;  %v4669_v40 = vld [vmem:[%s6414_s4 + $0x40] sm:$0xff] }
 0x4ca   : > { %v2363_v42 = vpop.f32.mrf.mxu3 }
 0x4cb   : > { %v2364_v56 = vadd.f32 %v2363_v42, %v2275_v1  ;;  %v6010_v1 = vpop.f32.mrf.mxu2 }
 0x4cd   : > { %v2400_v24 = vmax.f32 %v2364_v56, 0.0  ;;  %v4670_v56 = vld [vmem:[%s6414_s4 + $0x48] sm:$0xff] }
 0x4cf   : > { %2432 = vst [vmem:[%s5825_s28 + $0xe8] sm:$0xff] %v2400_v24  ;;  %v2464_v27 = vpack.c.bf16 %v2400_v24, %v2400_v24 }
 0x4d1   : > { %v2528_v14 = vunpack.c.l.b16 %v2464_v27 }
 0x4d2   : > { %v2366_v54 = vpop.f32.mrf.mxu3 }
 0x4d3   : > { %v2367_v57 = vadd.f32 %v2366_v54, %v2278_v15  ;;  %v2545_v63 = vpack.c.b16 %v2528_v14, %v2527_v23 }
 0x4d4   : > { %2596 = vmatmul.bf16.gmra.mxu0 %v5634_v47 }
 0x4d5   : > { %v2401_v5 = vmax.f32 %v2367_v57, 0.0  ;;  %3077 = vmatmul.bf16.gmra.mxu2 %v2545_v63 }
 0x4d7   : > { %2433 = vst [vmem:[%s5825_s28 + $0xf0] sm:$0xff] %v2401_v5  ;;  %v2465_v11 = vpack.c.bf16 %v2401_v5, %v2401_v5 }
 0x4d9   : > { %v2529_v8 = vunpack.c.l.b16 %v2465_v11 }
 0x4da   : > { %v2368_v62 = vpop.f32.mrf.mxu3 }
 0x4db   : > { %v2369_v48 = vadd.f32 %v2368_v62, %v2280_v36 }
 0x4dd   : > { %v2402_v53 = vmax.f32 %v2369_v48, 0.0 }
 0x4df   : > { %2434 = vst [vmem:[%s5825_s28 + $0xf8] sm:$0xff] %v2402_v53  ;;  %v2466_v50 = vpack.c.bf16 %v2402_v53, %v2402_v53 }
 0x4e1   : > { %v2530_v18 = vunpack.c.l.b16 %v2466_v50 }
 0x4e3   : > { %v2546_v32 = vpack.c.b16 %v2530_v18, %v2529_v8 }
 0x4e4   : > { %2601 = vmatmul.bf16.gmra.mxu0 %v5644_v37 }
 0x4e5   : > { %2652 = vmatpush.bf16.msra.mxu1 %v2546_v32  ;;  %3082 = vmatmul.bf16.gmra.mxu2 %v2546_v32 }
 0x4e9   : > { %2653 = vmatpush.bf16.msra.mxu1 %v2545_v63 }
 0x4ed   : > { %2654 = vmatpush.bf16.msra.mxu1 %v2544_v39  ;;  %v4671_v39 = vld [vmem:[%s6414_s4 + $0x50] sm:$0xff] }
 0x4f1   : > { %2655 = vmatpush.bf16.msra.mxu1 %v2543_v19  ;;  %v4672_v19 = vld [vmem:[%s6414_s4 + $0x58] sm:$0xff] }
 0x4f4   : > { %2606 = vmatmul.bf16.gmra.mxu0 %v5654_v16 }
 0x4f5   : > { %2656 = vmatpush.bf16.msra.mxu1 %v5968_v7 }
 0x4f9   : > { %2657 = vmatpush.bf16.msra.mxu1 %v5954_v13  ;;  %v4674_v13 = vld [vmem:[%s6414_s4 + $0x68] sm:$0xff] }
 0x4fd   : > { %2658 = vmatpush.bf16.msra.mxu1 %v5942_v28 }
 0x501   : > { %2659 = vmatpush.bf16.msra.mxu1 %v5925_v0  ;;  %v4675_v0 = vld [vmem:[%s6414_s4 + $0x70] sm:$0xff]  ;;  %v2572_v28 = vpop.f32.mrf.mxu0 }
 0x502   : > { %3089 = vmatpush.bf16.msra.mxu3 %v4675_v0 }
 0x504   : > { %2660 = vmatmul.bf16.vlgmr.msra.gmra.mxu1 %v5608_v41  ;;  %2611 = vmatmul.bf16.gmra.mxu0 %v5673_v43 }
 0x506   : > { %3090 = vmatpush.bf16.msra.mxu3 %v4674_v13 }
 0x509   : > { %v2574_v7 = vpop.f32.mrf.mxu0 }
 0x50a   : > { %3091 = vmatpush.bf16.msra.mxu3 %v4673_v29 }
 0x50e   : > { %3092 = vmatpush.bf16.msra.mxu3 %v4672_v19 }
 0x511   : > { %v2577_v42 = vpop.f32.mrf.mxu0 }
 0x512   : > { %3093 = vmatpush.bf16.msra.mxu3 %v4671_v39 }
 0x514   : > { %2665 = vmatmul.bf16.gmra.mxu1 %v5619_v22  ;;  %2616 = vmatmul.bf16.gmra.mxu0 %v5695_v49 }
 0x516   : > { %3094 = vmatpush.bf16.msra.mxu3 %v4670_v56 }
 0x519   : > { %v2579_v24 = vpop.f32.mrf.mxu0 }
 0x51a   : > { %3095 = vmatpush.bf16.msra.mxu3 %v4669_v40 }
 0x521   : > { %v2582_v27 = vpop.f32.mrf.mxu0 }
 0x524   : > { %2670 = vmatmul.bf16.gmra.mxu1 %v5629_v31  ;;  %2621 = vmatmul.bf16.gmra.mxu0 %v5708_v59 }
 0x529   : > { %v2584_v15 = vpop.f32.mrf.mxu0 }
 0x531   : > { %v2587_v54 = vpop.f32.mrf.mxu0 }
 0x534   : > { %2675 = vmatmul.bf16.gmra.mxu1 %v5639_v46  ;;  %2626 = vmatmul.bf16.gmra.mxu0 %v5718_v30 }
 0x539   : > { %v2589_v53 = vpop.f32.mrf.mxu0 }
 0x541   : > { %v2592_v18 = vpop.f32.mrf.mxu0 }
 0x544   : > { %2680 = vmatmul.bf16.gmra.mxu1 %v5649_v60  ;;  %2631 = vmatmul.bf16.gmra.mxu0 %v5728_v26 }
 0x549   : > { %v2594_v19 = vpop.f32.mrf.mxu0 }
 0x551   : > { %v2597_v40 = vpop.f32.mrf.mxu0 }
 0x554   : > { %2685 = vmatmul.bf16.gmra.mxu1 %v5659_v38  ;;  %2636 = vmatmul.bf16.gmra.mxu0 %v5738_v21 }
 0x564   : > { %2690 = vmatmul.bf16.gmra.mxu1 %v5681_v17  ;;  %2641 = vmatmul.bf16.gmra.mxu0 %v5748_v33 }
 0x574   : > { %2695 = vmatmul.bf16.gmra.mxu1 %v5703_v25  ;;  %2646 = vmatmul.bf16.gmra.mxu0 %v5758_v6 }
 0x581   : > { %v2661_v23 = vpop.f32.mrf.mxu1 }
 0x582   : > { %v2662_v14 = vadd.f32 %v2661_v23, %v2572_v28 }
 0x584   : > { %2700 = vmatmul.bf16.gmra.mxu1 %v5713_v2  ;;  %v2741_v63 = vpack.c.bf16 %v2662_v14, %v2662_v14 }
 0x586   : > { %v2805_v62 = vunpack.c.l.b16 %v2741_v63 }
 0x589   : > { %v2663_v57 = vpop.f32.mrf.mxu1 }
 0x58a   : > { %v2664_v5 = vadd.f32 %v2663_v57, %v2574_v7 }
 0x58c   : > { %v2742_v36 = vpack.c.bf16 %v2664_v5, %v2664_v5 }
 0x58e   : > { %v2806_v48 = vunpack.c.l.b16 %v2742_v36 }
 0x590   : > { %v2837_v11 = vpack.c.b16 %v2806_v48, %v2805_v62  ;;  %v6506_v48 = vld [vmem:[#allocation3_spill] sm:$0xff] }
 0x591   : > { %v2666_v50 = vpop.f32.mrf.mxu1 }
 0x592   : > { %3096 = vmatmul.bf16.vlgmr.msra.gmra.mxu3 %v2837_v11  ;;  %v2667_v8 = vadd.f32 %v2666_v50, %v2577_v42 }
 0x594   : > { %2705 = vmatmul.bf16.gmra.mxu1 %v5723_v3  ;;  %v2743_v4 = vpack.c.bf16 %v2667_v8, %v2667_v8 }
 0x596   : > { %v2807_v13 = vunpack.c.l.b16 %v2743_v4 }
 0x599   : > { %v2668_v32 = vpop.f32.mrf.mxu1 }
 0x59a   : > { %v2669_v0 = vadd.f32 %v2668_v32, %v2579_v24  ;;  %v2599_v24 = vpop.f32.mrf.mxu0 }
 0x59c   : > { %v2744_v28 = vpack.c.bf16 %v2669_v0, %v2669_v0 }
 0x59e   : > { %v2808_v29 = vunpack.c.l.b16 %v2744_v28 }
 0x5a0   : > { %v2838_v7 = vpack.c.b16 %v2808_v29, %v2807_v13 }
 0x5a1   : > { %v2671_v39 = vpop.f32.mrf.mxu1 }
 0x5a2   : > { %3101 = vmatmul.bf16.gmra.mxu3 %v2838_v7  ;;  %v2672_v56 = vadd.f32 %v2671_v39, %v2582_v27  ;;  %v2602_v4 = vpop.f32.mrf.mxu0 }
 0x5a4   : > { %2710 = vmatmul.bf16.gmra.mxu1 %v5733_v35  ;;  %v2745_v14 = vpack.c.bf16 %v2672_v56, %v2672_v56 }
 0x5a6   : > { %v2809_v42 = vunpack.c.l.b16 %v2745_v14 }
 0x5a9   : > { %v2673_v23 = vpop.f32.mrf.mxu1 }
 0x5aa   : > { %v2674_v57 = vadd.f32 %v2673_v23, %v2584_v15  ;;  %v6507_v15 = vld [vmem:[#allocation4_spill] sm:$0xff]  ;;  %v2604_v7 = vpop.f32.mrf.mxu0 }
 0x5ac   : > { %v2746_v63 = vpack.c.bf16 %v2674_v57, %v2674_v57 }
 0x5ae   : > { %v2810_v5 = vunpack.c.l.b16 %v2746_v63 }
 0x5b0   : > { %v2839_v36 = vpack.c.b16 %v2810_v5, %v2809_v42 }
 0x5b1   : > { %v2676_v62 = vpop.f32.mrf.mxu1 }
 0x5b2   : > { %3106 = vmatmul.bf16.gmra.mxu3 %v2839_v36  ;;  %v2677_v11 = vadd.f32 %v2676_v62, %v2587_v54  ;;  %v2607_v42 = vpop.f32.mrf.mxu0  ;;  %v6508_v36 = vld [vmem:[#allocation5_spill] sm:$0xff] }
 0x5b4   : > { %2715 = vmatmul.bf16.gmra.mxu1 %v6506_v48  ;;  %v2747_v8 = vpack.c.bf16 %v2677_v11, %v2677_v11 }
 0x5b6   : > { %v2811_v27 = vunpack.c.l.b16 %v2747_v8 }
 0x5b9   : > { %v2678_v50 = vpop.f32.mrf.mxu1 }
 0x5ba   : > { %v2679_v32 = vadd.f32 %v2678_v50, %v2589_v53  ;;  %v2609_v50 = vpop.f32.mrf.mxu0 }
 0x5bc   : > { %v2748_v0 = vpack.c.bf16 %v2679_v32, %v2679_v32 }
 0x5be   : > { %v2812_v28 = vunpack.c.l.b16 %v2748_v0 }
 0x5c0   : > { %v2840_v13 = vpack.c.b16 %v2812_v28, %v2811_v27 }
 0x5c1   : > { %v2681_v29 = vpop.f32.mrf.mxu1 }
 0x5c2   : > { %3111 = vmatmul.bf16.gmra.mxu3 %v2840_v13  ;;  %v2682_v39 = vadd.f32 %v2681_v29, %v2592_v18  ;;  %v6063_v29 = vpop.f32.mrf.mxu2 }
 0x5c4   : > { %2720 = vmatmul.bf16.gmra.mxu1 %v6507_v15  ;;  %v2749_v23 = vpack.c.bf16 %v2682_v39, %v2682_v39  ;;  %v6509_v39 = vld [vmem:[#allocation6_spill] sm:$0xff] }
 0x5c6   : > { %v2813_v63 = vunpack.c.l.b16 %v2749_v23 }
 0x5c9   : > { %v2683_v56 = vpop.f32.mrf.mxu1 }
 0x5ca   : > { %v2684_v14 = vadd.f32 %v2683_v56, %v2594_v19  ;;  %v2612_v19 = vpop.f32.mrf.mxu0 }
 0x5cc   : > { %v2750_v57 = vpack.c.bf16 %v2684_v14, %v2684_v14 }
 0x5ce   : > { %v2814_v54 = vunpack.c.l.b16 %v2750_v57  ;;  %v4683_v57 = vld [vmem:[%s6415_s5 + $0x30] sm:$0xff] }
 0x5d0   : > { %v2841_v5 = vpack.c.b16 %v2814_v54, %v2813_v63 }
 0x5d1   : > { %v2686_v53 = vpop.f32.mrf.mxu1 }
 0x5d2   : > { %3116 = vmatmul.bf16.gmra.mxu3 %v2841_v5  ;;  %v2687_v62 = vadd.f32 %v2686_v53, %v2597_v40  ;;  %v4684_v40 = vld [vmem:[%s6415_s5 + $0x38] sm:$0xff]  ;;  %v2614_v54 = vpop.f32.mrf.mxu0  ;;  %v6072_v5 = vpop.f32.mrf.mxu2 }
 0x5d3   : > { %3773 = vmatpush.bf16.msrb.mxu2 %v4684_v40 }
 0x5d4   : > { %2725 = vmatmul.bf16.gmra.mxu1 %v6508_v36  ;;  %v2751_v8 = vpack.c.bf16 %v2687_v62, %v2687_v62 }
 0x5d6   : > { %v2815_v27 = vunpack.c.l.b16 %v2751_v8 }
 0x5d7   : > { %3774 = vmatpush.bf16.msrb.mxu2 %v4683_v57 }
 0x5d9   : > { %v2688_v11 = vpop.f32.mrf.mxu1 }
 0x5da   : > { %v2689_v32 = vadd.f32 %v2688_v11, %v2599_v24 }
 0x5dc   : > { %v2752_v0 = vpack.c.bf16 %v2689_v32, %v2689_v32  ;;  %v6510_v32 = vld [vmem:[#allocation7_spill] sm:$0xff] }
 0x5de   : > { %v2816_v18 = vunpack.c.l.b16 %v2752_v0 }
 0x5e0   : > { %v2842_v28 = vpack.c.b16 %v2816_v18, %v2815_v27  ;;  %v2617_v27 = vpop.f32.mrf.mxu0  ;;  %v4680_v18 = vld [vmem:[%s6415_s5 + $0x18] sm:$0xff] }
 0x5e1   : > { %v2691_v13 = vpop.f32.mrf.mxu1 }
 0x5e2   : > { %3121 = vmatmul.bf16.gmra.mxu3 %v2842_v28  ;;  %v2692_v56 = vadd.f32 %v2691_v13, %v2602_v4  ;;  %v4682_v4 = vld [vmem:[%s6415_s5 + $0x28] sm:$0xff]  ;;  %v6084_v28 = vpop.f32.mrf.mxu2 }
 0x5e3   : > { %3775 = vmatpush.bf16.msrb.mxu2 %v4682_v4 }
 0x5e4   : > { %2730 = vmatmul.bf16.gmra.mxu1 %v6509_v39  ;;  %v2753_v14 = vpack.c.bf16 %v2692_v56, %v2692_v56 }
 0x5e6   : > { %v2817_v53 = vunpack.c.l.b16 %v2753_v14 }
 0x5e9   : > { %v2693_v23 = vpop.f32.mrf.mxu1 }
 0x5ea   : > { %v2694_v24 = vadd.f32 %v2693_v23, %v2604_v7  ;;  %v4681_v7 = vld [vmem:[%s6415_s5 + $0x20] sm:$0xff]  ;;  %v4679_v23 = vld [vmem:[%s6415_s5 + $0x10] sm:$0xff]  ;;  %v6092_v4 = vpop.f32.mrf.mxu2 }
 0x5eb   : > { %3776 = vmatpush.bf16.msrb.mxu2 %v4681_v7 }
 0x5ec   : > { %v2754_v63 = vpack.c.bf16 %v2694_v24, %v2694_v24 }
 0x5ee   : > { %v2818_v62 = vunpack.c.l.b16 %v2754_v63 }
 0x5ef   : > { %3777 = vmatpush.bf16.msrb.mxu2 %v4680_v18 }
 0x5f0   : > { %v2843_v11 = vpack.c.b16 %v2818_v62, %v2817_v53  ;;  %v2619_v62 = vpop.f32.mrf.mxu0 }
 0x5f1   : > { %v2696_v8 = vpop.f32.mrf.mxu1 }
 0x5f2   : > { %3126 = vmatmul.bf16.gmra.mxu3 %v2843_v11  ;;  %v2697_v0 = vadd.f32 %v2696_v8, %v2607_v42  ;;  %v4678_v42 = vld [vmem:[%s6415_s5 + $0x8] sm:$0xff] }
 0x5f3   : > { %3778 = vmatpush.bf16.msrb.mxu2 %v4679_v23 }
 0x5f4   : > { %2735 = vmatmul.bf16.gmra.mxu1 %v6510_v32  ;;  %v2755_v56 = vpack.c.bf16 %v2697_v0, %v2697_v0 }
 0x5f6   : > { %v2819_v24 = vunpack.c.l.b16 %v2755_v56 }
 0x5f7   : > { %3779 = vmatpush.bf16.msrb.mxu2 %v4678_v42 }
 0x5f8   : > { %v2622_v18 = vpop.f32.mrf.mxu0 }
 0x5f9   : > { %v2698_v13 = vpop.f32.mrf.mxu1 }
 0x5fa   : > { %v2699_v40 = vadd.f32 %v2698_v13, %v2609_v50  ;;  %v4677_v50 = vld [vmem:[%s6415_s5] sm:$0xff]  ;;  %v6097_v13 = vpop.f32.mrf.mxu2 }
 0x5fb   : > { %3780 = vmatpush.bf16.msrb.mxu2 %v4677_v50 }
 0x5fc   : > { %v2756_v14 = vpack.c.bf16 %v2699_v40, %v2699_v40 }
 0x5fe   : > { %v2820_v57 = vunpack.c.l.b16 %v2756_v14 }
 0x600   : > { %v2844_v63 = vpack.c.b16 %v2820_v57, %v2819_v24  ;;  %v6102_v57 = vld [vmem:[%s6416_s6 + $0x2] ss:$0 sm:$0xff] }
 0x601   : > { %v2701_v53 = vpop.f32.mrf.mxu1 }
 0x602   : > { %3131 = vmatmul.bf16.gmra.mxu3 %v2844_v63  ;;  %v2702_v11 = vadd.f32 %v2701_v53, %v2612_v19  ;;  %v2624_v63 = vpop.f32.mrf.mxu0  ;;  %v3009_v19 = vadd.f32 %v6102_v57, %v5963_v20 }
 0x604   : > { %v2757_v7 = vpack.c.bf16 %v2702_v11, %v2702_v11 }
 0x606   : > { %v2821_v40 = vunpack.c.l.b16 %v2757_v7 }
 0x609   : > { %v2703_v8 = vpop.f32.mrf.mxu1 }
 0x60a   : > { %v2704_v0 = vadd.f32 %v2703_v8, %v2614_v54  ;;  %v6106_v54 = vpop.f32.mrf.mxu2  ;;  %v2627_v36 = vpop.f32.mrf.mxu0 }
 0x60c   : > { %v2758_v56 = vpack.c.bf16 %v2704_v0, %v2704_v0  ;;  %v3011_v0 = vadd.f32 %v6102_v57, %v5975_v58  ;;  %v3014_v58 = vadd.f32 %v6102_v57, %v5980_v10 }
 0x60e   : > { %v2822_v23 = vunpack.c.l.b16 %v2758_v56 }
 0x610   : > { %v2845_v14 = vpack.c.b16 %v2822_v23, %v2821_v40 }
 0x611   : > { %v2706_v24 = vpop.f32.mrf.mxu1 }
 0x612   : > { %3136 = vmatmul.bf16.gmra.mxu3 %v2845_v14  ;;  %v2707_v53 = vadd.f32 %v2706_v24, %v2617_v27  ;;  %v6110_v15 = vpop.f32.mrf.mxu2 }
 0x614   : > { %v2759_v8 = vpack.c.bf16 %v2707_v53, %v2707_v53 }
 0x615   : > { %v3097_v42 = vpop.f32.mrf.mxu3 }
 0x616   : > { %v3098_v50 = vadd.f32 %v3097_v42, %v3009_v19  ;;  %v2823_v32 = vunpack.c.l.b16 %v2759_v8 }
 0x618   : > { %v3177_v56 = vmax.f32 %v3098_v50, 0.0 }
 0x619   : > { %v2708_v11 = vpop.f32.mrf.mxu1 }
 0x61a   : > { %v2709_v7 = vadd.f32 %v2708_v11, %v2619_v62  ;;  %v3209_v20 = vpack.c.bf16 %v3177_v56, %v3177_v56 }
 0x61c   : > { %v2760_v40 = vpack.c.bf16 %v2709_v7, %v2709_v7  ;;  %v3273_v42 = vunpack.c.l.b16 %v3209_v20  ;;  %v2629_v7 = vpop.f32.mrf.mxu0 }
 0x61d   : > { %v3099_v23 = vpop.f32.mrf.mxu3 }
 0x61e   : > { %v2824_v14 = vunpack.c.l.b16 %v2760_v40  ;;  %v3100_v39 = vadd.f32 %v3099_v23, %v3011_v0  ;;  %v6117_v0 = vpop.f32.mrf.mxu2 }
 0x620   : > { %v3178_v48 = vmax.f32 %v3100_v39, 0.0  ;;  %v2846_v35 = vpack.c.b16 %v2824_v14, %v2823_v32 }
 0x621   : > { %v2711_v27 = vpop.f32.mrf.mxu1 }
 0x622   : > { %v3210_v24 = vpack.c.bf16 %v3178_v48, %v3178_v48  ;;  %3141 = vmatmul.bf16.gmra.mxu3 %v2846_v35  ;;  %v2712_v50 = vadd.f32 %v2711_v27, %v2622_v18  ;;  %v3016_v35 = vadd.f32 %v6102_v57, %v5986_v61  ;;  %v3019_v61 = vadd.f32 %v6102_v57, %v5992_v52 }
 0x624   : > { %v3274_v62 = vunpack.c.l.b16 %v3210_v24  ;;  %v2761_v39 = vpack.c.bf16 %v2712_v50, %v2712_v50 }
 0x625   : > { %v3102_v19 = vpop.f32.mrf.mxu3 }
 0x626   : > { %v6114_v53 = vpack.c.b16 %v3274_v62, %v3273_v42  ;;  %v3103_v11 = vadd.f32 %v3102_v19, %v3014_v58  ;;  %v2825_v23 = vunpack.c.l.b16 %v2761_v39  ;;  %v2632_v62 = vpop.f32.mrf.mxu0  ;;  %v6121_v19 = vpop.f32.mrf.mxu2 }
 0x628   : > { %3781 = vmatmul.bf16.vlgmr.msrb.gmra.mxu2 %v6114_v53  ;;  %v3179_v48 = vmax.f32 %v3103_v11, 0.0 }
 0x629   : > { %v2713_v8 = vpop.f32.mrf.mxu1 }
 0x62a   : > { %v2714_v32 = vadd.f32 %v2713_v8, %v2624_v63  ;;  %v3211_v20 = vpack.c.bf16 %v3179_v48, %v3179_v48 }
 0x62c   : > { %v2762_v56 = vpack.c.bf16 %v2714_v32, %v2714_v32  ;;  %v3275_v58 = vunpack.c.l.b16 %v3211_v20 }
 0x62d   : > { %v3104_v40 = vpop.f32.mrf.mxu3 }
 0x62e   : > { %v2826_v10 = vunpack.c.l.b16 %v2762_v56  ;;  %v3105_v14 = vadd.f32 %v3104_v40, %v3016_v35  ;;  %v3021_v56 = vadd.f32 %v6102_v57, %v6000_v34  ;;  %v6130_v20 = vpop.f32.mrf.mxu2  ;;  %v3024_v34 = vadd.f32 %v6102_v57, %v6006_v51 }
 0x630   : > { %v3180_v18 = vmax.f32 %v3105_v14, 0.0  ;;  %v2847_v27 = vpack.c.b16 %v2826_v10, %v2825_v23  ;;  %v2634_v14 = vpop.f32.mrf.mxu0 }
 0x631   : > { %v2716_v24 = vpop.f32.mrf.mxu1 }
 0x632   : > { %v3212_v42 = vpack.c.bf16 %v3180_v18, %v3180_v18  ;;  %3146 = vmatmul.bf16.gmra.mxu3 %v2847_v27  ;;  %v2717_v11 = vadd.f32 %v2716_v24, %v2627_v36 }
 0x634   : > { %v3276_v63 = vunpack.c.l.b16 %v3212_v42  ;;  %v2763_v35 = vpack.c.bf16 %v2717_v11, %v2717_v11 }
 0x635   : > { %v3107_v50 = vpop.f32.mrf.mxu3 }
 0x636   : > { %v6125_v8 = vpack.c.b16 %v3276_v63, %v3275_v58  ;;  %v3108_v39 = vadd.f32 %v3107_v50, %v3019_v61  ;;  %v2827_v18 = vunpack.c.l.b16 %v2763_v35 }
 0x638   : > { %3786 = vmatmul.bf16.gmra.mxu2 %v6125_v8  ;;  %v3181_v40 = vmax.f32 %v3108_v39, 0.0 }
 0x639   : > { %v2718_v32 = vpop.f32.mrf.mxu1 }
 0x63a   : > { %v2719_v48 = vadd.f32 %v2718_v32, %v2629_v7  ;;  %v3213_v27 = vpack.c.bf16 %v3181_v40, %v3181_v40  ;;  %v2637_v32 = vpop.f32.mrf.mxu0 }
 0x63c   : > { %v2764_v23 = vpack.c.bf16 %v2719_v48, %v2719_v48  ;;  %v3277_v50 = vunpack.c.l.b16 %v3213_v27  ;;  %v6136_v48 = vpop.f32.mrf.mxu2 }
 0x63d   : > { %v3109_v10 = vpop.f32.mrf.mxu3 }
 0x63e   : > { %v2828_v52 = vunpack.c.l.b16 %v2764_v23  ;;  %v3110_v36 = vadd.f32 %v3109_v10, %v3021_v56  ;;  %v3026_v10 = vadd.f32 %v6102_v57, %v6010_v1  ;;  %v3029_v1 = vadd.f32 %v6102_v57, %v6063_v29 }
 0x640   : > { %v3182_v24 = vmax.f32 %v3110_v36, 0.0  ;;  %v2848_v42 = vpack.c.b16 %v2828_v52, %v2827_v18 }
 0x641   : > { %v2721_v58 = vpop.f32.mrf.mxu1 }
 0x642   : > { %v3214_v63 = vpack.c.bf16 %v3182_v24, %v3182_v24  ;;  %3151 = vmatmul.bf16.gmra.mxu3 %v2848_v42  ;;  %v2722_v11 = vadd.f32 %v2721_v58, %v2632_v62 }
 0x644   : > { %v3278_v7 = vunpack.c.l.b16 %v3214_v63  ;;  %v2765_v40 = vpack.c.bf16 %v2722_v11, %v2722_v11  ;;  %v2639_v63 = vpop.f32.mrf.mxu0 }
 0x645   : > { %v3112_v61 = vpop.f32.mrf.mxu3 }
 0x646   : > { %v6134_v39 = vpack.c.b16 %v3278_v7, %v3277_v50  ;;  %v3113_v35 = vadd.f32 %v3112_v61, %v3024_v34  ;;  %v2829_v27 = vunpack.c.l.b16 %v2765_v40  ;;  %v6141_v7 = vpop.f32.mrf.mxu2 }
 0x648   : > { %3791 = vmatmul.bf16.gmra.mxu2 %v6134_v39  ;;  %v3183_v18 = vmax.f32 %v3113_v35, 0.0 }
 0x649   : > { %v2723_v56 = vpop.f32.mrf.mxu1 }
 0x64a   : > { %v2724_v23 = vadd.f32 %v2723_v56, %v2634_v14  ;;  %v3215_v24 = vpack.c.bf16 %v3183_v18, %v3183_v18 }
 0x64c   : > { %v2766_v52 = vpack.c.bf16 %v2724_v23, %v2724_v23  ;;  %v3279_v34 = vunpack.c.l.b16 %v3215_v24 }
 0x64d   : > { %v3114_v36 = vpop.f32.mrf.mxu3 }
 0x64e   : > { %v2830_v51 = vunpack.c.l.b16 %v2766_v52  ;;  %v3115_v62 = vadd.f32 %v3114_v36, %v3026_v10  ;;  %v2642_v52 = vpop.f32.mrf.mxu0  ;;  %v3031_v36 = vadd.f32 %v6102_v57, %v6072_v5  ;;  %v3034_v5 = vadd.f32 %v6102_v57, %v6084_v28 }
 0x650   : > { %v3184_v42 = vmax.f32 %v3115_v62, 0.0  ;;  %v2849_v58 = vpack.c.b16 %v2830_v51, %v2829_v27  ;;  %v6150_v27 = vpop.f32.mrf.mxu2 }
 0x651   : > { %v2726_v50 = vpop.f32.mrf.mxu1 }
 0x652   : > { %v3216_v61 = vpack.c.bf16 %v3184_v42, %v3184_v42  ;;  %3156 = vmatmul.bf16.gmra.mxu3 %v2849_v58  ;;  %v2727_v35 = vadd.f32 %v2726_v50, %v2637_v32 }
 0x654   : > { %v3280_v14 = vunpack.c.l.b16 %v3216_v61  ;;  %v2767_v10 = vpack.c.bf16 %v2727_v35, %v2727_v35 }
 0x655   : > { %v3117_v11 = vpop.f32.mrf.mxu3 }
 0x656   : > { %v6145_v56 = vpack.c.b16 %v3280_v14, %v3279_v34  ;;  %v3118_v40 = vadd.f32 %v3117_v11, %v3029_v1  ;;  %v2831_v42 = vunpack.c.l.b16 %v2767_v10  ;;  %v2644_v1 = vpop.f32.mrf.mxu0 }
 0x658   : > { %3796 = vmatmul.bf16.gmra.mxu2 %v6145_v56  ;;  %v3185_v51 = vmax.f32 %v3118_v40, 0.0 }
 0x659   : > { %v2728_v23 = vpop.f32.mrf.mxu1 }
 0x65a   : > { %v2729_v18 = vadd.f32 %v2728_v23, %v2639_v63  ;;  %v3217_v58 = vpack.c.bf16 %v3185_v51, %v3185_v51  ;;  %v6154_v23 = vpop.f32.mrf.mxu2 }
 0x65c   : > { %v2768_v62 = vpack.c.bf16 %v2729_v18, %v2729_v18  ;;  %v3281_v11 = vunpack.c.l.b16 %v3217_v58 }
 0x65d   : > { %v3119_v24 = vpop.f32.mrf.mxu3 }
 0x65e   : > { %v2832_v29 = vunpack.c.l.b16 %v2768_v62  ;;  %v3120_v32 = vadd.f32 %v3119_v24, %v3031_v36  ;;  %v3036_v24 = vadd.f32 %v6102_v57, %v6092_v4  ;;  %v3039_v4 = vadd.f32 %v6102_v57, %v6097_v13 }
 0x660   : > { %v3186_v50 = vmax.f32 %v3120_v32, 0.0  ;;  %v2850_v61 = vpack.c.b16 %v2832_v29, %v2831_v42 }
 0x661   : > { %v2731_v34 = vpop.f32.mrf.mxu1 }
 0x662   : > { %v3218_v14 = vpack.c.bf16 %v3186_v50, %v3186_v50  ;;  %3161 = vmatmul.bf16.gmra.mxu3 %v2850_v61  ;;  %v2732_v40 = vadd.f32 %v2731_v34, %v2642_v52  ;;  %v2647_v61 = vpop.f32.mrf.mxu0 }
 0x664   : > { %v3282_v63 = vunpack.c.l.b16 %v3218_v14  ;;  %v2769_v51 = vpack.c.bf16 %v2732_v40, %v2732_v40  ;;  %v6161_v14 = vpop.f32.mrf.mxu2 }
 0x665   : > { %v3122_v35 = vpop.f32.mrf.mxu3 }
 0x666   : > { %v6156_v18 = vpack.c.b16 %v3282_v63, %v3281_v11  ;;  %v3123_v10 = vadd.f32 %v3122_v35, %v3034_v5  ;;  %v2833_v58 = vunpack.c.l.b16 %v2769_v51 }
 0x668   : > { %3801 = vmatmul.bf16.gmra.mxu2 %v6156_v18  ;;  %v3187_v42 = vmax.f32 %v3123_v10, 0.0 }
 0x669   : > { %v2733_v36 = vpop.f32.mrf.mxu1 }
 0x66a   : > { %v2734_v62 = vadd.f32 %v2733_v36, %v2644_v1  ;;  %v3219_v52 = vpack.c.bf16 %v3187_v42, %v3187_v42 }
 0x66c   : > { %v2770_v29 = vpack.c.bf16 %v2734_v62, %v2734_v62  ;;  %v3283_v5 = vunpack.c.l.b16 %v3219_v52  ;;  %v2649_v62 = vpop.f32.mrf.mxu0 }
 0x66d   : > { %v3124_v32 = vpop.f32.mrf.mxu3 }
 0x66e   : > { %v2834_v50 = vunpack.c.l.b16 %v2770_v29  ;;  %v3125_v28 = vadd.f32 %v3124_v32, %v3036_v24  ;;  %v6165_v29 = vpop.f32.mrf.mxu2 }
 0x670   : > { %v3188_v34 = vmax.f32 %v3125_v28, 0.0  ;;  %v2851_v11 = vpack.c.b16 %v2834_v50, %v2833_v58  ;;  %v3041_v58 = vadd.f32 %v6102_v57, %v6106_v54 }
 0x671   : > { %v2736_v63 = vpop.f32.mrf.mxu1 }
 0x672   : > { %v3220_v35 = vpack.c.bf16 %v3188_v34, %v3188_v34  ;;  %3166 = vmatmul.bf16.gmra.mxu3 %v2851_v11  ;;  %v2737_v10 = vadd.f32 %v2736_v63, %v2647_v61 }
 0x674   : > { %v3284_v1 = vunpack.c.l.b16 %v3220_v35  ;;  %v2771_v42 = vpack.c.bf16 %v2737_v10, %v2737_v10 }
 0x675   : > { %v3127_v40 = vpop.f32.mrf.mxu3 }
 0x676   : > { %v3310_v36 = vpack.c.b16 %v3284_v1, %v3283_v5  ;;  %v3128_v51 = vadd.f32 %v3127_v40, %v3039_v4  ;;  %v2835_v34 = vunpack.c.l.b16 %v2771_v42  ;;  %v6169_v1 = vpop.f32.mrf.mxu2 }
 0x678   : > { %3806 = vmatmul.bf16.gmra.mxu2 %v3310_v36  ;;  %v3189_v50 = vmax.f32 %v3128_v51, 0.0 }
 0x679   : > { %v2738_v24 = vpop.f32.mrf.mxu1 }
 0x67a   : > { %v2739_v32 = vadd.f32 %v2738_v24, %v2649_v62  ;;  %v3221_v13 = vpack.c.bf16 %v3189_v50, %v3189_v50  ;;  %v3044_v62 = vadd.f32 %v6102_v57, %v6110_v15  ;;  %v3046_v24 = vadd.f32 %v6102_v57, %v6117_v0 }
 0x67b   : > { %v3049_v15 = vadd.f32 %v6102_v57, %v6121_v19  ;;  %v3051_v0 = vadd.f32 %v6102_v57, %v6130_v20 }
 0x67c   : > { %v2772_v28 = vpack.c.bf16 %v2739_v32, %v2739_v32  ;;  %v3285_v40 = vunpack.c.l.b16 %v3221_v13 }
 0x67d   : > { %v3129_v52 = vpop.f32.mrf.mxu3 }
 0x67e   : > { %v2836_v11 = vunpack.c.l.b16 %v2772_v28  ;;  %v3130_v35 = vadd.f32 %v3129_v52, %v3041_v58  ;;  %v6175_v58 = vpop.f32.mrf.mxu2 }
 0x680   : > { %v3190_v61 = vmax.f32 %v3130_v35, 0.0  ;;  %v2852_v63 = vpack.c.b16 %v2836_v11, %v2835_v34 }
 0x682   : > { %v3222_v5 = vpack.c.bf16 %v3190_v61, %v3190_v61  ;;  %3171 = vmatmul.bf16.gmra.mxu3 %v2852_v63 }
 0x684   : > { %v3286_v4 = vunpack.c.l.b16 %v3222_v5 }
 0x685   : > { %v3132_v10 = vpop.f32.mrf.mxu3 }
 0x686   : > { %v3311_v54 = vpack.c.b16 %v3286_v4, %v3285_v40  ;;  %v3133_v51 = vadd.f32 %v3132_v10, %v3044_v62  ;;  %v6179_v63 = vpop.f32.mrf.mxu2 }
 0x688   : > { %3811 = vmatmul.bf16.gmra.mxu2 %v3311_v54  ;;  %v3191_v42 = vmax.f32 %v3133_v51, 0.0 }
 0x68a   : > { %v3223_v28 = vpack.c.bf16 %v3191_v42, %v3191_v42 }
 0x68c   : > { %v3287_v11 = vunpack.c.l.b16 %v3223_v28  ;;  %v3054_v28 = vadd.f32 %v6102_v57, %v6136_v48 }
 0x68d   : > { %v3134_v32 = vpop.f32.mrf.mxu3 }
 0x68e   : > { %v3135_v50 = vadd.f32 %v3134_v32, %v3046_v24  ;;  %v6183_v24 = vpop.f32.mrf.mxu2 }
 0x690   : > { %v3192_v52 = vmax.f32 %v3135_v50, 0.0 }
 0x692   : > { %v3224_v34 = vpack.c.bf16 %v3192_v52, %v3192_v52 }
 0x694   : > { %v3288_v35 = vunpack.c.l.b16 %v3224_v34 }
 0x695   : > { %v3137_v13 = vpop.f32.mrf.mxu3 }
 0x696   : > { %v3312_v61 = vpack.c.b16 %v3288_v35, %v3287_v11  ;;  %v3138_v5 = vadd.f32 %v3137_v13, %v3049_v15 }
 0x698   : > { %3337 = vmatpush.bf16.msrb.mxu0 %v3312_v61  ;;  %3816 = vmatmul.bf16.gmra.mxu2 %v3312_v61  ;;  %v3193_v40 = vmax.f32 %v3138_v5, 0.0 }
 0x69a   : > { %v3225_v62 = vpack.c.bf16 %v3193_v40, %v3193_v40 }
 0x69c   : > { %3338 = vmatpush.bf16.msrb.mxu0 %v3311_v54  ;;  %v3289_v19 = vunpack.c.l.b16 %v3225_v62  ;;  %v6194_v54 = vpop.f32.mrf.mxu2 }
 0x69d   : > { %v3139_v4 = vpop.f32.mrf.mxu3 }
 0x69e   : > { %v3140_v10 = vadd.f32 %v3139_v4, %v3051_v0 }
 0x6a0   : > { %v3194_v51 = vmax.f32 %v3140_v10, 0.0  ;;  %3339 = vmatpush.bf16.msrb.mxu0 %v3310_v36  ;;  %v3056_v36 = vadd.f32 %v6102_v57, %v6141_v7  ;;  %v3059_v7 = vadd.f32 %v6102_v57, %v6150_v27 }
 0x6a2   : > { %v3226_v42 = vpack.c.bf16 %v3194_v51, %v3194_v51 }
 0x6a4   : > { %v3290_v32 = vunpack.c.l.b16 %v3226_v42  ;;  %3340 = vmatpush.bf16.msrb.mxu0 %v6156_v18  ;;  %v6201_v5 = vpop.f32.mrf.mxu2 }
 0x6a5   : > { %v3142_v50 = vpop.f32.mrf.mxu3 }
 0x6a6   : > { %v6188_v52 = vpack.c.b16 %v3290_v32, %v3289_v19  ;;  %v3143_v20 = vadd.f32 %v3142_v50, %v3054_v28 }
 0x6a8   : > { %3341 = vmatpush.bf16.msrb.mxu0 %v6145_v56  ;;  %3821 = vmatmul.bf16.gmra.mxu2 %v6188_v52  ;;  %v3195_v34 = vmax.f32 %v3143_v20, 0.0  ;;  %v3066_v20 = vadd.f32 %v6102_v57, %v6165_v29  ;;  %v3071_v29 = vadd.f32 %v6102_v57, %v6175_v58 }
 0x6aa   : > { %v3227_v35 = vpack.c.bf16 %v3195_v34, %v3195_v34 }
 0x6ac   : > { %3342 = vmatpush.bf16.msrb.mxu0 %v6134_v39  ;;  %v3291_v15 = vunpack.c.l.b16 %v3227_v35 }
 0x6ad   : > { %v3144_v18 = vpop.f32.mrf.mxu3 }
 0x6ae   : > { %v3145_v11 = vadd.f32 %v3144_v18, %v3056_v36 }
 0x6b0   : > { %v3196_v13 = vmax.f32 %v3145_v11, 0.0  ;;  %3343 = vmatpush.bf16.msrb.mxu0 %v6125_v8  ;;  %v3061_v8 = vadd.f32 %v6102_v57, %v6154_v23 }
 0x6b2   : > { %v3228_v48 = vpack.c.bf16 %v3196_v13, %v3196_v13 }
 0x6b4   : > { %v3292_v61 = vunpack.c.l.b16 %v3228_v48  ;;  %3344 = vmatpush.bf16.msrb.mxu0 %v6114_v53  ;;  %v6209_v53 = vpop.f32.mrf.mxu2 }
 0x6b5   : > { %v3147_v56 = vpop.f32.mrf.mxu3 }
 0x6b6   : > { %v6203_v0 = vpack.c.b16 %v3292_v61, %v3291_v15  ;;  %v3148_v39 = vadd.f32 %v3147_v56, %v3059_v7 }
 0x6b7   : > { %3345 = vmatmul.bf16.vlgmr.msrb.gmra.mxu0 %v5586_v55  ;;  %v3064_v55 = vadd.f32 %v6102_v57, %v6161_v14 }
 0x6b8   : > { %3826 = vmatmul.bf16.gmra.mxu2 %v6203_v0  ;;  %v3197_v40 = vmax.f32 %v3148_v39, 0.0 }
 0x6ba   : > { %v3229_v62 = vpack.c.bf16 %v3197_v40, %v3197_v40 }
 0x6bc   : > { %v3293_v42 = vunpack.c.l.b16 %v3229_v62  ;;  %v6217_v23 = vpop.f32.mrf.mxu2 }
 0x6bd   : > { %v3149_v4 = vpop.f32.mrf.mxu3 }
 0x6be   : > { %v3150_v10 = vadd.f32 %v3149_v4, %v3061_v8 }
 0x6c0   : > { %v3198_v51 = vmax.f32 %v3150_v10, 0.0 }
 0x6c2   : > { %v3230_v27 = vpack.c.bf16 %v3198_v51, %v3198_v51 }
 0x6c4   : > { %v3294_v19 = vunpack.c.l.b16 %v3230_v27  ;;  %v6221_v13 = vpop.f32.mrf.mxu2 }
 0x6c5   : > { %v3152_v32 = vpop.f32.mrf.mxu3 }
 0x6c6   : > { %v6213_v50 = vpack.c.b16 %v3294_v19, %v3293_v42  ;;  %v3153_v28 = vadd.f32 %v3152_v32, %v3064_v55  ;;  %v3076_v55 = vadd.f32 %v6102_v57, %v6183_v24 }
 0x6c7   : > { %3350 = vmatmul.bf16.gmra.mxu0 %v5595_v9  ;;  %v3069_v9 = vadd.f32 %v6102_v57, %v6169_v1 }
 0x6c8   : > { %3831 = vmatmul.bf16.gmra.mxu2 %v6213_v50  ;;  %v3199_v36 = vmax.f32 %v3153_v28, 0.0 }
 0x6ca   : > { %v3231_v11 = vpack.c.bf16 %v3199_v36, %v3199_v36 }
 0x6cc   : > { %v3295_v48 = vunpack.c.l.b16 %v3231_v11  ;;  %v6231_v39 = vpop.f32.mrf.mxu2 }
 0x6cd   : > { %v3154_v34 = vpop.f32.mrf.mxu3 }
 0x6ce   : > { %v3155_v18 = vadd.f32 %v3154_v34, %v3066_v20 }
 0x6d0   : > { %v3200_v35 = vmax.f32 %v3155_v18, 0.0 }
 0x6d2   : > { %v3232_v14 = vpack.c.bf16 %v3200_v35, %v3200_v35 }
 0x6d4   : > { %v3296_v15 = vunpack.c.l.b16 %v3232_v14  ;;  %v6235_v19 = vpop.f32.mrf.mxu2 }
 0x6d5   : > { %v3157_v61 = vpop.f32.mrf.mxu3 }
 0x6d6   : > { %v6225_v56 = vpack.c.b16 %v3296_v15, %v3295_v48  ;;  %v3158_v7 = vadd.f32 %v3157_v61, %v3069_v9  ;;  %v3079_v15 = vadd.f32 %v6102_v57, %v6194_v54  ;;  %v3081_v9 = vadd.f32 %v6102_v57, %v6201_v5 }
 0x6d7   : > { %3355 = vmatmul.bf16.gmra.mxu0 %v5602_v44  ;;  %v3074_v44 = vadd.f32 %v6102_v57, %v6179_v63  ;;  %v3086_v5 = vadd.f32 %v6102_v57, %v6217_v23 }
 0x6d8   : > { %3836 = vmatmul.bf16.gmra.mxu2 %v6225_v56  ;;  %v3201_v8 = vmax.f32 %v3158_v7, 0.0 }
 0x6da   : > { %v3233_v10 = vpack.c.bf16 %v3201_v8, %v3201_v8 }
 0x6dc   : > { %v3297_v27 = vunpack.c.l.b16 %v3233_v10  ;;  %v6240_v34 = vpop.f32.mrf.mxu2 }
 0x6dd   : > { %v3159_v40 = vpop.f32.mrf.mxu3 }
 0x6de   : > { %v3160_v4 = vadd.f32 %v3159_v40, %v3071_v29 }
 0x6e0   : > { %v3202_v62 = vmax.f32 %v3160_v4, 0.0 }
 0x6e2   : > { %v3234_v51 = vpack.c.bf16 %v3202_v62, %v3202_v62 }
 0x6e4   : > { %v3298_v1 = vunpack.c.l.b16 %v3234_v51  ;;  %v6245_v24 = vpop.f32.mrf.mxu2 }
 0x6e5   : > { %v3162_v42 = vpop.f32.mrf.mxu3 }
 0x6e6   : > { %v3317_v32 = vpack.c.b16 %v3298_v1, %v3297_v27  ;;  %v3163_v58 = vadd.f32 %v3162_v42, %v3074_v44 }
 0x6e7   : > { %3360 = vmatmul.bf16.gmra.mxu0 %v5614_v45 }
 0x6e8   : > { %3841 = vmatmul.bf16.gmra.mxu2 %v3317_v32  ;;  %v3203_v28 = vmax.f32 %v3163_v58, 0.0 }
 0x6ea   : > { %v3235_v18 = vpack.c.bf16 %v3203_v28, %v3203_v28 }
 0x6ec   : > { %v3299_v14 = vunpack.c.l.b16 %v3235_v18  ;;  %v6249_v62 = vpop.f32.mrf.mxu2 }
 0x6ed   : > { %v3164_v20 = vpop.f32.mrf.mxu3 }
 0x6ee   : > { %v3165_v36 = vadd.f32 %v3164_v20, %v3076_v55 }
 0x6f0   : > { %v3204_v11 = vmax.f32 %v3165_v36, 0.0 }
 0x6f2   : > { %v3236_v35 = vpack.c.bf16 %v3204_v11, %v3204_v11 }
 0x6f4   : > { %v3300_v63 = vunpack.c.l.b16 %v3236_v35  ;;  %v6256_v55 = vpop.f32.mrf.mxu2 }
 0x6f5   : > { %v3167_v48 = vpop.f32.mrf.mxu3 }
 0x6f6   : > { %v3318_v45 = vpack.c.b16 %v3300_v63, %v3299_v14  ;;  %v3168_v61 = vadd.f32 %v3167_v48, %v3079_v15 }
 0x6f7   : > { %3365 = vmatmul.bf16.gmra.mxu0 %v5624_v12  ;;  %v3084_v12 = vadd.f32 %v6102_v57, %v6209_v53 }
 0x6f8   : > { %3846 = vmatmul.bf16.gmra.mxu2 %v3318_v45  ;;  %v3205_v7 = vmax.f32 %v3168_v61, 0.0 }
 0x6fa   : > { %v3237_v40 = vpack.c.bf16 %v3205_v7, %v3205_v7 }
 0x6fc   : > { %v3301_v51 = vunpack.c.l.b16 %v3237_v40  ;;  %v6259_v53 = vpop.f32.mrf.mxu2 }
 0x6fd   : > { %v3169_v29 = vpop.f32.mrf.mxu3 }
 0x6fe   : > { %v3170_v8 = vadd.f32 %v3169_v29, %v3081_v9 }
 0x700   : > { %v3206_v4 = vmax.f32 %v3170_v8, 0.0 }
 0x702   : > { %v3238_v10 = vpack.c.bf16 %v3206_v4, %v3206_v4 }
 0x704   : > { %v3302_v54 = vunpack.c.l.b16 %v3238_v10  ;;  %v6511_v10 = vld [vmem:[#allocation2_spill] sm:$0xff] }
 0x705   : > { %v3172_v27 = vpop.f32.mrf.mxu3 }
 0x706   : > { %v3319_v1 = vpack.c.b16 %v3302_v54, %v3301_v51  ;;  %v3173_v42 = vadd.f32 %v3172_v27, %v3084_v12 }
 0x707   : > { %3370 = vmatmul.bf16.gmra.mxu0 %v5634_v47 }
 0x708   : > { %3851 = vmatmul.bf16.gmra.mxu2 %v3319_v1  ;;  %v3207_v44 = vmax.f32 %v3173_v42, 0.0 }
 0x70a   : > { %v3239_v20 = vpack.c.bf16 %v3207_v44, %v3207_v44 }
 0x70c   : > { %v3303_v11 = vunpack.c.l.b16 %v3239_v20 }
 0x70d   : > { %v3174_v58 = vpop.f32.mrf.mxu3 }
 0x70e   : > { %v3175_v28 = vadd.f32 %v3174_v58, %v3086_v5 }
 0x710   : > { %v3208_v36 = vmax.f32 %v3175_v28, 0.0  ;;  %v6512_v28 = vld [vmem:[#allocation3_spill] sm:$0xff] }
 0x712   : > { %v3240_v18 = vpack.c.bf16 %v3208_v36, %v3208_v36 }
 0x714   : > { %v3304_v35 = vunpack.c.l.b16 %v3240_v18 }
 0x716   : > { %v3320_v14 = vpack.c.b16 %v3304_v35, %v3303_v11 }
 0x717   : > { %3375 = vmatmul.bf16.gmra.mxu0 %v5644_v37  ;;  %v4688_v37 = vld [vmem:[%s6415_s5 + $0x58] sm:$0xff] }
 0x718   : > { %3426 = vmatpush.bf16.msrb.mxu1 %v3320_v14  ;;  %3856 = vmatmul.bf16.gmra.mxu2 %v3320_v14 }
 0x71c   : > { %3427 = vmatpush.bf16.msrb.mxu1 %v3319_v1 }
 0x720   : > { %3428 = vmatpush.bf16.msrb.mxu1 %v3318_v45 }
 0x724   : > { %3429 = vmatpush.bf16.msrb.mxu1 %v3317_v32 }
 0x727   : > { %3380 = vmatmul.bf16.gmra.mxu0 %v5654_v16  ;;  %v4687_v16 = vld [vmem:[%s6415_s5 + $0x50] sm:$0xff] }
 0x728   : > { %3430 = vmatpush.bf16.msrb.mxu1 %v6225_v56 }
 0x72c   : > { %3431 = vmatpush.bf16.msrb.mxu1 %v6213_v50 }
 0x730   : > { %3432 = vmatpush.bf16.msrb.mxu1 %v6203_v0 }
 0x734   : > { %3433 = vmatpush.bf16.msrb.mxu1 %v6188_v52  ;;  %v3346_v47 = vpop.f32.mrf.mxu0 }
 0x737   : > { %3434 = vmatmul.bf16.vlgmr.msrb.gmra.mxu1 %v5608_v41  ;;  %3385 = vmatmul.bf16.gmra.mxu0 %v5673_v43  ;;  %v4692_v41 = vld [vmem:[%s6415_s5 + $0x78] sm:$0xff] }
 0x738   : > { %3862 = vmatpush.bf16.msrb.mxu3 %v4692_v41 }
 0x747   : > { %3439 = vmatmul.bf16.gmra.mxu1 %v5619_v22  ;;  %3390 = vmatmul.bf16.gmra.mxu0 %v5695_v49  ;;  %v4691_v22 = vld [vmem:[%s6415_s5 + $0x70] sm:$0xff]  ;;  %v4685_v49 = vld [vmem:[%s6415_s5 + $0x40] sm:$0xff] }
 0x748   : > { %3863 = vmatpush.bf16.msrb.mxu3 %v4691_v22 }
 0x757   : > { %3444 = vmatmul.bf16.gmra.mxu1 %v5629_v31  ;;  %3395 = vmatmul.bf16.gmra.mxu0 %v5708_v59  ;;  %v4690_v31 = vld [vmem:[%s6415_s5 + $0x68] sm:$0xff] }
 0x758   : > { %3864 = vmatpush.bf16.msrb.mxu3 %v4690_v31 }
 0x767   : > { %3449 = vmatmul.bf16.gmra.mxu1 %v5639_v46  ;;  %3400 = vmatmul.bf16.gmra.mxu0 %v5718_v30  ;;  %v4689_v46 = vld [vmem:[%s6415_s5 + $0x60] sm:$0xff] }
 0x768   : > { %3865 = vmatpush.bf16.msrb.mxu3 %v4689_v46  ;;  %v6513_v46 = vld [vmem:[#allocation4_spill] sm:$0xff] }
 0x76c   : > { %3866 = vmatpush.bf16.msrb.mxu3 %v4688_v37 }
 0x770   : > { %3867 = vmatpush.bf16.msrb.mxu3 %v4687_v16 }
 0x777   : > { %3454 = vmatmul.bf16.gmra.mxu1 %v5649_v60  ;;  %v3348_v60 = vpop.f32.mrf.mxu0  ;;  %3405 = vmatmul.bf16.gmra.mxu0 %v5728_v26 }
 0x77f   : > { %v3351_v43 = vpop.f32.mrf.mxu0 }
 0x787   : > { %3459 = vmatmul.bf16.gmra.mxu1 %v5659_v38  ;;  %v4686_v38 = vld [vmem:[%s6415_s5 + $0x48] sm:$0xff]  ;;  %v3353_v59 = vpop.f32.mrf.mxu0  ;;  %3410 = vmatmul.bf16.gmra.mxu0 %v5738_v21 }
 0x788   : > { %3868 = vmatpush.bf16.msrb.mxu3 %v4686_v38 }
 0x78c   : > { %3869 = vmatpush.bf16.msrb.mxu3 %v4685_v49 }
 0x797   : > { %3464 = vmatmul.bf16.gmra.mxu1 %v5681_v17  ;;  %v3356_v17 = vpop.f32.mrf.mxu0 }
 0x79f   : > { %v3358_v26 = vpop.f32.mrf.mxu0  ;;  %3415 = vmatmul.bf16.gmra.mxu0 %v5748_v33 }
 0x7a7   : > { %3469 = vmatmul.bf16.gmra.mxu1 %v5703_v25  ;;  %v3361_v0 = vpop.f32.mrf.mxu0 }
 0x7af   : > { %v3363_v21 = vpop.f32.mrf.mxu0  ;;  %3420 = vmatmul.bf16.gmra.mxu0 %v5758_v6 }
 0x7b4   : > { %v3435_v30 = vpop.f32.mrf.mxu1 }
 0x7b5   : > { %v3436_v57 = vadd.f32 %v3435_v30, %v3346_v47 }
 0x7b7   : > { %3474 = vmatmul.bf16.gmra.mxu1 %v5713_v2  ;;  %v3515_v50 = vpack.c.bf16 %v3436_v57, %v3436_v57  ;;  %v3366_v45 = vpop.f32.mrf.mxu0 }
 0x7b9   : > { %v3579_v32 = vunpack.c.l.b16 %v3515_v50 }
 0x7bc   : > { %v3437_v52 = vpop.f32.mrf.mxu1 }
 0x7bd   : > { %v3438_v23 = vadd.f32 %v3437_v52, %v3348_v60  ;;  %v6514_v52 = vld [vmem:[#allocation5_spill] sm:$0xff] }
 0x7bf   : > { %v3516_v56 = vpack.c.bf16 %v3438_v23, %v3438_v23  ;;  %v3368_v4 = vpop.f32.mrf.mxu0 }
 0x7c1   : > { %v3580_v63 = vunpack.c.l.b16 %v3516_v56 }
 0x7c3   : > { %v3611_v48 = vpack.c.b16 %v3580_v63, %v3579_v32 }
 0x7c4   : > { %v3440_v15 = vpop.f32.mrf.mxu1 }
 0x7c5   : > { %3870 = vmatmul.bf16.vlgmr.msrb.gmra.mxu3 %v3611_v48  ;;  %v3441_v25 = vadd.f32 %v3440_v15, %v3351_v43 }
 0x7c7   : > { %3479 = vmatmul.bf16.gmra.mxu1 %v5723_v3  ;;  %v3517_v2 = vpack.c.bf16 %v3441_v25, %v3441_v25  ;;  %v3371_v6 = vpop.f32.mrf.mxu0 }
 0x7c9   : > { %v3581_v7 = vunpack.c.l.b16 %v3517_v2 }
 0x7cc   : > { %v3442_v33 = vpop.f32.mrf.mxu1 }
 0x7cd   : > { %v3443_v61 = vadd.f32 %v3442_v33, %v3353_v59 }
 0x7cf   : > { %v3518_v9 = vpack.c.bf16 %v3443_v61, %v3443_v61  ;;  %v3373_v58 = vpop.f32.mrf.mxu0 }
 0x7d1   : > { %v3582_v29 = vunpack.c.l.b16 %v3518_v9 }
 0x7d3   : > { %v3612_v8 = vpack.c.b16 %v3582_v29, %v3581_v7 }
 0x7d4   : > { %v3445_v40 = vpop.f32.mrf.mxu1 }
 0x7d5   : > { %3875 = vmatmul.bf16.gmra.mxu3 %v3612_v8  ;;  %v3446_v51 = vadd.f32 %v3445_v40, %v3356_v17 }
 0x7d7   : > { %3484 = vmatmul.bf16.gmra.mxu1 %v6511_v10  ;;  %v3519_v27 = vpack.c.bf16 %v3446_v51, %v3446_v51  ;;  %v3376_v35 = vpop.f32.mrf.mxu0 }
 0x7d9   : > { %v3583_v1 = vunpack.c.l.b16 %v3519_v27 }
 0x7dc   : > { %v3447_v54 = vpop.f32.mrf.mxu1 }
 0x7dd   : > { %v3448_v12 = vadd.f32 %v3447_v54, %v3358_v26  ;;  %v6516_v54 = vld [vmem:[#allocation7_spill] sm:$0xff] }
 0x7df   : > { %v3520_v3 = vpack.c.bf16 %v3448_v12, %v3448_v12  ;;  %v3378_v37 = vpop.f32.mrf.mxu0 }
 0x7e1   : > { %v3584_v42 = vunpack.c.l.b16 %v3520_v3 }
 0x7e3   : > { %v3613_v5 = vpack.c.b16 %v3584_v42, %v3583_v1 }
 0x7e4   : > { %v3450_v44 = vpop.f32.mrf.mxu1 }
 0x7e5   : > { %3880 = vmatmul.bf16.gmra.mxu3 %v3613_v5  ;;  %v3451_v20 = vadd.f32 %v3450_v44, %v3361_v0 }
 0x7e7   : > { %3489 = vmatmul.bf16.gmra.mxu1 %v6512_v28  ;;  %v3521_v18 = vpack.c.bf16 %v3451_v20, %v3451_v20  ;;  %v3381_v30 = vpop.f32.mrf.mxu0 }
 0x7e9   : > { %v3585_v41 = vunpack.c.l.b16 %v3521_v18 }
 0x7ec   : > { %v3452_v36 = vpop.f32.mrf.mxu1 }
 0x7ed   : > { %v3453_v11 = vadd.f32 %v3452_v36, %v3363_v21 }
 0x7ef   : > { %v3522_v14 = vpack.c.bf16 %v3453_v11, %v3453_v11  ;;  %v3383_v23 = vpop.f32.mrf.mxu0 }
 0x7f1   : > { %v3586_v22 = vunpack.c.l.b16 %v3522_v14 }
 0x7f3   : > { %v3614_v31 = vpack.c.b16 %v3586_v22, %v3585_v41 }
 0x7f4   : > { %v3455_v47 = vpop.f32.mrf.mxu1 }
 0x7f5   : > { %3885 = vmatmul.bf16.gmra.mxu3 %v3614_v31  ;;  %v3456_v60 = vadd.f32 %v3455_v47, %v3366_v45  ;;  %v6515_v45 = vld [vmem:[#allocation6_spill] sm:$0xff] }
 0x7f6   : > { %v6317_v47 = vld [vmem:[%s6416_s6 + $0x3] ss:$0 sm:$0xff] }
 0x7f7   : > { %3494 = vmatmul.bf16.gmra.mxu1 %v6513_v46  ;;  %v3523_v38 = vpack.c.bf16 %v3456_v60, %v3456_v60  ;;  %v3386_v33 = vpop.f32.mrf.mxu0  ;;  %v3783_v60 = vadd.f32 %v6317_v47, %v6221_v13  ;;  %v3785_v13 = vadd.f32 %v6317_v47, %v6231_v39 }
 0x7f9   : > { %v3587_v59 = vunpack.c.l.b16 %v3523_v38 }
 0x7fc   : > { %v3457_v16 = vpop.f32.mrf.mxu1 }
 0x7fd   : > { %v3458_v43 = vadd.f32 %v3457_v16, %v3368_v4 }
 0x7ff   : > { %v3524_v49 = vpack.c.bf16 %v3458_v43, %v3458_v43  ;;  %v3388_v8 = vpop.f32.mrf.mxu0 }
 0x801   : > { %v3588_v17 = vunpack.c.l.b16 %v3524_v49 }
 0x803   : > { %v3615_v26 = vpack.c.b16 %v3588_v17, %v3587_v59 }
 0x804   : > { %v3460_v57 = vpop.f32.mrf.mxu1 }
 0x805   : > { %3890 = vmatmul.bf16.gmra.mxu3 %v3615_v26  ;;  %v3461_v0 = vadd.f32 %v3460_v57, %v3371_v6 }
 0x807   : > { %3499 = vmatmul.bf16.gmra.mxu1 %v6514_v52  ;;  %v3525_v56 = vpack.c.bf16 %v3461_v0, %v3461_v0  ;;  %v3391_v27 = vpop.f32.mrf.mxu0 }
 0x809   : > { %v3589_v48 = vunpack.c.l.b16 %v3525_v56 }
 0x80c   : > { %v3462_v50 = vpop.f32.mrf.mxu1 }
 0x80d   : > { %v3463_v32 = vadd.f32 %v3462_v50, %v3373_v58 }
 0x80f   : > { %v3526_v63 = vpack.c.bf16 %v3463_v32, %v3463_v32  ;;  %v3393_v20 = vpop.f32.mrf.mxu0 }
 0x811   : > { %v3590_v15 = vunpack.c.l.b16 %v3526_v63 }
 0x813   : > { %v3616_v21 = vpack.c.b16 %v3590_v15, %v3589_v48  ;;  %v6332_v15 = vpop.f32.mrf.mxu2 }
 0x814   : > { %v3465_v25 = vpop.f32.mrf.mxu1 }
 0x815   : > { %3895 = vmatmul.bf16.gmra.mxu3 %v3616_v21  ;;  %v3466_v2 = vadd.f32 %v3465_v25, %v3376_v35  ;;  %v3788_v21 = vadd.f32 %v6317_v47, %v6235_v19 }
 0x817   : > { %3504 = vmatmul.bf16.gmra.mxu1 %v6515_v45  ;;  %v3527_v9 = vpack.c.bf16 %v3466_v2, %v3466_v2  ;;  %v3396_v14 = vpop.f32.mrf.mxu0 }
 0x819   : > { %v3591_v40 = vunpack.c.l.b16 %v3527_v9 }
 0x81c   : > { %v3467_v61 = vpop.f32.mrf.mxu1 }
 0x81d   : > { %v3468_v7 = vadd.f32 %v3467_v61, %v3378_v37 }
 0x81f   : > { %v3528_v29 = vpack.c.bf16 %v3468_v7, %v3468_v7  ;;  %v3398_v38 = vpop.f32.mrf.mxu0 }
 0x821   : > { %v3592_v4 = vunpack.c.l.b16 %v3528_v29  ;;  %v3790_v29 = vadd.f32 %v6317_v47, %v6240_v34 }
 0x823   : > { %v3617_v10 = vpack.c.b16 %v3592_v4, %v3591_v40  ;;  %v6339_v40 = vpop.f32.mrf.mxu2 }
 0x824   : > { %v3470_v51 = vpop.f32.mrf.mxu1 }
 0x825   : > { %3900 = vmatmul.bf16.gmra.mxu3 %v3617_v10  ;;  %v3471_v6 = vadd.f32 %v3470_v51, %v3381_v30 }
 0x827   : > { %3509 = vmatmul.bf16.gmra.mxu1 %v6516_v54  ;;  %v3529_v3 = vpack.c.bf16 %v3471_v6, %v3471_v6  ;;  %v3401_v56 = vpop.f32.mrf.mxu0 }
 0x829   : > { %v3593_v5 = vunpack.c.l.b16 %v3529_v3  ;;  %v3793_v3 = vadd.f32 %v6317_v47, %v6245_v24 }
 0x82c   : > { %v3472_v12 = vpop.f32.mrf.mxu1 }
 0x82d   : > { %v3473_v1 = vadd.f32 %v3472_v12, %v3383_v23 }
 0x82f   : > { %v3530_v42 = vpack.c.bf16 %v3473_v1, %v3473_v1  ;;  %v3403_v61 = vpop.f32.mrf.mxu0 }
 0x831   : > { %v3594_v44 = vunpack.c.l.b16 %v3530_v42 }
 0x833   : > { %v3618_v58 = vpack.c.b16 %v3594_v44, %v3593_v5  ;;  %v6344_v5 = vpop.f32.mrf.mxu2 }
 0x834   : > { %v3475_v28 = vpop.f32.mrf.mxu1 }
 0x835   : > { %3905 = vmatmul.bf16.gmra.mxu3 %v3618_v58  ;;  %v3476_v36 = vadd.f32 %v3475_v28, %v3386_v33 }
 0x837   : > { %v3531_v11 = vpack.c.bf16 %v3476_v36, %v3476_v36  ;;  %v3406_v12 = vpop.f32.mrf.mxu0  ;;  %v3795_v36 = vadd.f32 %v6317_v47, %v6249_v62 }
 0x839   : > { %v3595_v22 = vunpack.c.l.b16 %v3531_v11 }
 0x83c   : > { %v3477_v18 = vpop.f32.mrf.mxu1 }
 0x83d   : > { %v3478_v35 = vadd.f32 %v3477_v18, %v3388_v8 }
 0x83f   : > { %v3532_v41 = vpack.c.bf16 %v3478_v35, %v3478_v35  ;;  %v3408_v35 = vpop.f32.mrf.mxu0 }
 0x841   : > { %v3596_v31 = vunpack.c.l.b16 %v3532_v41 }
 0x843   : > { %v3619_v46 = vpack.c.b16 %v3596_v31, %v3595_v22 }
 0x844   : > { %v3480_v37 = vpop.f32.mrf.mxu1 }
 0x845   : > { %3910 = vmatmul.bf16.gmra.mxu3 %v3619_v46  ;;  %v3481_v43 = vadd.f32 %v3480_v37, %v3391_v27  ;;  %v3809_v46 = vpop.f32.mrf.mxu2 }
 0x847   : > { %v3533_v30 = vpack.c.bf16 %v3481_v43, %v3481_v43  ;;  %v3411_v62 = vpop.f32.mrf.mxu0 }
 0x848   : > { %v3871_v16 = vpop.f32.mrf.mxu3 }
 0x849   : > { %v3872_v49 = vadd.f32 %v3871_v16, %v3783_v60  ;;  %v3597_v0 = vunpack.c.l.b16 %v3533_v30  ;;  %v3798_v60 = vadd.f32 %v6317_v47, %v6256_v55 }
 0x84b   : > { %v3951_v59 = vmax.f32 %v3872_v49, 0.0 }
 0x84c   : > { %v3482_v17 = vpop.f32.mrf.mxu1 }
 0x84d   : > { %3983 = vst [vmem:[%s6326_s15] sm:$0xff] %v3951_v59  ;;  %v3483_v26 = vadd.f32 %v3482_v17, %v3393_v20 }
 0x84f   : > { %v3534_v57 = vpack.c.bf16 %v3483_v26, %v3483_v26  ;;  %v3812_v26 = vpop.f32.mrf.mxu2 }
 0x850   : > { %v3873_v52 = vpop.f32.mrf.mxu3 }
 0x851   : > { %v3598_v50 = vunpack.c.l.b16 %v3534_v57  ;;  %v3874_v23 = vadd.f32 %v3873_v52, %v3785_v13  ;;  %v3800_v13 = vadd.f32 %v6317_v47, %v6259_v53 }
 0x853   : > { %v3620_v32 = vpack.c.b16 %v3598_v50, %v3597_v0  ;;  %v3952_v63 = vmax.f32 %v3874_v23, 0.0 }
 0x854   : > { %v3485_v48 = vpop.f32.mrf.mxu1 }
 0x855   : > { %3984 = vst [vmem:[%s6326_s15 + $0x8] sm:$0xff] %v3952_v63  ;;  %3915 = vmatmul.bf16.gmra.mxu3 %v3620_v32  ;;  %v3486_v33 = vadd.f32 %v3485_v48, %v3396_v14  ;;  %v3413_v63 = vpop.f32.mrf.mxu0  ;;  %v3803_v48 = vadd.f32 %v6317_v47, %v6332_v15 }
 0x857   : > { %v3535_v9 = vpack.c.bf16 %v3486_v33, %v3486_v33 }
 0x858   : > { %v3876_v25 = vpop.f32.mrf.mxu3 }
 0x859   : > { %v3877_v39 = vadd.f32 %v3876_v25, %v3788_v21  ;;  %v3599_v10 = vunpack.c.l.b16 %v3535_v9  ;;  %v3814_v21 = vpop.f32.mrf.mxu2 }
 0x85b   : > { %v3953_v45 = vmax.f32 %v3877_v39, 0.0 }
 0x85c   : > { %v3487_v2 = vpop.f32.mrf.mxu1 }
 0x85d   : > { %3985 = vst [vmem:[%s6326_s15 + $0x10] sm:$0xff] %v3953_v45  ;;  %v3488_v7 = vadd.f32 %v3487_v2, %v3398_v38  ;;  %v3416_v9 = vpop.f32.mrf.mxu0 }
 0x85f   : > { %v3536_v8 = vpack.c.bf16 %v3488_v7, %v3488_v7  ;;  %v3805_v7 = vadd.f32 %v6317_v47, %v6339_v40 }
 0x860   : > { %v3878_v4 = vpop.f32.mrf.mxu3 }
 0x861   : > { %v3600_v51 = vunpack.c.l.b16 %v3536_v8  ;;  %v3879_v19 = vadd.f32 %v3878_v4, %v3790_v29  ;;  %v3817_v15 = vpop.f32.mrf.mxu2 }
 0x863   : > { %v3621_v54 = vpack.c.b16 %v3600_v51, %v3599_v10  ;;  %v3954_v6 = vmax.f32 %v3879_v19, 0.0 }
 0x864   : > { %v3490_v27 = vpop.f32.mrf.mxu1 }
 0x865   : > { %3986 = vst [vmem:[%s6326_s15 + $0x18] sm:$0xff] %v3954_v6  ;;  %3920 = vmatmul.bf16.gmra.mxu3 %v3621_v54  ;;  %v3491_v42 = vadd.f32 %v3490_v27, %v3401_v56  ;;  %v3808_v27 = vadd.f32 %v6317_v47, %v6344_v5 }
 0x867   : > { %v3537_v28 = vpack.c.bf16 %v3491_v42, %v3491_v42 }
 0x868   : > { %v3881_v1 = vpop.f32.mrf.mxu3 }
 0x869   : > { %v3882_v34 = vadd.f32 %v3881_v1, %v3793_v3  ;;  %v3601_v14 = vunpack.c.l.b16 %v3537_v28  ;;  %v3418_v3 = vpop.f32.mrf.mxu0 }
 0x86b   : > { %v3955_v44 = vmax.f32 %v3882_v34, 0.0  ;;  %v3819_v34 = vpop.f32.mrf.mxu2 }
 0x86c   : > { %v3492_v58 = vpop.f32.mrf.mxu1 }
 0x86d   : > { %3987 = vst [vmem:[%s6326_s15 + $0x20] sm:$0xff] %v3955_v44  ;;  %v3493_v20 = vadd.f32 %v3492_v58, %v3403_v61 }
 0x86f   : > { %v3538_v18 = vpack.c.bf16 %v3493_v20, %v3493_v20  ;;  %v3810_v20 = vadd.f32 %v6317_v47, %v3809_v46 }
 0x870   : > { %v3883_v11 = vpop.f32.mrf.mxu3 }
 0x871   : > { %v3602_v41 = vunpack.c.l.b16 %v3538_v18  ;;  %v3884_v24 = vadd.f32 %v3883_v11, %v3795_v36  ;;  %v3421_v5 = vpop.f32.mrf.mxu0 }
 0x873   : > { %v3622_v22 = vpack.c.b16 %v3602_v41, %v3601_v14  ;;  %v3956_v31 = vmax.f32 %v3884_v24, 0.0 }
 0x874   : > { %v3495_v37 = vpop.f32.mrf.mxu1 }
 0x875   : > { %3988 = vst [vmem:[%s6326_s15 + $0x28] sm:$0xff] %v3956_v31  ;;  %3925 = vmatmul.bf16.gmra.mxu3 %v3622_v22  ;;  %v3496_v38 = vadd.f32 %v3495_v37, %v3406_v12  ;;  %v3822_v31 = vpop.f32.mrf.mxu2  ;;  %v3813_v37 = vadd.f32 %v6317_v47, %v3812_v26 }
 0x877   : > { %v3539_v17 = vpack.c.bf16 %v3496_v38, %v3496_v38 }
 0x878   : > { %v3886_v16 = vpop.f32.mrf.mxu3 }
 0x879   : > { %v3887_v43 = vadd.f32 %v3886_v16, %v3798_v60  ;;  %v3603_v0 = vunpack.c.l.b16 %v3539_v17  ;;  %v3815_v17 = vadd.f32 %v6317_v47, %v3814_v21  ;;  %v3820_v21 = vadd.f32 %v6317_v47, %v3819_v34 }
 0x87b   : > { %v3957_v49 = vmax.f32 %v3887_v43, 0.0  ;;  %v3423_v43 = vpop.f32.mrf.mxu0 }
 0x87c   : > { %v3497_v59 = vpop.f32.mrf.mxu1 }
 0x87d   : > { %3989 = vst [vmem:[%s6326_s15 + $0x30] sm:$0xff] %v3957_v49  ;;  %v3498_v30 = vadd.f32 %v3497_v59, %v3408_v35 }
 0x87f   : > { %v3540_v57 = vpack.c.bf16 %v3498_v30, %v3498_v30 }
 0x880   : > { %v3888_v52 = vpop.f32.mrf.mxu3 }
 0x881   : > { %v3604_v50 = vunpack.c.l.b16 %v3540_v57  ;;  %v3889_v55 = vadd.f32 %v3888_v52, %v3800_v13  ;;  %v3824_v13 = vpop.f32.mrf.mxu2 }
 0x883   : > { %v3623_v23 = vpack.c.b16 %v3604_v50, %v3603_v0  ;;  %v3958_v56 = vmax.f32 %v3889_v55, 0.0 }
 0x884   : > { %v3500_v32 = vpop.f32.mrf.mxu1 }
 0x885   : > { %3990 = vst [vmem:[%s6326_s15 + $0x38] sm:$0xff] %v3958_v56  ;;  %3930 = vmatmul.bf16.gmra.mxu3 %v3623_v23  ;;  %v3501_v33 = vadd.f32 %v3500_v32, %v3411_v62  ;;  %v3818_v23 = vadd.f32 %v6317_v47, %v3817_v15 }
 0x887   : > { %v3541_v2 = vpack.c.bf16 %v3501_v33, %v3501_v33 }
 0x888   : > { %v3891_v25 = vpop.f32.mrf.mxu3 }
 0x889   : > { %v3892_v39 = vadd.f32 %v3891_v25, %v3803_v48  ;;  %v3605_v4 = vunpack.c.l.b16 %v3541_v2 }
 0x88b   : > { %v3959_v53 = vmax.f32 %v3892_v39, 0.0 }
 0x88c   : > { %v3502_v45 = vpop.f32.mrf.mxu1 }
 0x88d   : > { %3991 = vst [vmem:[%s6326_s15 + $0x40] sm:$0xff] %v3959_v53  ;;  %v3503_v61 = vadd.f32 %v3502_v45, %v3413_v63  ;;  %v3827_v63 = vpop.f32.mrf.mxu2  ;;  %v3823_v45 = vadd.f32 %v6317_v47, %v3822_v31 }
 0x88f   : > { %v3542_v29 = vpack.c.bf16 %v3503_v61, %v3503_v61 }
 0x890   : > { %v3893_v8 = vpop.f32.mrf.mxu3 }
 0x891   : > { %v3606_v10 = vunpack.c.l.b16 %v3542_v29  ;;  %v3894_v51 = vadd.f32 %v3893_v8, %v3805_v7  ;;  %v3825_v29 = vadd.f32 %v6317_v47, %v3824_v13 }
 0x893   : > { %v3624_v19 = vpack.c.b16 %v3606_v10, %v3605_v4  ;;  %v3960_v54 = vmax.f32 %v3894_v51, 0.0  ;;  %v3828_v51 = vadd.f32 %v6317_v47, %v3827_v63 }
 0x894   : > { %v3505_v6 = vpop.f32.mrf.mxu1 }
 0x895   : > { %3992 = vst [vmem:[%s6326_s15 + $0x48] sm:$0xff] %v3960_v54  ;;  %3935 = vmatmul.bf16.gmra.mxu3 %v3624_v19  ;;  %v3506_v1 = vadd.f32 %v3505_v6, %v3416_v9  ;;  %v3829_v53 = vpop.f32.mrf.mxu2 }
 0x897   : > { %v3543_v58 = vpack.c.bf16 %v3506_v1, %v3506_v1 }
 0x898   : > { %v3896_v12 = vpop.f32.mrf.mxu3 }
 0x899   : > { %v3897_v42 = vadd.f32 %v3896_v12, %v3808_v27  ;;  %v3607_v11 = vunpack.c.l.b16 %v3543_v58  ;;  %v3830_v27 = vadd.f32 %v6317_v47, %v3829_v53 }
 0x89b   : > { %v3961_v40 = vmax.f32 %v3897_v42, 0.0 }
 0x89c   : > { %v3507_v44 = vpop.f32.mrf.mxu1 }
 0x89d   : > { %3993 = vst [vmem:[%s6326_s15 + $0x50] sm:$0xff] %v3961_v40  ;;  %v3508_v28 = vadd.f32 %v3507_v44, %v3418_v3  ;;  %v3832_v7 = vpop.f32.mrf.mxu2 }
 0x89e   : > { %v3833_v40 = vadd.f32 %v6317_v47, %v3832_v7 }
 0x89f   : > { %v3544_v36 = vpack.c.bf16 %v3508_v28, %v3508_v28 }
 0x8a0   : > { %v3898_v18 = vpop.f32.mrf.mxu3 }
 0x8a1   : > { %v3608_v35 = vunpack.c.l.b16 %v3544_v36  ;;  %v3899_v14 = vadd.f32 %v3898_v18, %v3810_v20 }
 0x8a3   : > { %v3625_v41 = vpack.c.b16 %v3608_v35, %v3607_v11  ;;  %v3962_v24 = vmax.f32 %v3899_v14, 0.0 }
 0x8a4   : > { %v3510_v22 = vpop.f32.mrf.mxu1 }
 0x8a5   : > { %3994 = vst [vmem:[%s6326_s15 + $0x58] sm:$0xff] %v3962_v24  ;;  %3940 = vmatmul.bf16.gmra.mxu3 %v3625_v41  ;;  %v3511_v16 = vadd.f32 %v3510_v22, %v3421_v5  ;;  %v3834_v15 = vpop.f32.mrf.mxu2 }
 0x8a6   : > { %v3835_v20 = vadd.f32 %v6317_v47, %v3834_v15 }
 0x8a7   : > { %v3545_v49 = vpack.c.bf16 %v3511_v16, %v3511_v16 }
 0x8a8   : > { %v3901_v60 = vpop.f32.mrf.mxu3 }
 0x8a9   : > { %v3902_v38 = vadd.f32 %v3901_v60, %v3813_v37  ;;  %v3609_v52 = vunpack.c.l.b16 %v3545_v49 }
 0x8ab   : > { %v3963_v46 = vmax.f32 %v3902_v38, 0.0 }
 0x8ac   : > { %v3512_v62 = vpop.f32.mrf.mxu1 }
 0x8ad   : > { %3995 = vst [vmem:[%s6326_s15 + $0x60] sm:$0xff] %v3963_v46  ;;  %v3513_v59 = vadd.f32 %v3512_v62, %v3423_v43  ;;  %v3837_v1 = vpop.f32.mrf.mxu2 }
 0x8ae   : > { %v3838_v14 = vadd.f32 %v6317_v47, %v3837_v1 }
 0x8af   : > { %v3546_v30 = vpack.c.bf16 %v3513_v59, %v3513_v59 }
 0x8b0   : > { %v3903_v57 = vpop.f32.mrf.mxu3 }
 0x8b1   : > { %v3610_v0 = vunpack.c.l.b16 %v3546_v30  ;;  %v3904_v50 = vadd.f32 %v3903_v57, %v3815_v17 }
 0x8b3   : > { %v3626_v26 = vpack.c.b16 %v3610_v0, %v3609_v52  ;;  %v3964_v55 = vmax.f32 %v3904_v50, 0.0 }
 0x8b5   : > { %3996 = vst [vmem:[%s6326_s15 + $0x68] sm:$0xff] %v3964_v55  ;;  %3945 = vmatmul.bf16.gmra.mxu3 %v3626_v26  ;;  %v3839_v28 = vpop.f32.mrf.mxu2 }
 0x8b6   : > { %v3840_v22 = vadd.f32 %v6317_v47, %v3839_v28 }
 0x8b8   : > { %v3906_v56 = vpop.f32.mrf.mxu3 }
 0x8b9   : > { %v3907_v32 = vadd.f32 %v3906_v56, %v3818_v23 }
 0x8bb   : > { %v3965_v48 = vmax.f32 %v3907_v32, 0.0 }
 0x8bd   : > { %3997 = vst [vmem:[%s6326_s15 + $0x70] sm:$0xff] %v3965_v48  ;;  %v3842_v35 = vpop.f32.mrf.mxu2 }
 0x8be   : > { %v3843_v38 = vadd.f32 %v6317_v47, %v3842_v35 }
 0x8c0   : > { %v3908_v25 = vpop.f32.mrf.mxu3 }
 0x8c1   : > { %v3909_v33 = vadd.f32 %v3908_v25, %v3820_v21 }
 0x8c3   : > { %v3966_v39 = vmax.f32 %v3909_v33, 0.0 }
 0x8c5   : > { %3998 = vst [vmem:[%s6326_s15 + $0x78] sm:$0xff] %v3966_v39  ;;  %v3844_v31 = vpop.f32.mrf.mxu2 }
 0x8c6   : > { %v3845_v59 = vadd.f32 %v6317_v47, %v3844_v31 }
 0x8c8   : > { %v3911_v2 = vpop.f32.mrf.mxu3 }
 0x8c9   : > { %v3912_v61 = vadd.f32 %v3911_v2, %v3823_v45 }
 0x8cb   : > { %v3967_v9 = vmax.f32 %v3912_v61, 0.0 }
 0x8cd   : > { %3999 = vst [vmem:[%s6326_s15 + $0x80] sm:$0xff] %v3967_v9  ;;  %v3847_v62 = vpop.f32.mrf.mxu2 }
 0x8ce   : > { %v3848_v52 = vadd.f32 %v6317_v47, %v3847_v62 }
 0x8d0   : > { %v3913_v8 = vpop.f32.mrf.mxu3 }
 0x8d1   : > { %v3914_v4 = vadd.f32 %v3913_v8, %v3825_v29 }
 0x8d3   : > { %v3968_v10 = vmax.f32 %v3914_v4, 0.0 }
 0x8d5   : > { %4000 = vst [vmem:[%s6326_s15 + $0x88] sm:$0xff] %v3968_v10  ;;  %v3849_v57 = vpop.f32.mrf.mxu2 }
 0x8d6   : > { %v3850_v23 = vadd.f32 %v6317_v47, %v3849_v57 }
 0x8d8   : > { %v3916_v19 = vpop.f32.mrf.mxu3 }
 0x8d9   : > { %v3917_v54 = vadd.f32 %v3916_v19, %v3828_v51 }
 0x8db   : > { %v3969_v6 = vmax.f32 %v3917_v54, 0.0 }
 0x8dd   : > { %4001 = vst [vmem:[%s6326_s15 + $0x90] sm:$0xff] %v3969_v6  ;;  %v3852_v55 = vpop.f32.mrf.mxu2 }
 0x8de   : > { %v3853_v48 = vadd.f32 %v6317_v47, %v3852_v55 }
 0x8e0   : > { %v3918_v12 = vpop.f32.mrf.mxu3 }
 0x8e1   : > { %v3919_v3 = vadd.f32 %v3918_v12, %v3830_v27 }
 0x8e3   : > { %v3970_v42 = vmax.f32 %v3919_v3, 0.0 }
 0x8e5   : > { %4002 = vst [vmem:[%s6326_s15 + $0x98] sm:$0xff] %v3970_v42  ;;  %v3854_v21 = vpop.f32.mrf.mxu2 }
 0x8e6   : > { %v3855_v53 = vadd.f32 %v6317_v47, %v3854_v21 }
 0x8e8   : > { %v3921_v34 = vpop.f32.mrf.mxu3 }
 0x8e9   : > { %v3922_v44 = vadd.f32 %v3921_v34, %v3833_v40 }
 0x8eb   : > { %v3971_v58 = vmax.f32 %v3922_v44, 0.0 }
 0x8ed   : > { %4003 = vst [vmem:[%s6326_s15 + $0xa0] sm:$0xff] %v3971_v58  ;;  %v3857_v61 = vpop.f32.mrf.mxu2 }
 0x8ee   : > { %v3858_v7 = vadd.f32 %v6317_v47, %v3857_v61 }
 0x8f0   : > { %v3923_v36 = vpop.f32.mrf.mxu3 }
 0x8f1   : > { %v3924_v18 = vadd.f32 %v3923_v36, %v3835_v20 }
 0x8f3   : > { %v3972_v11 = vmax.f32 %v3924_v18, 0.0 }
 0x8f5   : > { %4004 = vst [vmem:[%s6326_s15 + $0xa8] sm:$0xff] %v3972_v11  ;;  %v3859_v10 = vpop.f32.mrf.mxu2 }
 0x8f6   : > { %v3860_v51 = vadd.f32 %v6317_v47, %v3859_v10 }
 0x8f8   : > { %v3926_v5 = vpop.f32.mrf.mxu3 }
 0x8f9   : > { %v3927_v41 = vadd.f32 %v3926_v5, %v3838_v14 }
 0x8fb   : > { %v3973_v24 = vmax.f32 %v3927_v41, 0.0 }
 0x8fd   : > { %4005 = vst [vmem:[%s6326_s15 + $0xb0] sm:$0xff] %v3973_v24 }
 0x900   : > { %v3928_v37 = vpop.f32.mrf.mxu3 }
 0x901   : > { %v3929_v60 = vadd.f32 %v3928_v37, %v3840_v22 }
 0x903   : > { %v3974_v16 = vmax.f32 %v3929_v60, 0.0 }
 0x905   : > { %4006 = vst [vmem:[%s6326_s15 + $0xb8] sm:$0xff] %v3974_v16 }
 0x908   : > { %v3931_v46 = vpop.f32.mrf.mxu3 }
 0x909   : > { %v3932_v43 = vadd.f32 %v3931_v46, %v3843_v38 }
 0x90b   : > { %v3975_v49 = vmax.f32 %v3932_v43, 0.0 }
 0x90d   : > { %4007 = vst [vmem:[%s6326_s15 + $0xc0] sm:$0xff] %v3975_v49 }
 0x910   : > { %v3933_v17 = vpop.f32.mrf.mxu3 }
 0x911   : > { %v3934_v30 = vadd.f32 %v3933_v17, %v3845_v59 }
 0x913   : > { %v3976_v13 = vmax.f32 %v3934_v30, 0.0 }
 0x915   : > { %4008 = vst [vmem:[%s6326_s15 + $0xc8] sm:$0xff] %v3976_v13 }
 0x918   : > { %v3936_v0 = vpop.f32.mrf.mxu3 }
 0x919   : > { %v3937_v50 = vadd.f32 %v3936_v0, %v3848_v52 }
 0x91b   : > { %v3977_v26 = vmax.f32 %v3937_v50, 0.0 }
 0x91d   : > { %4009 = vst [vmem:[%s6326_s15 + $0xd0] sm:$0xff] %v3977_v26 }
 0x920   : > { %v3938_v56 = vpop.f32.mrf.mxu3 }
 0x921   : > { %v3939_v32 = vadd.f32 %v3938_v56, %v3850_v23 }
 0x923   : > { %v3978_v63 = vmax.f32 %v3939_v32, 0.0 }
 0x925   : > { %4010 = vst [vmem:[%s6326_s15 + $0xd8] sm:$0xff] %v3978_v63 }
 0x928   : > { %v3941_v25 = vpop.f32.mrf.mxu3 }
 0x929   : > { %v3942_v33 = vadd.f32 %v3941_v25, %v3853_v48 }
 0x92b   : > { %v3979_v39 = vmax.f32 %v3942_v33, 0.0 }
 0x92d   : > { %4011 = vst [vmem:[%s6326_s15 + $0xe0] sm:$0xff] %v3979_v39 }
 0x930   : > { %v3943_v45 = vpop.f32.mrf.mxu3 }
 0x931   : > { %v3944_v2 = vadd.f32 %v3943_v45, %v3855_v53 }
 0x933   : > { %v3980_v9 = vmax.f32 %v3944_v2, 0.0 }
 0x935   : > { %4012 = vst [vmem:[%s6326_s15 + $0xe8] sm:$0xff] %v3980_v9 }
 0x938   : > { %v3946_v29 = vpop.f32.mrf.mxu3 }
 0x939   : > { %v3947_v8 = vadd.f32 %v3946_v29, %v3858_v7 }
 0x93b   : > { %v3981_v4 = vmax.f32 %v3947_v8, 0.0 }
 0x93d   : > { %4013 = vst [vmem:[%s6326_s15 + $0xf0] sm:$0xff] %v3981_v4 }
 0x940   : > { %v3948_v15 = vpop.f32.mrf.mxu3 }
 0x941   : > { %v3949_v19 = vadd.f32 %v3948_v15, %v3860_v51 }
 0x943   : > { %v3982_v54 = vmax.f32 %v3949_v19, 0.0 }
 0x945   : > { %4014 = vst [vmem:[%s6326_s15 + $0xf8] sm:$0xff] %v3982_v54 }
 0x946 PF: > { %s19_s27 = sadd.s32 1, %s4777_s27  }
 0x947   : > { %p16_p5 = scmp.ge.s32.totalorder %s19_s27, 4  }
 0x949   :  { %18 = sbr.rel (!%p16_p5) target bundleno = 1 (0x1), region = 93 }

</bundles_post_ra>
